<compile_context>
chip_gen: v7x
topology: tpu7x:2x2x1
jax: 0.10.0
libtpu: 0.0.40
codegen_flags: <defaults>
</compile_context>

<pallas_src>
import functools
import math

import jax
import jax.numpy as jnp
from jax import lax
from jax.experimental import pallas as pl
from jax.experimental.pallas import tpu as pltpu

EMB = 128
RAW_CH = 3
OUT_CH = 1
RMS_EPS = 1e-6

# Fold the whole batch into one grid step only when the level output is this
# small (rows = B*H*W); bigger levels grid over batch ("parallel") so both v7x
# TensorCores get work.  v5e/v6e (1 TC) lose nothing either way.
_FOLD_ROWS = 512


# ------------------------- in-kernel building blocks ------------------------ #
def _up2x_bilinear(x):
    """Exact 2x bilinear upsample (align_corners=False, edge clamped), NHWC.
    Matches F.interpolate(scale=2, mode='bilinear') and jax.image.resize
    ('bilinear', antialias=False) for exact 2x.  Pure slice/concat/reshape."""
    n, h, w, c = x.shape
    v = x.astype(jnp.float32)

    def neighbors(t, axis):
        size = t.shape[axis]
        first = lax.slice_in_dim(t, 0, 1, axis=axis)
        last = lax.slice_in_dim(t, size - 1, size, axis=axis)
        prev = jnp.concatenate(
            [first, lax.slice_in_dim(t, 0, size - 1, axis=axis)], axis=axis)
        nxt = jnp.concatenate(
            [lax.slice_in_dim(t, 1, size, axis=axis), last], axis=axis)
        return prev, nxt

    # H direction: out[2j] = .25 x[j-1] + .75 x[j]; out[2j+1] = .75 x[j] + .25 x[j+1]
    pv, nx = neighbors(v, 1)
    even = 0.25 * pv + 0.75 * v
    odd = 0.75 * v + 0.25 * nx
    # interleave rows: concat along W then row-major reshape (no 5-D temporaries)
    v = jnp.concatenate([even, odd], axis=2).reshape(n, 2 * h, w, c)
    # W direction
    pv, nx = neighbors(v, 2)
    even = 0.25 * pv + 0.75 * v
    odd = 0.75 * v + 0.25 * nx
    # interleave columns: lane-concat (128-aligned) then reshape
    v = jnp.concatenate([even, odd], axis=-1).reshape(n, 2 * h, 2 * w, c)
    return v.astype(x.dtype)


def _conv3x3_nhwc(x, w_ref):
    """3x3 SAME conv.  x: (n,H,W,Cin) bf16; w_ref: (3, Cin, 3*Cout) bf16 with the
    kh index major and the 3 kw taps packed along N, so each kh is ONE MXU matmul
    with N = 3*Cout.  Returns (n,H,W,Cout) float32 (bias not added)."""
    n, H, W, cin = x.shape
    cout = w_ref.shape[-1] // 3
    rows = n * H * W

    # kh = -1 / +1 taps: zero-row-padded H slices (tile-granular; no masks).
    zrow = jnp.zeros((n, 1, W, cin), x.dtype)
    x_up = jnp.concatenate([zrow, x[:, :H - 1]], axis=1)    # x[h-1]
    x_dn = jnp.concatenate([x[:, 1:], zrow], axis=1)        # x[h+1]

    def tap(v, k):
        return jnp.dot(v.reshape(rows, cin), w_ref[k],
                       preferred_element_type=jnp.float32)

    # single accumulation chain (v7x MRB accumulates in place)
    s = tap(x_up, 0) + tap(x, 1) + tap(x_dn, 2)             # (rows, 3*Cout) f32
    s = s.reshape(n, H, W, 3 * cout)
    s_l = s[..., :cout]              # kw = -1 group
    s_c = s[..., cout:2 * cout]      # kw =  0 group
    s_r = s[..., 2 * cout:]          # kw = +1 group
    zcol = jnp.zeros((n, H, 1, cout), jnp.float32)
    left = jnp.concatenate([zcol, s_l[:, :, :W - 1, :]], axis=2)   # s_l[h, w-1]
    right = jnp.concatenate([s_r[:, :, 1:, :], zcol], axis=2)      # s_r[h, w+1]
    return s_c + left + right


def _fused_conv_kernel(*refs, n_inputs, up_first, stages, eps):
    """[optional in-kernel 2x bilinear upsample of input 0] -> channel concat of
    the inputs (VMEM only) -> chain of conv3x3+bias[+RMSNorm+SiLU] stages.
    All intermediates stay in VMEM; only the final activation goes to HBM."""
    in_refs = refs[:n_inputs]
    o_ref = refs[-1]
    prm = refs[n_inputs:-1]

    xs = []
    for idx, r in enumerate(in_refs):
        v = r[...].astype(jnp.bfloat16)
        if idx == 0 and up_first:
            v = _up2x_bilinear(v)
        xs.append(v)
    cur = xs[0] if len(xs) == 1 else jnp.concatenate(xs, axis=-1)

    i = 0
    for has_norm, act in stages:
        w_ref, b_ref = prm[i], prm[i + 1]
        i += 2
        g = None
        if has_norm:
            g = prm[i][...]
            i += 1
        cout = b_ref.shape[-1]
        acc = _conv3x3_nhwc(cur, w_ref)                       # f32 accumulation
        acc = acc + b_ref[...].reshape(1, 1, 1, cout)
        if g is not None:                                     # RMSNorm (channel)
            ms = jnp.mean(acc * acc, axis=-1, keepdims=True)
            acc = acc * lax.rsqrt(ms + eps) * g.reshape(1, 1, 1, cout)
        if act:                                               # SiLU
            acc = acc * jax.nn.sigmoid(acc)
        cur = acc.astype(jnp.bfloat16)

    o_ref[...] = cur.astype(o_ref.dtype)


# ------------------------------ host wrapper -------------------------------- #
def _vmem_limit(est_bytes):
    try:
        cap = int(pltpu.get_tpu_info().vmem_capacity_bytes)
    except Exception:
        cap = 64 << 20                 # conservative fallback: v7x per-TC VMEM
    return int(min(max(est_bytes, 32 << 20), (cap * 3) // 4))


def fused_convs(inputs, stage_params, *, upsample_first=False, eps=RMS_EPS,
                out_dtype=jnp.bfloat16):
    """inputs: list of NHWC arrays, concatenated along channels inside the
    kernel.  If upsample_first, inputs[0] is at half spatial resolution and is
    2x-bilinear-upsampled in-kernel before the concat.  Each stage dict: 'w'
    (3,3,Cin,Cout) HWIO, 'b' (Cout,), optional 'g' (Cout,) RMSNorm gain, 'act'
    (SiLU).  All stages run inside ONE pallas_call."""
    inputs = [x.astype(jnp.bfloat16) for x in inputs]
    B = inputs[0].shape[0]
    if upsample_first:
        H, W = 2 * inputs[0].shape[1], 2 * inputs[0].shape[2]
    else:
        H, W = inputs[0].shape[1], inputs[0].shape[2]
    for x in inputs[1:]:
        assert x.shape[0] == B and x.shape[1:3] == (H, W), (x.shape, (B, H, W))

    fold = (B * H * W) <= _FOLD_ROWS
    n_img = B if fold else 1
    grid = (1,) if fold else (B,)
    blk4 = (lambda i: (0, 0, 0, 0)) if fold else (lambda i: (i, 0, 0, 0))

    args = list(inputs)
    in_specs = [pl.BlockSpec((n_img,) + x.shape[1:], blk4) for x in inputs]

    cin0 = sum(x.shape[-1] for x in inputs)
    cin, couts, stages, w_bytes = cin0, [], [], 0
    for p in stage_params:
        w = p["w"]
        assert w.shape[:3] == (3, 3, cin), (w.shape, cin)
        cout = w.shape[3]
        # (kh,kw,Cin,Cout) -> (kh, Cin, kw*Cout + co): kw groups packed along N.
        wp = jnp.transpose(w.astype(jnp.bfloat16), (0, 2, 1, 3)).reshape(
            3, cin, 3 * cout)
        args.append(wp)
        in_specs.append(pl.BlockSpec((3, cin, 3 * cout), lambda i: (0, 0, 0)))
        args.append(p["b"].astype(jnp.float32).reshape(1, cout))
        in_specs.append(pl.BlockSpec((1, cout), lambda i: (0, 0)))
        has_norm = p.get("g", None) is not None
        if has_norm:
            args.append(p["g"].astype(jnp.float32).reshape(1, cout))
            in_specs.append(pl.BlockSpec((1, cout), lambda i: (0, 0)))
        stages.append((has_norm, bool(p.get("act", False))))
        couts.append(cout)
        w_bytes += int(wp.size) * 2
        cin = cout

    rows = n_img * H * W
    max_c = max([cin0] + couts)
    est = (rows * max_c * 40                      # live bf16/f32 slabs per stage
           + 4 * rows * (cin0 + couts[-1])        # double-buffered in/out blocks
           + 2 * w_bytes + (4 << 20))

    kernel = functools.partial(_fused_conv_kernel, n_inputs=len(inputs),
                               up_first=bool(upsample_first),
                               stages=tuple(stages), eps=eps)
    return pl.pallas_call(
        kernel,
        out_shape=jax.ShapeDtypeStruct((B, H, W, couts[-1]), out_dtype),
        grid=grid,
        in_specs=in_specs,
        out_specs=pl.BlockSpec((n_img, H, W, couts[-1]), blk4),
        compiler_params=pltpu.CompilerParams(
            dimension_semantics=("arbitrary",) if fold else ("parallel",),
            vmem_limit_bytes=_vmem_limit(est)),
    )(*args)


# ------------------------------ XLA-side glue ------------------------------- #
def _conv3x3_bias_xla(x, p):
    """Plain XLA SAME conv + bias.  Used for the Cin=3 shallow conv (K=3,
    fill/drain dominated) and the five Cout=1 Bside convs (lane-sparse output),
    per the performance review."""
    y = lax.conv_general_dilated(
        x.astype(jnp.float32), p["w"].astype(jnp.float32), (1, 1), "SAME",
        dimension_numbers=("NHWC", "HWIO", "NHWC"))
    return y + p["b"].astype(jnp.float32).reshape(1, 1, 1, -1)


def _resize_like(src, tar_hw):
    """Bilinear resize (non-2x cases on the shallow path only)."""
    B, _, _, C = src.shape
    return jax.image.resize(src.astype(jnp.float32),
                            (B, tar_hw[0], tar_hw[1], C),
                            method="bilinear", antialias=False)


# -------------------------------- parameters -------------------------------- #
def _init_conv(key, cin, cout):
    w = jax.random.normal(key, (3, 3, cin, cout), jnp.float32) / math.sqrt(9 * cin)
    return {"w": w, "b": jnp.zeros((cout,), jnp.float32)}


def _init_crs(key, cin, cout):
    p = _init_conv(key, cin, cout)
    p["g"] = jnp.ones((cout,), jnp.float32)      # RMSNorm gain init = 1
    return p


def init_params(key):
    ks = jax.random.split(key, 16)
    return {
        "dec": [[_init_crs(ks[2 * i], EMB * 2, EMB * 2),
                 _init_crs(ks[2 * i + 1], EMB * 2, EMB)] for i in range(4)],
        "shallow": _init_conv(ks[8], RAW_CH, EMB),
        "up1": _init_crs(ks[9], EMB, EMB),
        "up2": _init_crs(ks[10], EMB, EMB),
        "bside": [_init_conv(ks[11 + i], EMB, OUT_CH) for i in range(5)],
    }


# --------------------------------- forward ---------------------------------- #
def pdf_depth_decoder_forward(params, img, img_feature):
    L1, L2, L3, L4, gfeat = [f.astype(jnp.bfloat16) for f in img_feature]

    def dec(block, prev, skip):
        # torch.cat([upsample_like(prev, skip), skip], C) -> crs -> crs, fused
        # into ONE pallas_call (upsample + concat + both conv stages in VMEM).
        stages = [dict(block[0], act=True), dict(block[1], act=True)]
        if prev.shape[1:3] == skip.shape[1:3]:
            return fused_convs([prev, skip], stages)
        assert (2 * prev.shape[1], 2 * prev.shape[2]) == skip.shape[1:3]
        return fused_convs([prev, skip], stages, upsample_first=True)

    De_L4 = dec(params["dec"][0], gfeat, L4)
    De_L3 = dec(params["dec"][1], De_L4, L3)
    De_L2 = dec(params["dec"][2], De_L3, L2)
    De_L1 = dec(params["dec"][3], De_L2, L1)

    shallow = _conv3x3_bias_xla(img, params["shallow"])         # Cin=3 -> XLA

    # upsample1(_upsample_(final, 2x)) with the 2x upsample fused in-kernel.
    final = De_L1.astype(jnp.float32) + _resize_like(shallow, De_L1.shape[1:3])
    final = fused_convs([final], [dict(params["up1"], act=True)],
                        upsample_first=True)
    # upsample2(_upsample_(final + upsample_like(shallow), 2x)), same fusion.
    final = final.astype(jnp.float32) + _resize_like(shallow, final.shape[1:3])
    final = fused_convs([final], [dict(params["up2"], act=True)],
                        upsample_first=True)
    final = _conv3x3_bias_xla(final, params["bside"][0])

    side_1 = _conv3x3_bias_xla(De_L1, params["bside"][1])
    side_2 = _conv3x3_bias_xla(De_L2, params["bside"][2])
    side_3 = _conv3x3_bias_xla(De_L3, params["bside"][3])
    side_4 = _conv3x3_bias_xla(De_L4, params["bside"][4])
    return [final, side_1, side_2, side_3, side_4]


# ------------------------------ plain-JAX ref -------------------------------- #
def _ref_crs(x, p, eps=RMS_EPS):
    xq = x.astype(jnp.bfloat16).astype(jnp.float32)
    wq = p["w"].astype(jnp.bfloat16).astype(jnp.float32)
    y = lax.conv_general_dilated(xq, wq, (1, 1), "SAME",
                                 dimension_numbers=("NHWC", "HWIO", "NHWC"),
                                 precision=lax.Precision.HIGHEST)
    y = y + p["b"].astype(jnp.float32).reshape(1, 1, 1, -1)
    if p.get("g", None) is not None:
        y = y * lax.rsqrt(jnp.mean(y * y, axis=-1, keepdims=True) + eps) * p["g"]
    if p.get("act", False):
        y = y * jax.nn.sigmoid(y)
    return y


# ----------------------------------- main ------------------------------------ #
if __name__ == "__main__":
    key = jax.random.PRNGKey(0)
    kp, k0, k1, k2, k3, k4, k5, k6, k7, k8 = jax.random.split(key, 10)

    B, H, W = 2, 64, 64
    img = jax.random.normal(k0, (B, H, W, RAW_CH), jnp.float32)
    L1 = jax.random.normal(k1, (B, H // 4, W // 4, EMB), jnp.float32)
    L2 = jax.random.normal(k2, (B, H // 8, W // 8, EMB), jnp.float32)
    L3 = jax.random.normal(k3, (B, H // 16, W // 16, EMB), jnp.float32)
    L4 = jax.random.normal(k4, (B, H // 32, W // 32, EMB), jnp.float32)
    g_feat = jax.random.normal(k5, (B, H // 32, W // 32, EMB), jnp.float32)

    params = init_params(kp)

    # --- self-check 1: fused conv+RMSNorm+SiLU vs plain-JAX reference -------
    xc = jax.random.normal(k6, (2, 16, 16, EMB), jnp.float32)
    pc = {"w": jax.random.normal(k7, (3, 3, EMB, EMB), jnp.float32) * 0.05,
          "b": jnp.full((EMB,), 0.1, jnp.float32),
          "g": jnp.ones((EMB,), jnp.float32), "act": True}
    got = fused_convs([xc], [pc]).astype(jnp.float32)
    ref = _ref_crs(xc, pc)
    got, ref = jax.block_until_ready((got, ref))
    assert jnp.allclose(got, ref, atol=5e-2, rtol=5e-2), \
        float(jnp.max(jnp.abs(got - ref)))

    # --- self-check 2: fused in-kernel 2x bilinear upsample + conv stage ----
    xs = jax.random.normal(k8, (2, 8, 8, EMB), jnp.float32)
    got2 = fused_convs([xs], [pc], upsample_first=True).astype(jnp.float32)
    xq = xs.astype(jnp.bfloat16).astype(jnp.float32)
    up = jax.image.resize(xq, (2, 16, 16, EMB), method="bilinear",
                          antialias=False)
    ref2 = _ref_crs(up, pc)
    got2, ref2 = jax.block_until_ready((got2, ref2))
    assert jnp.allclose(got2, ref2, atol=5e-2, rtol=5e-2), \
        float(jnp.max(jnp.abs(got2 - ref2)))

    # --- full forward --------------------------------------------------------
    fwd = jax.jit(pdf_depth_decoder_forward)
    outs = jax.block_until_ready(fwd(params, img, [L1, L2, L3, L4, g_feat]))

    expected = [(B, H, W, OUT_CH), (B, H // 4, W // 4, OUT_CH),
                (B, H // 8, W // 8, OUT_CH), (B, H // 16, W // 16, OUT_CH),
                (B, H // 32, W // 32, OUT_CH)]
    assert [tuple(o.shape) for o in outs] == expected, [o.shape for o in outs]
    assert all(bool(jnp.all(jnp.isfinite(o.astype(jnp.float32)))) for o in outs)
    print("KERNEL_OK")
</pallas_src>

<mosaic_0001>
module attributes {stable_mosaic.version = 11 : i64} {
  func.func @_fused_conv_kernel(%arg0: i32, %arg1: memref<2x16x16x128xbf16, #tpu.memory_space<vmem>>, %arg2: memref<3x128x384xbf16, #tpu.memory_space<vmem>>, %arg3: memref<1x128xf32, #tpu.memory_space<vmem>>, %arg4: memref<1x128xf32, #tpu.memory_space<vmem>>, %arg5: memref<2x16x16x128xbf16, #tpu.memory_space<vmem>>) attributes {dimension_semantics = [#tpu.dimension_semantics<arbitrary>], iteration_bounds = array<i64: 1>, scalar_prefetch = 0 : i64, scratch_operands = 0 : i64, tpu.core_type = #tpu.core_type<tc>, window_params = [{pipeline_mode = #tpu.pipeline_mode<synchronous>, transform_indices = @transform_0, window_bounds = array<i64: 2, 16, 16, 128>}, {pipeline_mode = #tpu.pipeline_mode<synchronous>, transform_indices = @transform_1, window_bounds = array<i64: 3, 128, 384>}, {pipeline_mode = #tpu.pipeline_mode<synchronous>, transform_indices = @transform_2, window_bounds = array<i64: 1, 128>}, {pipeline_mode = #tpu.pipeline_mode<synchronous>, transform_indices = @transform_3, window_bounds = array<i64: 1, 128>}, {pipeline_mode = #tpu.pipeline_mode<synchronous>, transform_indices = @transform_4, window_bounds = array<i64: 2, 16, 16, 128>}]} {
    %c0 = arith.constant 0 : index
    %c0_0 = arith.constant 0 : index
    %c0_1 = arith.constant 0 : index
    %c0_2 = arith.constant 0 : index
    %0 = vector.load %arg1[%c0, %c0_0, %c0_1, %c0_2] : memref<2x16x16x128xbf16, #tpu.memory_space<vmem>>, vector<2x16x16x128xbf16>
    %c0_3 = arith.constant 0 : index
    %c0_4 = arith.constant 0 : index
    %1 = vector.load %arg4[%c0_3, %c0_4] : memref<1x128xf32, #tpu.memory_space<vmem>>, vector<1x128xf32>
    %cst = arith.constant 0.000000e+00 : bf16
    %2 = vector.broadcast %cst : bf16 to vector<2x1x16x128xbf16>
    %3 = vector.extract_strided_slice %0 {offsets = [0, 0, 0, 0], sizes = [2, 15, 16, 128], strides = [1, 1, 1, 1]} : vector<2x16x16x128xbf16> to vector<2x15x16x128xbf16>
    %4 = tpu.concatenate %2, %3 in 1 : vector<2x1x16x128xbf16>, vector<2x15x16x128xbf16> -> vector<2x16x16x128xbf16>
    %5 = vector.extract_strided_slice %0 {offsets = [0, 1, 0, 0], sizes = [2, 15, 16, 128], strides = [1, 1, 1, 1]} : vector<2x16x16x128xbf16> to vector<2x15x16x128xbf16>
    %6 = tpu.concatenate %5, %2 in 1 : vector<2x15x16x128xbf16>, vector<2x1x16x128xbf16> -> vector<2x16x16x128xbf16>
    %7 = vector.shape_cast %4 : vector<2x16x16x128xbf16> to vector<512x128xbf16>
    %c0_5 = arith.constant 0 : index
    %c0_6 = arith.constant 0 : index
    %c0_7 = arith.constant 0 : index
    %8 = vector.load %arg2[%c0_5, %c0_6, %c0_7] : memref<3x128x384xbf16, #tpu.memory_space<vmem>>, vector<1x128x384xbf16>
    %9 = vector.shape_cast %8 : vector<1x128x384xbf16> to vector<128x384xbf16>
    %cst_8 = arith.constant dense<0.000000e+00> : vector<512x384xf32>
    %10 = tpu.matmul %7, %9, %cst_8 {dimension_numbers = #tpu.dot_dimension_numbers<[1], [0], [0], [1], [0, 0, 1, 1], [], []>} : vector<512x128xbf16>, vector<128x384xbf16>, vector<512x384xf32> -> vector<512x384xf32>
    %11 = vector.shape_cast %0 : vector<2x16x16x128xbf16> to vector<512x128xbf16>
    %c1 = arith.constant 1 : index
    %c0_9 = arith.constant 0 : index
    %c0_10 = arith.constant 0 : index
    %12 = vector.load %arg2[%c1, %c0_9, %c0_10] : memref<3x128x384xbf16, #tpu.memory_space<vmem>>, vector<1x128x384xbf16>
    %13 = vector.shape_cast %12 : vector<1x128x384xbf16> to vector<128x384xbf16>
    %cst_11 = arith.constant dense<0.000000e+00> : vector<512x384xf32>
    %14 = tpu.matmul %11, %13, %cst_11 {dimension_numbers = #tpu.dot_dimension_numbers<[1], [0], [0], [1], [0, 0, 1, 1], [], []>} : vector<512x128xbf16>, vector<128x384xbf16>, vector<512x384xf32> -> vector<512x384xf32>
    %15 = arith.addf %10, %14 : vector<512x384xf32>
    %16 = vector.shape_cast %6 : vector<2x16x16x128xbf16> to vector<512x128xbf16>
    %c2 = arith.constant 2 : index
    %c0_12 = arith.constant 0 : index
    %c0_13 = arith.constant 0 : index
    %17 = vector.load %arg2[%c2, %c0_12, %c0_13] : memref<3x128x384xbf16, #tpu.memory_space<vmem>>, vector<1x128x384xbf16>
    %18 = vector.shape_cast %17 : vector<1x128x384xbf16> to vector<128x384xbf16>
    %cst_14 = arith.constant dense<0.000000e+00> : vector<512x384xf32>
    %19 = tpu.matmul %16, %18, %cst_14 {dimension_numbers = #tpu.dot_dimension_numbers<[1], [0], [0], [1], [0, 0, 1, 1], [], []>} : vector<512x128xbf16>, vector<128x384xbf16>, vector<512x384xf32> -> vector<512x384xf32>
    %20 = arith.addf %15, %19 : vector<512x384xf32>
    %21 = vector.shape_cast %20 : vector<512x384xf32> to vector<2x16x16x384xf32>
    %22 = vector.extract_strided_slice %21 {offsets = [0, 0, 0, 0], sizes = [2, 16, 16, 128], strides = [1, 1, 1, 1]} : vector<2x16x16x384xf32> to vector<2x16x16x128xf32>
    %23 = vector.extract_strided_slice %21 {offsets = [0, 0, 0, 128], sizes = [2, 16, 16, 128], strides = [1, 1, 1, 1]} : vector<2x16x16x384xf32> to vector<2x16x16x128xf32>
    %24 = vector.extract_strided_slice %21 {offsets = [0, 0, 0, 256], sizes = [2, 16, 16, 128], strides = [1, 1, 1, 1]} : vector<2x16x16x384xf32> to vector<2x16x16x128xf32>
    %cst_15 = arith.constant 0.000000e+00 : f32
    %25 = vector.broadcast %cst_15 : f32 to vector<2x16x1x128xf32>
    %26 = vector.extract_strided_slice %22 {offsets = [0, 0, 0, 0], sizes = [2, 16, 15, 128], strides = [1, 1, 1, 1]} : vector<2x16x16x128xf32> to vector<2x16x15x128xf32>
    %27 = tpu.concatenate %25, %26 in 2 : vector<2x16x1x128xf32>, vector<2x16x15x128xf32> -> vector<2x16x16x128xf32>
    %28 = vector.extract_strided_slice %24 {offsets = [0, 0, 1, 0], sizes = [2, 16, 15, 128], strides = [1, 1, 1, 1]} : vector<2x16x16x128xf32> to vector<2x16x15x128xf32>
    %29 = tpu.concatenate %28, %25 in 2 : vector<2x16x15x128xf32>, vector<2x16x1x128xf32> -> vector<2x16x16x128xf32>
    %30 = arith.addf %23, %27 : vector<2x16x16x128xf32>
    %31 = arith.addf %30, %29 : vector<2x16x16x128xf32>
    %c0_16 = arith.constant 0 : index
    %c0_17 = arith.constant 0 : index
    %32 = vector.load %arg3[%c0_16, %c0_17] : memref<1x128xf32, #tpu.memory_space<vmem>>, vector<1x128xf32>
    %33 = vector.shape_cast %32 : vector<1x128xf32> to vector<1x1x1x128xf32>
    %34 = vector.broadcast %33 : vector<1x1x1x128xf32> to vector<2x16x16x128xf32>
    %35 = arith.addf %31, %34 : vector<2x16x16x128xf32>
    %36 = arith.mulf %35, %35 : vector<2x16x16x128xf32>
    %cst_18 = arith.constant dense<0.000000e+00> : vector<2x16x16xf32>
    %37 = vector.multi_reduction <add>, %36, %cst_18 [3] : vector<2x16x16x128xf32> to vector<2x16x16xf32>
    %38 = vector.shape_cast %37 : vector<2x16x16xf32> to vector<2x16x16x1xf32>
    %cst_19 = arith.constant 1.280000e+02 : f32
    %39 = vector.broadcast %cst_19 : f32 to vector<2x16x16x1xf32>
    %40 = arith.divf %38, %39 : vector<2x16x16x1xf32>
    %cst_20 = arith.constant 9.99999997E-7 : f32
    %41 = vector.broadcast %cst_20 : f32 to vector<2x16x16x1xf32>
    %42 = arith.addf %40, %41 : vector<2x16x16x1xf32>
    %43 = math.rsqrt %42 : vector<2x16x16x1xf32>
    %44 = vector.broadcast %43 : vector<2x16x16x1xf32> to vector<2x16x16x128xf32>
    %45 = arith.mulf %35, %44 : vector<2x16x16x128xf32>
    %46 = vector.shape_cast %1 : vector<1x128xf32> to vector<1x1x1x128xf32>
    %47 = vector.broadcast %46 : vector<1x1x1x128xf32> to vector<2x16x16x128xf32>
    %48 = arith.mulf %45, %47 : vector<2x16x16x128xf32>
    %49 = arith.negf %48 : vector<2x16x16x128xf32>
    %50 = math.exp %49 : vector<2x16x16x128xf32>
    %cst_21 = arith.constant 1.000000e+00 : f32
    %51 = vector.broadcast %cst_21 : f32 to vector<2x16x16x128xf32>
    %52 = arith.addf %51, %50 : vector<2x16x16x128xf32>
    %53 = arith.divf %51, %52 : vector<2x16x16x128xf32>
    %54 = arith.mulf %48, %53 : vector<2x16x16x128xf32>
    %55 = arith.truncf %54 : vector<2x16x16x128xf32> to vector<2x16x16x128xbf16>
    %c0_22 = arith.constant 0 : index
    %c0_23 = arith.constant 0 : index
    %c0_24 = arith.constant 0 : index
    %c0_25 = arith.constant 0 : index
    %56 = vector.load %arg5[%c0_22, %c0_23, %c0_24, %c0_25] : memref<2x16x16x128xbf16, #tpu.memory_space<vmem>>, vector<2x16x16x128xbf16>
    tpu.vector_store %arg5[%c0_22, %c0_23, %c0_24, %c0_25], %55 {strides = array<i32>} : memref<2x16x16x128xbf16, #tpu.memory_space<vmem>>, vector<2x16x16x128xbf16>,
    return
  }
  func.func @transform_0(%arg0: i32) -> (i32, i32, i32, i32) {
    %c0_i32 = arith.constant 0 : i32
    %c0_i32_0 = arith.constant 0 : i32
    %c0_i32_1 = arith.constant 0 : i32
    %c0_i32_2 = arith.constant 0 : i32
    %c0_i32_3 = arith.constant 0 : i32
    return %c0_i32, %c0_i32_0, %c0_i32_1, %c0_i32_2 : i32, i32, i32, i32
  }
  func.func @transform_1(%arg0: i32) -> (i32, i32, i32) {
    %c0_i32 = arith.constant 0 : i32
    %c0_i32_0 = arith.constant 0 : i32
    %c0_i32_1 = arith.constant 0 : i32
    %c0_i32_2 = arith.constant 0 : i32
    return %c0_i32, %c0_i32_0, %c0_i32_1 : i32, i32, i32
  }
  func.func @transform_2(%arg0: i32) -> (i32, i32) {
    %c0_i32 = arith.constant 0 : i32
    %c0_i32_0 = arith.constant 0 : i32
    %c0_i32_1 = arith.constant 0 : i32
    return %c0_i32, %c0_i32_0 : i32, i32
  }
  func.func @transform_3(%arg0: i32) -> (i32, i32) {
    %c0_i32 = arith.constant 0 : i32
    %c0_i32_0 = arith.constant 0 : i32
    %c0_i32_1 = arith.constant 0 : i32
    return %c0_i32, %c0_i32_0 : i32, i32
  }
  func.func @transform_4(%arg0: i32) -> (i32, i32, i32, i32) {
    %c0_i32 = arith.constant 0 : i32
    %c0_i32_0 = arith.constant 0 : i32
    %c0_i32_1 = arith.constant 0 : i32
    %c0_i32_2 = arith.constant 0 : i32
    %c0_i32_3 = arith.constant 0 : i32
    return %c0_i32, %c0_i32_0, %c0_i32_1, %c0_i32_2 : i32, i32, i32, i32
  }
}

</mosaic_0001>

<bundles_post_ra>
// kernel: tpu_custom_call.1
= control target key start
LH: loop header
LB: loop body
LE: loop exit
PB: predicated region body
PF: predicated region fallthrough
CT: control target
= control target key end

     0   :  { %9 = vsyncpa [#allocation3], 0  ;;  %s8585_s0 = inlined_call_operand.hbm [shape: bf16[2,16,16,128], index: 0, kind: input, shape index: {}]   ;;  %s8586_s1 = inlined_call_operand.hbm [shape: bf16[3,128,384], index: 1, kind: input, shape index: {}]   ;;  %s8587_s2 = inlined_call_operand.vmem [shape: f32[1,128], index: 2, kind: input, shape index: {}]   ;;  %s8588_s3 = inlined_call_operand.vmem [shape: f32[1,128], index: 3, kind: input, shape index: {}]   ;;  %s8589_s4 = inlined_call_operand.hbm [shape: bf16[2,16,16,128], index: 4, kind: output, shape index: {}]  }
   0x1   :  { %10 = vsyncpa [#allocation6], 0 }
   0x2   :  { %11 = vsyncpa [#allocation4], 0  ;;  %s6776_s15 = smov [#allocation2]   ;;  %s6704_s19 = scalar_lea.hbm %s8585_s0, 4096 }
   0x3   :  { %s17_s16 = sshll.u32 %s6776_s15, 4  ;;  %p6705_p0 = scmp.ne.s32.totalorder %s8585_s0, %s6704_s19  ;;  %s18_s16 = int_to_ptr.vmem [resolvable:$true] %s17_s16 }
   0x4   :  { %p6708_p1 = scmp.lt.u32.totalorder %s6704_s19, %s8585_s0 }
   0x6   :  { %p6710_p2 = pnand %p6708_p1, %p6705_p0 }
   0x8   :  { %6713 = shalt.err (!%p6710_p2)
}
   0x9   :  { %s6714_s24 = scalar_lea.vmem %s18_s16, 4096  ;;  %p6719_p4 = scmp.lt.s32.totalorder %s18_s16, %s18_s16 }
   0xa   :  { %p6715_p3 = scmp.ne.s32.totalorder %s18_s16, %s6714_s24  ;;  %p6720_p5 = scmp.lt.s32.totalorder %s6714_s24, %s6714_s24 }
   0xc   :  { %p6721_p6 = por %p6720_p5, %p6719_p4 }
   0xe   :  { %p6722_p7 = pnand %p6721_p6, %p6715_p3 }
  0x10   :  { %6725 = shalt.err (!%p6722_p7)
}
  0x11   :  { %s6777_s25 = smov 64   ;;  %s6778_s26 = smov 4  }
  0x12   :  { %23 = dma.hbm_to_vmem [thread:$0]  %s8585_s0, 4096, %s18_s16, [#allocation3], %s6777_s25, %s6777_s25, %s6778_s26  }
  0x13   :  { %s6779_s29 = smov [#allocation5]   ;;  %s6726_s7 = scalar_lea.hbm %s8586_s1, 9216 }
  0x14   :  { %s29_s30 = sshll.u32 %s6779_s29, 4  ;;  %p6727_p8 = scmp.ne.s32.totalorder %s8586_s1, %s6726_s7  ;;  %s30_s30 = int_to_ptr.vmem [resolvable:$true] %s29_s30 }
  0x15   :  { %p6730_p9 = scmp.lt.u32.totalorder %s6726_s7, %s8586_s1 }
  0x17   :  { %p6732_p10 = pnand %p6730_p9, %p6727_p8 }
  0x19   :  { %6735 = shalt.err (!%p6732_p10)
}
  0x1a   :  { %s6736_s12 = scalar_lea.vmem %s30_s30, 9216  ;;  %p6741_p12 = scmp.lt.s32.totalorder %s30_s30, %s30_s30 }
  0x1b   :  { %p6737_p11 = scmp.ne.s32.totalorder %s30_s30, %s6736_s12  ;;  %p6742_p13 = scmp.lt.s32.totalorder %s6736_s12, %s6736_s12 }
  0x1d   :  { %p6743_p0 = por %p6742_p13, %p6741_p12 }
  0x1f   :  { %p6744_p1 = pnand %p6743_p0, %p6737_p11 }
  0x21   :  { %6747 = shalt.err (!%p6744_p1)
}
  0x22   :  { %s6780_s0 = smov 192   ;;  %s6781_s13 = smov 12  }
  0x23   :  { %35 = dma.hbm_to_vmem [thread:$0]  %s8586_s1, 9216, %s30_s30, [#allocation6], %s6780_s0, %s6780_s0, %s6781_s13  }
  0x24   :  { %6770 = dma.done.wait [#allocation3], 4096  }
  0x25   :  { %6771 = vsyncadd [#allocation3], 4294963200 }
  0x26   :  { %6772 = dma.done.wait [#allocation6], 9216  }
  0x27   :  { %6773 = vsyncadd [#allocation6], 4294958080  ;;  %v6782_v0 = vmov 0   ;;  %v6184_v1 = vld [vmem:[#allocation5 + $0xc4] ss:$12 sps:$4 sm:$0xff]   ;;  %v6846_v27 = vld [vmem:[#allocation2 + $0x8] sm:$0xff]  }
  0x28   :  { %529 = vmatprep.mubr.bf16.mxu0 %v6782_v0  ;;  %609 = vmatprep.mubr.bf16.mxu1 %v6782_v0  ;;  %v6186_v2 = vld [vmem:[#allocation5 + $0xc0] ss:$12 sps:$4 sm:$0xff]   ;;  %v6187_v3 = vld [vmem:[#allocation5 + $0xdc] ss:$12 sps:$4 sm:$0xff]   ;;  %v6189_v4 = vld [vmem:[#allocation5 + $0xd8] ss:$12 sps:$4 sm:$0xff]  }
  0x29   :  { %497 = vmatprep.subr.bf16.mxu0 %v6184_v1  ;;  %5776 = vmatprep.subr.bf16.mxu1 %v6184_v1  ;;  %v6190_v5 = vld [vmem:[#allocation5 + $0xf4] ss:$12 sps:$4 sm:$0xff]   ;;  %v6192_v6 = vld [vmem:[#allocation5 + $0xf0] ss:$12 sps:$4 sm:$0xff]   ;;  %v6193_v7 = vld [vmem:[#allocation5 + $0x10c] ss:$12 sps:$4 sm:$0xff]  }
  0x2a   :  { %498 = vmatpush1.bf16.msra.mxu0 %v6186_v2  ;;  %5784 = vmatpush1.bf16.msra.mxu1 %v6186_v2  ;;  %v6195_v8 = vld [vmem:[#allocation5 + $0x108] ss:$12 sps:$4 sm:$0xff]   ;;  %v6196_v9 = vld [vmem:[#allocation5 + $0x124] ss:$12 sps:$4 sm:$0xff]   ;;  %v6198_v10 = vld [vmem:[#allocation5 + $0x120] ss:$12 sps:$4 sm:$0xff]  }
  0x2b   :  { %499 = vmatprep.subr.bf16.mxu0 %v6187_v3  ;;  %5777 = vmatprep.subr.bf16.mxu1 %v6187_v3  ;;  %v6199_v11 = vld [vmem:[#allocation5 + $0x13c] ss:$12 sps:$4 sm:$0xff]   ;;  %v6201_v12 = vld [vmem:[#allocation5 + $0x138] ss:$12 sps:$4 sm:$0xff]   ;;  %v6202_v13 = vld [vmem:[#allocation5 + $0x154] ss:$12 sps:$4 sm:$0xff]  }
  0x2c   :  { %v6204_v14 = vld [vmem:[#allocation5 + $0x150] ss:$12 sps:$4 sm:$0xff]   ;;  %v6205_v15 = vld [vmem:[#allocation5 + $0x16c] ss:$12 sps:$4 sm:$0xff]   ;;  %v6207_v16 = vld [vmem:[#allocation5 + $0x168] ss:$12 sps:$4 sm:$0xff]  }
  0x2d   :  { %v6210_v17 = vld [vmem:[#allocation5 + $0xc8] ss:$12 sps:$4 sm:$0xff]   ;;  %v6213_v18 = vld [vmem:[#allocation5 + $0x4] ss:$12 sps:$4 sm:$0xff]   ;;  %v6211_v21 = vld [vmem:[#allocation5] ss:$12 sps:$4 sm:$0xff]  }
  0x2e   :  { %500 = vmatpush1.bf16.msra.mxu0 %v6189_v4  ;;  %5785 = vmatpush1.bf16.msra.mxu1 %v6189_v4  ;;  %v6838_v19 = vld [vmem:[#allocation2] sm:$0xff]   ;;  %v6218_v22 = vld [vmem:[#allocation5 + $0x1c] ss:$12 sps:$4 sm:$0xff]   ;;  %v6229_v30 = vld [vmem:[#allocation5 + $0x4c] ss:$12 sps:$4 sm:$0xff]   ;;  %vm2972_vm0 = vcmask 1040384  }
  0x2f   :  { %501 = vmatprep.subr.bf16.mxu0 %v6190_v5  ;;  %5778 = vmatprep.subr.bf16.mxu1 %v6190_v5  ;;  %v6840_v20 = vld [vmem:[#allocation2 + $0x40] sm:$0xff]   ;;  %v6848_v28 = vld [vmem:[#allocation2 + $0x48] sm:$0xff]   ;;  %v6221_v29 = vld [vmem:[#allocation5 + $0x30] ss:$12 sps:$4 sm:$0xff]   ;;  %vm3229_vm1 = vcmask 1046528  }
  0x30   :  { %v6226_v23 = vld [vmem:[#allocation5 + $0xe0] ss:$12 sps:$4 sm:$0xff]   ;;  %v6216_v24 = vld [vmem:[#allocation5 + $0x18] ss:$12 sps:$4 sm:$0xff]   ;;  %v6227_v31 = vld [vmem:[#allocation5 + $0x48] ss:$12 sps:$4 sm:$0xff]  }
  0x31   :  { %v6223_v25 = vld [vmem:[#allocation5 + $0x34] ss:$12 sps:$4 sm:$0xff]   ;;  %v6242_v26 = vld [vmem:[#allocation5 + $0xf8] ss:$12 sps:$4 sm:$0xff]   ;;  %v6256_v33 = vld [vmem:[#allocation5 + $0x110] ss:$12 sps:$4 sm:$0xff]  }
  0x32   :  { %502 = vmatpush1.bf16.msra.mxu0 %v6192_v6  ;;  %5786 = vmatpush1.bf16.msra.mxu1 %v6192_v6  ;;  %v6854_v32 = vld [vmem:[#allocation2 + $0x10] sm:$0xff]   ;;  %v6232_v36 = vld [vmem:[#allocation5 + $0x60] ss:$12 sps:$4 sm:$0xff]   ;;  %v6239_v38 = vld [vmem:[#allocation5 + $0x7c] ss:$12 sps:$4 sm:$0xff]  }
  0x33   :  { %503 = vmatprep.subr.bf16.mxu0 %v6193_v7  ;;  %5779 = vmatprep.subr.bf16.mxu1 %v6193_v7  ;;  %v6234_v34 = vld [vmem:[#allocation5 + $0x64] ss:$12 sps:$4 sm:$0xff]   ;;  %v6260_v37 = vld [vmem:[#allocation5 + $0x128] ss:$12 sps:$4 sm:$0xff]   ;;  %v6862_v40 = vld [vmem:[#allocation2 + $0x18] sm:$0xff]  }
  0x34   :  { %v6856_v35 = vld [vmem:[#allocation2 + $0x50] sm:$0xff]   ;;  %v6237_v39 = vld [vmem:[#allocation5 + $0x78] ss:$12 sps:$4 sm:$0xff]   ;;  %v6267_v42 = vld [vmem:[#allocation5 + $0x140] ss:$12 sps:$4 sm:$0xff]  }
  0x35   :  { %v6245_v41 = vld [vmem:[#allocation5 + $0x94] ss:$12 sps:$4 sm:$0xff]   ;;  %v6864_v43 = vld [vmem:[#allocation2 + $0x58] sm:$0xff]   ;;  %v6254_v50 = vld [vmem:[#allocation5 + $0x184] ss:$12 sps:$4 sm:$0xff]  }
  0x36   :  { %504 = vmatpush1.bf16.msra.mxu0 %v6195_v8  ;;  %5787 = vmatpush1.bf16.msra.mxu1 %v6195_v8  ;;  %v6243_v44 = vld [vmem:[#allocation5 + $0x90] ss:$12 sps:$4 sm:$0xff]   ;;  %v6250_v45 = vld [vmem:[#allocation5 + $0xac] ss:$12 sps:$4 sm:$0xff]   ;;  %v6870_v47 = vld [vmem:[#allocation2 + $0x20] sm:$0xff]  }
  0x37   :  { %505 = vmatprep.subr.bf16.mxu0 %v6196_v9  ;;  %5780 = vmatprep.subr.bf16.mxu1 %v6196_v9  ;;  %v6274_v46 = vld [vmem:[#allocation5 + $0x158] ss:$12 sps:$4 sm:$0xff]   ;;  %v6248_v49 = vld [vmem:[#allocation5 + $0xa8] ss:$12 sps:$4 sm:$0xff]   ;;  %v6281_v53 = vld [vmem:[#allocation5 + $0x170] ss:$12 sps:$4 sm:$0xff]  }
  0x38   :  { %v6872_v48 = vld [vmem:[#allocation2 + $0x60] sm:$0xff]   ;;  %v6878_v51 = vld [vmem:[#allocation2 + $0x28] sm:$0xff]   ;;  %v6886_v54 = vld [vmem:[#allocation2 + $0x30] sm:$0xff]  }
  0x39   :  { %v6880_v52 = vld [vmem:[#allocation2 + $0x68] sm:$0xff]   ;;  %v6888_v55 = vld [vmem:[#allocation2 + $0x70] sm:$0xff]   ;;  %v6894_v56 = vld [vmem:[#allocation2 + $0x38] sm:$0xff]  }
  0x3a   :  { %506 = vmatpush1.bf16.msra.mxu0 %v6198_v10  ;;  %5788 = vmatpush1.bf16.msra.mxu1 %v6198_v10  ;;  %v6896_v57 = vld [vmem:[#allocation2 + $0x78] sm:$0xff]   ;;  %v6902_v58 = vld [vmem:[#allocation2 + $0x80] sm:$0xff]   ;;  %v6906_v61 = vld [vmem:[#allocation5 + $0x8] ss:$12 sps:$4 sm:$0xff]  }
  0x3b   :  { %507 = vmatprep.subr.bf16.mxu0 %v6199_v11  ;;  %5781 = vmatprep.subr.bf16.mxu1 %v6199_v11  ;;  %v6252_v59 = vld [vmem:[#allocation5 + $0x180] ss:$12 sps:$4 sm:$0xff]   ;;  %v6263_v60 = vld [vmem:[#allocation5 + $0x19c] ss:$12 sps:$4 sm:$0xff]   ;;  %v6261_v62 = vld [vmem:[#allocation5 + $0x198] ss:$12 sps:$4 sm:$0xff]  }
  0x3c   :  { %v6271_v63 = vld [vmem:[#allocation5 + $0x1b4] ss:$12 sps:$4 sm:$0xff]   ;;  %v6911_v1 = vld [vmem:[#allocation2 + $0x88] sm:$0xff]   ;;  %v6269_v2 = vld [vmem:[#allocation5 + $0x1b0] ss:$12 sps:$4 sm:$0xff]  }
  0x3d   :  { %v6279_v3 = vld [vmem:[#allocation5 + $0x1cc] ss:$12 sps:$4 sm:$0xff]   ;;  %v6277_v4 = vld [vmem:[#allocation5 + $0x1c8] ss:$12 sps:$4 sm:$0xff]   ;;  %v6287_v5 = vld [vmem:[#allocation5 + $0x1e4] ss:$12 sps:$4 sm:$0xff]  }
  0x3e   :  { %508 = vmatpush1.bf16.msra.mxu0 %v6201_v12  ;;  %5789 = vmatpush1.bf16.msra.mxu1 %v6201_v12  ;;  %v6917_v6 = vld [vmem:[#allocation2 + $0x90] sm:$0xff]   ;;  %v6285_v7 = vld [vmem:[#allocation5 + $0x1e0] ss:$12 sps:$4 sm:$0xff]   ;;  %v6923_v8 = vld [vmem:[#allocation2 + $0x98] sm:$0xff]  }
  0x3f   :  { %509 = vmatprep.subr.bf16.mxu0 %v6202_v13  ;;  %5782 = vmatprep.subr.bf16.mxu1 %v6202_v13  ;;  %v6929_v9 = vld [vmem:[#allocation2 + $0xa0] sm:$0xff]   ;;  %v6292_v11 = vld [vmem:[#allocation5 + $0x1fc] ss:$12 sps:$4 sm:$0xff]   ;;  %v6941_v13 = vld [vmem:[#allocation2 + $0xb0] sm:$0xff]  }
  0x40   :  { %v6290_v10 = vld [vmem:[#allocation5 + $0x1f8] ss:$12 sps:$4 sm:$0xff]   ;;  %v6935_v12 = vld [vmem:[#allocation2 + $0xa8] sm:$0xff]  }
  0x42   :  { %510 = vmatpush1.bf16.msra.mxu0 %v6204_v14  ;;  %5790 = vmatpush1.bf16.msra.mxu1 %v6204_v14  ;;  %v6947_v14 = vld [vmem:[#allocation2 + $0xb8] sm:$0xff]  }
  0x43   :  { %511 = vmatprep.subr.bf16.mxu0 %v6205_v15  ;;  %5783 = vmatprep.subr.bf16.mxu1 %v6205_v15  ;;  %v6953_v15 = vld [vmem:[#allocation2 + $0xc0] sm:$0xff]  }
  0x46   :  { %512 = vmatpush1.bf16.msra.mxu0 %v6207_v16  ;;  %5791 = vmatpush1.bf16.msra.mxu1 %v6207_v16  ;;  %v6295_v16 = vld [vmem:[#allocation5 + $0x210] ss:$12 sps:$4 sm:$0xff]  }
  0x47   :  { %5536 = vmatprep.subr.bf16.mxu1 %v6210_v17  ;;  %1267 = vmatprep.subr.bf16.mxu0 %v6213_v18  ;;  %v6959_v18 = vld [vmem:[#allocation2 + $0xc8] sm:$0xff]  }
  0x49   :  { %530 = vmatmul.mubr.bf16.vlgmr.msra.gmra.mrb[0].mxu0 %v6838_v19  ;;  %610 = vmatmul.mubr.bf16.vlgmr.msra.gmra.mrb[0].mxu1 %v6840_v20 }
  0x4a   :  { %5537 = vmatpush3.bf16.msra.mxu1 %v6210_v17  ;;  %1268 = vmatpush1.bf16.msra.mxu0 %v6211_v21  ;;  %v6297_v17 = vld [vmem:[#allocation5 + $0x214] ss:$12 sps:$4 sm:$0xff]  }
  0x4b   :  { %539 = vmatprep.mubr.bf16.mxu0 %v6782_v0  ;;  %619 = vmatprep.mubr.bf16.mxu1 %v6782_v0  ;;  %v6965_v21 = vld [vmem:[#allocation2 + $0xd0] sm:$0xff]  }
  0x4c   :  { %1269 = vmatprep.subr.bf16.mxu0 %v6218_v22  ;;  %5538 = vmatprep.subr.bf16.mxu1 %v6226_v23  ;;  %v6971_v22 = vld [vmem:[#allocation2 + $0xd8] sm:$0xff]  }
  0x4e   :  { %1270 = vmatpush1.bf16.msra.mxu0 %v6216_v24  ;;  %5539 = vmatpush3.bf16.msra.mxu1 %v6226_v23  ;;  %v6977_v23 = vld [vmem:[#allocation2 + $0xe0] sm:$0xff]   ;;  %v6300_v24 = vld [vmem:[#allocation5 + $0x228] ss:$12 sps:$4 sm:$0xff]  }
  0x4f   :  { %1271 = vmatprep.subr.bf16.mxu0 %v6223_v25  ;;  %5540 = vmatprep.subr.bf16.mxu1 %v6242_v26  ;;  %v6302_v25 = vld [vmem:[#allocation5 + $0x22c] ss:$12 sps:$4 sm:$0xff]  }
  0x51   :  { %540 = vmatmul.mubr.bf16.gmra.mrb[4].mxu0 %v6846_v27  ;;  %620 = vmatmul.mubr.bf16.gmra.mrb[4].mxu1 %v6848_v28 }
  0x52   :  { %549 = vmatprep.mubr.bf16.mxu0 %v6782_v0  ;;  %629 = vmatprep.mubr.bf16.mxu1 %v6782_v0 }
  0x53   :  { %1272 = vmatpush1.bf16.msra.mxu0 %v6221_v29  ;;  %5541 = vmatpush3.bf16.msra.mxu1 %v6242_v26  ;;  %v6983_v26 = vld [vmem:[#allocation2 + $0xe8] sm:$0xff]   ;;  %v6989_v29 = vld [vmem:[#allocation2 + $0xf0] sm:$0xff]  }
  0x54   :  { %1273 = vmatprep.subr.bf16.mxu0 %v6229_v30  ;;  %5542 = vmatprep.subr.bf16.mxu1 %v6256_v33  ;;  %v6995_v30 = vld [vmem:[#allocation2 + $0xf8] sm:$0xff]  }
  0x57   :  { %1274 = vmatpush1.bf16.msra.mxu0 %v6227_v31  ;;  %5543 = vmatpush3.bf16.msra.mxu1 %v6256_v33  ;;  %v6288_v31 = vld [vmem:[#allocation5 + $0x20] ss:$12 sps:$4 sm:$0xff]   ;;  %v6289_v33 = vld [vmem:[#allocation5 + $0x38] ss:$12 sps:$4 sm:$0xff]  }
  0x58   :  { %1275 = vmatprep.subr.bf16.mxu0 %v6234_v34  ;;  %5544 = vmatprep.subr.bf16.mxu1 %v6260_v37  ;;  %v6293_v34 = vld [vmem:[#allocation5 + $0x50] ss:$12 sps:$4 sm:$0xff]  }
  0x59   :  { %550 = vmatmul.mubr.bf16.gmra.mrb[8].mxu0 %v6854_v32  ;;  %630 = vmatmul.mubr.bf16.gmra.mrb[8].mxu1 %v6856_v35 }
  0x5a   :  { %559 = vmatprep.mubr.bf16.mxu0 %v6782_v0  ;;  %639 = vmatprep.mubr.bf16.mxu1 %v6782_v0 }
  0x5b   :  { %1276 = vmatpush1.bf16.msra.mxu0 %v6232_v36  ;;  %5545 = vmatpush3.bf16.msra.mxu1 %v6260_v37  ;;  %v6294_v36 = vld [vmem:[#allocation5 + $0x68] ss:$12 sps:$4 sm:$0xff]   ;;  %v6298_v37 = vld [vmem:[#allocation5 + $0x80] ss:$12 sps:$4 sm:$0xff]  }
  0x5c   :  { %1277 = vmatprep.subr.bf16.mxu0 %v6239_v38  ;;  %5546 = vmatprep.subr.bf16.mxu1 %v6267_v42 }
  0x5f   :  { %1278 = vmatpush1.bf16.msra.mxu0 %v6237_v39  ;;  %5547 = vmatpush3.bf16.msra.mxu1 %v6267_v42  ;;  %v6299_v39 = vld [vmem:[#allocation5 + $0x98] ss:$12 sps:$4 sm:$0xff]  }
  0x60   :  { %1279 = vmatprep.subr.bf16.mxu0 %v6245_v41  ;;  %5548 = vmatprep.subr.bf16.mxu1 %v6274_v46 }
  0x61   :  { %560 = vmatmul.mubr.bf16.gmra.mrb[12].mxu0 %v6862_v40  ;;  %640 = vmatmul.mubr.bf16.gmra.mrb[12].mxu1 %v6864_v43 }
  0x62   :  { %569 = vmatprep.mubr.bf16.mxu0 %v6782_v0  ;;  %649 = vmatprep.mubr.bf16.mxu1 %v6782_v0 }
  0x63   :  { %1280 = vmatpush1.bf16.msra.mxu0 %v6243_v44  ;;  %5549 = vmatpush3.bf16.msra.mxu1 %v6274_v46 }
  0x64   :  { %1281 = vmatprep.subr.bf16.mxu0 %v6250_v45  ;;  %5550 = vmatprep.subr.bf16.mxu1 %v6281_v53  ;;  %v6303_v45 = vld [vmem:[#allocation5 + $0xb0] ss:$12 sps:$4 sm:$0xff]  }
  0x67   :  { %1282 = vmatpush1.bf16.msra.mxu0 %v6248_v49  ;;  %5551 = vmatpush3.bf16.msra.mxu1 %v6281_v53  ;;  %v7028_v49 = vld [vmem:[#allocation5 + $0x188] ss:$12 sps:$4 sm:$0xff]  }
  0x68   :  { %2074 = vmatprep.subr.bf16.mxu0 %v6254_v50  ;;  %5616 = vmatprep.subr.bf16.mxu1 %v6906_v61 }
  0x69   :  { %570 = vmatmul.mubr.bf16.gmra.mrb[16].mxu0 %v6870_v47  ;;  %650 = vmatmul.mubr.bf16.gmra.mrb[16].mxu1 %v6872_v48 }
  0x6a   :  { %579 = vmatprep.mubr.bf16.mxu0 %v6782_v0  ;;  %659 = vmatprep.mubr.bf16.mxu1 %v6782_v0 }
  0x71   :  { %580 = vmatmul.mubr.bf16.gmra.mrb[20].mxu0 %v6878_v51  ;;  %660 = vmatmul.mubr.bf16.gmra.mrb[20].mxu1 %v6880_v52 }
  0x72   :  { %589 = vmatprep.mubr.bf16.mxu0 %v6782_v0  ;;  %669 = vmatprep.mubr.bf16.mxu1 %v6782_v0 }
  0x79   :  { %590 = vmatmul.mubr.bf16.gmra.mrb[24].mxu0 %v6886_v54  ;;  %670 = vmatmul.mubr.bf16.gmra.mrb[24].mxu1 %v6888_v55 }
  0x7a   :  { %599 = vmatprep.mubr.bf16.mxu0 %v6782_v0  ;;  %679 = vmatprep.mubr.bf16.mxu1 %v6782_v0 }
  0x81   :  { %600 = vmatmul.mubr.bf16.gmra.mrb[28].mxu0 %v6894_v56  ;;  %680 = vmatmul.mubr.bf16.gmra.mrb[28].mxu1 %v6896_v57 }
  0x82   :  { %689 = vmatprep.mubr.bf16.mxu1 %v6782_v0  ;;  %1299 = vmatprep.mubr.bf16.mxu0 %v6782_v0 }
  0x89   :  { %690 = vmatmul.mubr.bf16.gmra.mrb[32].mxu1 %v6902_v58  ;;  %1300 = vmatmul.mubr.bf16.vlgmr.msra.gmra.mrb[0].mxu0 %v6782_v0 }
  0x8a   :  { %2075 = vmatpush1.bf16.msra.mxu0 %v6252_v59  ;;  %699 = vmatprep.mubr.bf16.mxu1 %v6782_v0 }
  0x8b   :  { %1309 = vmatprep.mubr.bf16.mxu0 %v6782_v0  ;;  %2076 = vmatprep.subr.bf16.mxu0 %v6263_v60 }
  0x8e   :  { %2077 = vmatpush1.bf16.msra.mxu0 %v6261_v62 }
  0x8f   :  { %2078 = vmatprep.subr.bf16.mxu0 %v6271_v63 }
  0x91   :  { %700 = vmatmul.mubr.bf16.gmra.mrb[36].mxu1 %v6911_v1  ;;  %1310 = vmatmul.mubr.bf16.gmra.mrb[4].mxu0 %v6838_v19 }
  0x92   :  { %709 = vmatprep.mubr.bf16.mxu1 %v6782_v0  ;;  %1319 = vmatprep.mubr.bf16.mxu0 %v6782_v0 }
  0x93   :  { %2079 = vmatpush1.bf16.msra.mxu0 %v6269_v2 }
  0x94   :  { %2080 = vmatprep.subr.bf16.mxu0 %v6279_v3 }
  0x97   :  { %2081 = vmatpush1.bf16.msra.mxu0 %v6277_v4 }
  0x98   :  { %2082 = vmatprep.subr.bf16.mxu0 %v6287_v5 }
  0x99   :  { %710 = vmatmul.mubr.bf16.gmra.mrb[40].mxu1 %v6917_v6  ;;  %1320 = vmatmul.mubr.bf16.gmra.mrb[8].mxu0 %v6846_v27 }
  0x9a   :  { %719 = vmatprep.mubr.bf16.mxu1 %v6782_v0  ;;  %1329 = vmatprep.mubr.bf16.mxu0 %v6782_v0 }
  0x9b   :  { %2083 = vmatpush1.bf16.msra.mxu0 %v6285_v7 }
  0x9c   :  { %2084 = vmatprep.subr.bf16.mxu0 %v6292_v11 }
  0x9f   :  { %2085 = vmatpush1.bf16.msra.mxu0 %v6290_v10 }
  0xa0   :  { %2086 = vmatprep.subr.bf16.mxu0 %v6297_v17 }
  0xa1   :  { %720 = vmatmul.mubr.bf16.gmra.mrb[44].mxu1 %v6923_v8  ;;  %1330 = vmatmul.mubr.bf16.gmra.mrb[12].mxu0 %v6854_v32 }
  0xa2   :  { %729 = vmatprep.mubr.bf16.mxu1 %v6782_v0  ;;  %1339 = vmatprep.mubr.bf16.mxu0 %v6782_v0 }
  0xa3   :  { %2087 = vmatpush1.bf16.msra.mxu0 %v6295_v16 }
  0xa4   :  { %2088 = vmatprep.subr.bf16.mxu0 %v6302_v25 }
  0xa7   :  { %2089 = vmatpush1.bf16.msra.mxu0 %v6300_v24 }
  0xa9   :  { %730 = vmatmul.mubr.bf16.gmra.mrb[48].mxu1 %v6929_v9  ;;  %1340 = vmatmul.mubr.bf16.gmra.mrb[16].mxu0 %v6862_v40 }
  0xaa   :  { %739 = vmatprep.mubr.bf16.mxu1 %v6782_v0  ;;  %1349 = vmatprep.mubr.bf16.mxu0 %v6782_v0 }
  0xb1   :  { %740 = vmatmul.mubr.bf16.gmra.mrb[52].mxu1 %v6935_v12  ;;  %1350 = vmatmul.mubr.bf16.gmra.mrb[20].mxu0 %v6870_v47 }
  0xb2   :  { %749 = vmatprep.mubr.bf16.mxu1 %v6782_v0  ;;  %1359 = vmatprep.mubr.bf16.mxu0 %v6782_v0 }
  0xb9   :  { %750 = vmatmul.mubr.bf16.gmra.mrb[56].mxu1 %v6941_v13  ;;  %1360 = vmatmul.mubr.bf16.gmra.mrb[24].mxu0 %v6878_v51 }
  0xba   :  { %759 = vmatprep.mubr.bf16.mxu1 %v6782_v0  ;;  %1369 = vmatprep.mubr.bf16.mxu0 %v6782_v0 }
  0xc1   :  { %760 = vmatmul.mubr.bf16.gmra.mrb[60].mxu1 %v6947_v14  ;;  %1370 = vmatmul.mubr.bf16.gmra.mrb[28].mxu0 %v6886_v54 }
  0xc2   :  { %769 = vmatprep.mubr.bf16.mxu1 %v6782_v0  ;;  %1379 = vmatprep.mubr.bf16.mxu0 %v6782_v0 }
  0xc9   :  { %770 = vmatmul.mubr.bf16.gmra.mrb[64].mxu1 %v6953_v15  ;;  %1380 = vmatmul.mubr.bf16.gmra.mrb[32].mxu0 %v6894_v56 }
  0xca   :  { %779 = vmatprep.mubr.bf16.mxu1 %v6782_v0  ;;  %1389 = vmatprep.mubr.bf16.mxu0 %v6782_v0 }
  0xd1   :  { %780 = vmatmul.mubr.bf16.gmra.mrb[68].mxu1 %v6959_v18  ;;  %1390 = vmatmul.mubr.bf16.gmra.mrb[36].mxu0 %v6840_v20 }
  0xd2   :  { %789 = vmatprep.mubr.bf16.mxu1 %v6782_v0  ;;  %1399 = vmatprep.mubr.bf16.mxu0 %v6782_v0 }
  0xd9   :  { %790 = vmatmul.mubr.bf16.gmra.mrb[72].mxu1 %v6965_v21  ;;  %1400 = vmatmul.mubr.bf16.gmra.mrb[40].mxu0 %v6848_v28 }
  0xda   :  { %799 = vmatprep.mubr.bf16.mxu1 %v6782_v0  ;;  %1409 = vmatprep.mubr.bf16.mxu0 %v6782_v0 }
  0xe1   :  { %800 = vmatmul.mubr.bf16.gmra.mrb[76].mxu1 %v6971_v22  ;;  %1410 = vmatmul.mubr.bf16.gmra.mrb[44].mxu0 %v6856_v35 }
  0xe2   :  { %809 = vmatprep.mubr.bf16.mxu1 %v6782_v0  ;;  %1419 = vmatprep.mubr.bf16.mxu0 %v6782_v0 }
  0xe9   :  { %810 = vmatmul.mubr.bf16.gmra.mrb[80].mxu1 %v6977_v23  ;;  %1420 = vmatmul.mubr.bf16.gmra.mrb[48].mxu0 %v6864_v43 }
  0xea   :  { %819 = vmatprep.mubr.bf16.mxu1 %v6782_v0  ;;  %1429 = vmatprep.mubr.bf16.mxu0 %v6782_v0 }
  0xf1   :  { %820 = vmatmul.mubr.bf16.gmra.mrb[84].mxu1 %v6983_v26  ;;  %1430 = vmatmul.mubr.bf16.gmra.mrb[52].mxu0 %v6872_v48 }
  0xf2   :  { %829 = vmatprep.mubr.bf16.mxu1 %v6782_v0  ;;  %1439 = vmatprep.mubr.bf16.mxu0 %v6782_v0 }
  0xf9   :  { %830 = vmatmul.mubr.bf16.gmra.mrb[88].mxu1 %v6989_v29  ;;  %1440 = vmatmul.mubr.bf16.gmra.mrb[56].mxu0 %v6880_v52 }
  0xfa   :  { %839 = vmatprep.mubr.bf16.mxu1 %v6782_v0  ;;  %1449 = vmatprep.mubr.bf16.mxu0 %v6782_v0 }
 0x101   :  { %840 = vmatmul.mubr.bf16.gmra.mrb[92].mxu1 %v6995_v30  ;;  %1450 = vmatmul.mubr.bf16.gmra.mrb[60].mxu0 %v6888_v55 }
 0x102   :  { %5552 = vmatprep.mubr.bf16.mxu1 %v6838_v19  ;;  %1459 = vmatprep.mubr.bf16.mxu0 %v6782_v0 }
 0x109   :  { %5553 = vmatmul.mubr.bf16.vlgmr.msra.gmra.mrb[96].mxu1 %v6846_v27  ;;  %1460 = vmatmul.mubr.bf16.gmra.mrb[64].mxu0 %v6782_v0 }
 0x10a   :  { %5617 = vmatpush3.bf16.msra.mxu1 %v6906_v61  ;;  %5556 = vmatprep.mubr.bf16.mxu1 %v6854_v32 }
 0x10b   :  { %1469 = vmatprep.mubr.bf16.mxu0 %v6782_v0  ;;  %5618 = vmatprep.subr.bf16.mxu1 %v6288_v31 }
 0x10e   :  { %5619 = vmatpush3.bf16.msra.mxu1 %v6288_v31 }
 0x10f   :  { %5620 = vmatprep.subr.bf16.mxu1 %v6289_v33 }
 0x111   :  { %5557 = vmatmul.mubr.bf16.gmra.mrb[100].mxu1 %v6862_v40  ;;  %1470 = vmatmul.mubr.bf16.gmra.mrb[68].mxu0 %v6902_v58 }
 0x112   :  { %5560 = vmatprep.mubr.bf16.mxu1 %v6870_v47  ;;  %1479 = vmatprep.mubr.bf16.mxu0 %v6782_v0 }
 0x113   :  { %5621 = vmatpush3.bf16.msra.mxu1 %v6289_v33 }
 0x114   :  { %5622 = vmatprep.subr.bf16.mxu1 %v6293_v34 }
 0x117   :  { %5623 = vmatpush3.bf16.msra.mxu1 %v6293_v34 }
 0x118   :  { %5624 = vmatprep.subr.bf16.mxu1 %v6294_v36 }
 0x119   :  { %5561 = vmatmul.mubr.bf16.gmra.mrb[104].mxu1 %v6878_v51  ;;  %1480 = vmatmul.mubr.bf16.gmra.mrb[72].mxu0 %v6911_v1 }
 0x11a   :  { %5564 = vmatprep.mubr.bf16.mxu1 %v6886_v54  ;;  %1489 = vmatprep.mubr.bf16.mxu0 %v6782_v0 }
 0x11b   :  { %5625 = vmatpush3.bf16.msra.mxu1 %v6294_v36 }
 0x11c   :  { %v7014_v38 = vpop.f32.mrb[0].mxu1  ;;  %5626 = vmatprep.subr.bf16.mxu1 %v6298_v37 }
 0x11d   :  { %v7016_v41 = vpop.f32.mrb[1].mxu1 }
 0x11e   :  { %v7018_v42 = vpop.f32.mrb[2].mxu1 }
 0x11f   :  { %v7020_v44 = vpop.f32.mrb[3].mxu1  ;;  %5627 = vmatpush3.bf16.msra.mxu1 %v6298_v37 }
 0x120   :  { %5628 = vmatprep.subr.bf16.mxu1 %v6299_v39 }
 0x121   :  { %5565 = vmatmul.mubr.bf16.gmra.mrb[108].mxu1 %v6894_v56  ;;  %1490 = vmatmul.mubr.bf16.gmra.mrb[76].mxu0 %v6917_v6 }
 0x122   :  { %5568 = vmatprep.mubr.bf16.mxu1 %v6840_v20  ;;  %1499 = vmatprep.mubr.bf16.mxu0 %v6782_v0 }
 0x123   :  { %5629 = vmatpush3.bf16.msra.mxu1 %v6299_v39 }
 0x124   :  { %v7026_v46 = vpop.f32.mrb[4].mxu1  ;;  %5630 = vmatprep.subr.bf16.mxu1 %v6303_v45 }
 0x125   :  { %v7030_v50 = vpop.f32.mrb[5].mxu1 }
 0x126   :  { %v7032_v53 = vpop.f32.mrb[6].mxu1 }
 0x127   :  { %v7034_v59 = vpop.f32.mrb[7].mxu1  ;;  %5631 = vmatpush3.bf16.msra.mxu1 %v6303_v45 }
 0x128   :  { %5696 = vmatprep.subr.bf16.mxu1 %v7028_v49 }
 0x129   :  { %5569 = vmatmul.mubr.bf16.gmra.mrb[112].mxu1 %v6848_v28  ;;  %1500 = vmatmul.mubr.bf16.gmra.mrb[80].mxu0 %v6923_v8 }
 0x12a   :  { %5572 = vmatprep.mubr.bf16.mxu1 %v6856_v35  ;;  %1509 = vmatprep.mubr.bf16.mxu0 %v6782_v0 }
 0x12c   :  { %v7041_v20 = vpop.f32.mrb[8].mxu1 }
 0x12d   :  { %v7043_v60 = vpop.f32.mrb[9].mxu1 }
 0x12e   :  { %v7045_v61 = vpop.f32.mrb[10].mxu1 }
 0x12f   :  { %v7047_v62 = vpop.f32.mrb[11].mxu1 }
 0x131   :  { %5573 = vmatmul.mubr.bf16.gmra.mrb[116].mxu1 %v6864_v43  ;;  %1510 = vmatmul.mubr.bf16.gmra.mrb[84].mxu0 %v6929_v9 }
 0x132   :  { %5576 = vmatprep.mubr.bf16.mxu1 %v6872_v48  ;;  %1519 = vmatprep.mubr.bf16.mxu0 %v6782_v0 }
 0x134   :  { %v7053_v63 = vpop.f32.mrb[12].mxu1 }
 0x135   :  { %v7055_v2 = vpop.f32.mrb[13].mxu1 }
 0x136   :  { %v7057_v3 = vpop.f32.mrb[14].mxu1 }
 0x137   :  { %v7059_v4 = vpop.f32.mrb[15].mxu1 }
 0x139   :  { %5577 = vmatmul.mubr.bf16.gmra.mrb[120].mxu1 %v6880_v52  ;;  %1520 = vmatmul.mubr.bf16.gmra.mrb[88].mxu0 %v6935_v12 }
 0x13a   :  { %5580 = vmatprep.mubr.bf16.mxu1 %v6888_v55  ;;  %1529 = vmatprep.mubr.bf16.mxu0 %v6782_v0 }
 0x13c   :  { %v7065_v5 = vpop.f32.mrb[16].mxu1 }
 0x13d   :  { %v7067_v7 = vpop.f32.mrb[17].mxu1 }
 0x13e   :  { %v7069_v10 = vpop.f32.mrb[18].mxu1 }
 0x13f   :  { %v7071_v11 = vpop.f32.mrb[19].mxu1 }
 0x141   :  { %5581 = vmatmul.mubr.bf16.gmra.mrb[124].mxu1 %v6896_v57  ;;  %1530 = vmatmul.mubr.bf16.gmra.mrb[92].mxu0 %v6941_v13 }
 0x142   :  { %5584 = vmatprep.mubr.bf16.mxu1 %v6902_v58  ;;  %1539 = vmatprep.mubr.bf16.mxu0 %v6782_v0 }
 0x144   :  { %v7077_v16 = vpop.f32.mrb[20].mxu1 }
 0x145   :  { %v7079_v17 = vpop.f32.mrb[21].mxu1 }
 0x146   :  { %v7081_v24 = vpop.f32.mrb[22].mxu1 }
 0x147   :  { %v7083_v25 = vpop.f32.mrb[23].mxu1 }
 0x149   :  { %5585 = vmatmul.mubr.bf16.gmra.mrb[128].mxu1 %v6911_v1  ;;  %1540 = vmatmul.mubr.bf16.gmra.mrb[96].mxu0 %v6947_v14 }
 0x14a   :  { %5588 = vmatprep.mubr.bf16.mxu1 %v6917_v6  ;;  %1549 = vmatprep.mubr.bf16.mxu0 %v6782_v0 }
 0x14c   :  { %v7089_v31 = vpop.f32.mrb[24].mxu1 }
 0x14d   :  { %8626 = vst [vmem:[#allocation11_spill] sm:$0xff] %v7089_v31  ;;  %v7091_v33 = vpop.f32.mrb[25].mxu1 }
 0x14e   :  { %8627 = vst [vmem:[#allocation12_spill] sm:$0xff] %v7091_v33  ;;  %v7093_v34 = vpop.f32.mrb[26].mxu1 }
 0x14f   :  { %8628 = vst [vmem:[#allocation13_spill] sm:$0xff] %v7093_v34  ;;  %v7095_v36 = vpop.f32.mrb[27].mxu1 }
 0x150   :  { %8629 = vst [vmem:[#allocation14_spill] sm:$0xff] %v7095_v36 }
 0x151   :  { %5589 = vmatmul.mubr.bf16.gmra.mrb[132].mxu1 %v6923_v8  ;;  %1550 = vmatmul.mubr.bf16.gmra.mrb[100].mxu0 %v6953_v15 }
 0x152   :  { %5592 = vmatprep.mubr.bf16.mxu1 %v6929_v9  ;;  %1559 = vmatprep.mubr.bf16.mxu0 %v6782_v0 }
 0x154   :  { %v7101_v37 = vpop.f32.mrb[28].mxu1 }
 0x155   :  { %8630 = vst [vmem:[#allocation15_spill] sm:$0xff] %v7101_v37  ;;  %v7103_v39 = vpop.f32.mrb[29].mxu1 }
 0x156   :  { %8631 = vst [vmem:[#allocation16_spill] sm:$0xff] %v7103_v39  ;;  %v7105_v45 = vpop.f32.mrb[30].mxu1 }
 0x157   :  { %8632 = vst [vmem:[#allocation17_spill] sm:$0xff] %v7105_v45  ;;  %v7107_v31 = vpop.f32.mrb[31].mxu1 }
 0x158   :  { %8633 = vst [vmem:[#allocation18_spill] sm:$0xff] %v7107_v31 }
 0x159   :  { %5593 = vmatmul.mubr.bf16.gmra.mrb[136].mxu1 %v6935_v12  ;;  %1560 = vmatmul.mubr.bf16.gmra.mrb[104].mxu0 %v6959_v18 }
 0x15a   :  { %5596 = vmatprep.mubr.bf16.mxu1 %v6941_v13  ;;  %1569 = vmatprep.mubr.bf16.mxu0 %v6782_v0 }
 0x15c   :  { %v7113_v36 = vpop.f32.mrb[32].mxu1 }
 0x15d   :  { %8634 = vst [vmem:[#allocation19_spill] sm:$0xff] %v7113_v36  ;;  %v7115_v34 = vpop.f32.mrb[33].mxu1 }
 0x15e   :  { %8635 = vst [vmem:[#allocation20_spill] sm:$0xff] %v7115_v34  ;;  %v7117_v33 = vpop.f32.mrb[34].mxu1 }
 0x15f   :  { %8636 = vst [vmem:[#allocation21_spill] sm:$0xff] %v7117_v33  ;;  %v7119_v37 = vpop.f32.mrb[35].mxu1 }
 0x160   :  { %8637 = vst [vmem:[#allocation22_spill] sm:$0xff] %v7119_v37 }
 0x161   :  { %5597 = vmatmul.mubr.bf16.gmra.mrb[140].mxu1 %v6947_v14  ;;  %1570 = vmatmul.mubr.bf16.gmra.mrb[108].mxu0 %v6965_v21 }
 0x162   :  { %5600 = vmatprep.mubr.bf16.mxu1 %v6953_v15  ;;  %1579 = vmatprep.mubr.bf16.mxu0 %v6782_v0 }
 0x164   :  { %v7125_v31 = vpop.f32.mrb[36].mxu1 }
 0x165   :  { %8638 = vst [vmem:[#allocation23_spill] sm:$0xff] %v7125_v31  ;;  %v7127_v45 = vpop.f32.mrb[37].mxu1 }
 0x166   :  { %8639 = vst [vmem:[#allocation24_spill] sm:$0xff] %v7127_v45  ;;  %v7129_v39 = vpop.f32.mrb[38].mxu1 }
 0x167   :  { %8640 = vst [vmem:[#allocation25_spill] sm:$0xff] %v7129_v39  ;;  %v7131_v36 = vpop.f32.mrb[39].mxu1 }
 0x168   :  { %8641 = vst [vmem:[#allocation26_spill] sm:$0xff] %v7131_v36 }
 0x169   :  { %5601 = vmatmul.mubr.bf16.gmra.mrb[144].mxu1 %v6959_v18  ;;  %1580 = vmatmul.mubr.bf16.gmra.mrb[112].mxu0 %v6971_v22 }
 0x16a   :  { %5604 = vmatprep.mubr.bf16.mxu1 %v6965_v21  ;;  %1589 = vmatprep.mubr.bf16.mxu0 %v6782_v0 }
 0x16c   :  { %v7137_v37 = vpop.f32.mrb[40].mxu1 }
 0x16d   :  { %8642 = vst [vmem:[#allocation27_spill] sm:$0xff] %v7137_v37  ;;  %v7139_v33 = vpop.f32.mrb[41].mxu1 }
 0x16e   :  { %8643 = vst [vmem:[#allocation28_spill] sm:$0xff] %v7139_v33  ;;  %v7141_v34 = vpop.f32.mrb[42].mxu1 }
 0x16f   :  { %8644 = vst [vmem:[#allocation29_spill] sm:$0xff] %v7141_v34  ;;  %v7143_v31 = vpop.f32.mrb[43].mxu1 }
 0x170   :  { %8645 = vst [vmem:[#allocation30_spill] sm:$0xff] %v7143_v31 }
 0x171   :  { %5605 = vmatmul.mubr.bf16.gmra.mrb[148].mxu1 %v6971_v22  ;;  %1590 = vmatmul.mubr.bf16.gmra.mrb[116].mxu0 %v6977_v23 }
 0x172   :  { %5608 = vmatprep.mubr.bf16.mxu1 %v6977_v23  ;;  %1599 = vmatprep.mubr.bf16.mxu0 %v6782_v0 }
 0x174   :  { %v7149_v36 = vpop.f32.mrb[44].mxu1 }
 0x175   :  { %8646 = vst [vmem:[#allocation31_spill] sm:$0xff] %v7149_v36  ;;  %v7151_v39 = vpop.f32.mrb[45].mxu1 }
 0x176   :  { %8647 = vst [vmem:[#allocation32_spill] sm:$0xff] %v7151_v39  ;;  %v7153_v45 = vpop.f32.mrb[46].mxu1 }
 0x177   :  { %8648 = vst [vmem:[#allocation33_spill] sm:$0xff] %v7153_v45  ;;  %v7155_v37 = vpop.f32.mrb[47].mxu1 }
 0x178   :  { %8649 = vst [vmem:[#allocation34_spill] sm:$0xff] %v7155_v37 }
 0x179   :  { %5609 = vmatmul.mubr.bf16.gmra.mrb[152].mxu1 %v6983_v26  ;;  %1600 = vmatmul.mubr.bf16.gmra.mrb[120].mxu0 %v6983_v26 }
 0x17a   :  { %5612 = vmatprep.mubr.bf16.mxu1 %v6989_v29  ;;  %1609 = vmatprep.mubr.bf16.mxu0 %v6782_v0 }
 0x17c   :  { %v7161_v31 = vpop.f32.mrb[48].mxu1 }
 0x17d   :  { %8650 = vst [vmem:[#allocation35_spill] sm:$0xff] %v7161_v31  ;;  %v7163_v34 = vpop.f32.mrb[49].mxu1 }
 0x17e   :  { %8651 = vst [vmem:[#allocation36_spill] sm:$0xff] %v7163_v34  ;;  %v7165_v33 = vpop.f32.mrb[50].mxu1  ;;  %v6305_v34 = vld [vmem:[#allocation5 + $0x1a0] ss:$12 sps:$4 sm:$0xff]  }
 0x17f   :  { %v7167_v36 = vpop.f32.mrb[51].mxu1 }
 0x180   :  { %8652 = vst [vmem:[#allocation37_spill] sm:$0xff] %v7167_v36  ;;  %v6306_v36 = vld [vmem:[#allocation5 + $0x1b8] ss:$12 sps:$4 sm:$0xff]  }
 0x181   :  { %5613 = vmatmul.mubr.bf16.gmra.mrb[156].mxu1 %v6995_v30  ;;  %1610 = vmatmul.mubr.bf16.gmra.mrb[124].mxu0 %v6989_v29 }
 0x182   :  { %5632 = vmatprep.mubr.bf16.mxu1 %v6782_v0  ;;  %2106 = vmatprep.mubr.bf16.mxu0 %v6782_v0 }
 0x184   :  { %v7173_v37 = vpop.f32.mrb[52].mxu1 }
 0x185   :  { %8653 = vst [vmem:[#allocation38_spill] sm:$0xff] %v7173_v37  ;;  %v7175_v45 = vpop.f32.mrb[53].mxu1 }
 0x186   :  { %8654 = vst [vmem:[#allocation39_spill] sm:$0xff] %v7175_v45  ;;  %v7177_v39 = vpop.f32.mrb[54].mxu1 }
 0x187   :  { %8655 = vst [vmem:[#allocation40_spill] sm:$0xff] %v7177_v39  ;;  %v7179_v31 = vpop.f32.mrb[55].mxu1 }
 0x188   :  { %8656 = vst [vmem:[#allocation41_spill] sm:$0xff] %v7179_v31 }
 0x189   :  { %5633 = vmatmul.mubr.bf16.vlgmr.msra.gmra.mrb[96].mxu1 %v6838_v19  ;;  %2107 = vmatmul.mubr.bf16.vlgmr.msra.gmra.mrb[0].mxu0 %v6846_v27  ;;  %v6307_v19 = vld [vmem:[#allocation5 + $0x1d0] ss:$12 sps:$4 sm:$0xff]  }
 0x18a   :  { %5697 = vmatpush3.bf16.msra.mxu1 %v7028_v49  ;;  %5636 = vmatprep.mubr.bf16.mxu1 %v6846_v27  ;;  %v6308_v49 = vld [vmem:[#allocation5 + $0x1e8] ss:$12 sps:$4 sm:$0xff]  }
 0x18b   :  { %2116 = vmatprep.mubr.bf16.mxu0 %v6782_v0  ;;  %5698 = vmatprep.subr.bf16.mxu1 %v6305_v34 }
 0x18c   :  { %v7186_v37 = vpop.f32.mrb[56].mxu1 }
 0x18d   :  { %v7188_v45 = vpop.f32.mrb[57].mxu1 }
 0x18e   :  { %8657 = vst [vmem:[#allocation42_spill] sm:$0xff] %v7188_v45  ;;  %v7190_v39 = vpop.f32.mrb[58].mxu1  ;;  %5699 = vmatpush3.bf16.msra.mxu1 %v6305_v34 }
 0x18f   :  { %8658 = vst [vmem:[#allocation43_spill] sm:$0xff] %v7190_v39  ;;  %v7192_v31 = vpop.f32.mrb[59].mxu1  ;;  %5700 = vmatprep.subr.bf16.mxu1 %v6306_v36  ;;  %v6309_v39 = vld [vmem:[#allocation5 + $0x200] ss:$12 sps:$4 sm:$0xff]  }
 0x190   :  { %8659 = vst [vmem:[#allocation44_spill] sm:$0xff] %v7192_v31 }
 0x191   :  { %5637 = vmatmul.mubr.bf16.gmra.mrb[100].mxu1 %v6854_v32  ;;  %2117 = vmatmul.mubr.bf16.gmra.mrb[4].mxu0 %v6854_v32 }
 0x192   :  { %5640 = vmatprep.mubr.bf16.mxu1 %v6862_v40  ;;  %2126 = vmatprep.mubr.bf16.mxu0 %v6782_v0 }
 0x193   :  { %5701 = vmatpush3.bf16.msra.mxu1 %v6306_v36  ;;  %v6310_v36 = vld [vmem:[#allocation5 + $0x218] ss:$12 sps:$4 sm:$0xff]  }
 0x194   :  { %v7198_v27 = vpop.f32.mrb[60].mxu1  ;;  %5702 = vmatprep.subr.bf16.mxu1 %v6307_v19 }
 0x195   :  { %v7200_v45 = vpop.f32.mrb[61].mxu1 }
 0x196   :  { %8660 = vst [vmem:[#allocation45_spill] sm:$0xff] %v7200_v45  ;;  %v7202_v34 = vpop.f32.mrb[62].mxu1 }
 0x197   :  { %8661 = vst [vmem:[#allocation46_spill] sm:$0xff] %v7202_v34  ;;  %v7204_v31 = vpop.f32.mrb[63].mxu1  ;;  %5703 = vmatpush3.bf16.msra.mxu1 %v6307_v19 }
 0x198   :  { %8662 = vst [vmem:[#allocation47_spill] sm:$0xff] %v7204_v31  ;;  %5704 = vmatprep.subr.bf16.mxu1 %v6308_v49  ;;  %v6311_v31 = vld [vmem:[#allocation5 + $0x230] ss:$12 sps:$4 sm:$0xff]  }
 0x199   :  { %5641 = vmatmul.mubr.bf16.gmra.mrb[104].mxu1 %v6870_v47  ;;  %2127 = vmatmul.mubr.bf16.gmra.mrb[8].mxu0 %v6862_v40 }
 0x19a   :  { %5644 = vmatprep.mubr.bf16.mxu1 %v6878_v51  ;;  %2136 = vmatprep.mubr.bf16.mxu0 %v6782_v0 }
 0x19b   :  { %5705 = vmatpush3.bf16.msra.mxu1 %v6308_v49 }
 0x19c   :  { %v7210_v32 = vpop.f32.mrb[64].mxu1  ;;  %5706 = vmatprep.subr.bf16.mxu1 %v6309_v39 }
 0x19d   :  { %8663 = vst [vmem:[#allocation48_spill] sm:$0xff] %v7210_v32  ;;  %v7212_v45 = vpop.f32.mrb[65].mxu1 }
 0x19e   :  { %8664 = vst [vmem:[#allocation49_spill] sm:$0xff] %v7212_v45  ;;  %v7214_v34 = vpop.f32.mrb[66].mxu1 }
 0x19f   :  { %8665 = vst [vmem:[#allocation50_spill] sm:$0xff] %v7214_v34  ;;  %v7216_v19 = vpop.f32.mrb[67].mxu1  ;;  %5707 = vmatpush3.bf16.msra.mxu1 %v6309_v39  ;;  %v7230_v39 = vld [vmem:[#allocation2 + $0x40] sm:$0xff]  }
 0x1a0   :  { %8666 = vst [vmem:[#allocation51_spill] sm:$0xff] %v7216_v19  ;;  %5708 = vmatprep.subr.bf16.mxu1 %v6310_v36 }
 0x1a1   :  { %5645 = vmatmul.mubr.bf16.gmra.mrb[108].mxu1 %v6886_v54  ;;  %2137 = vmatmul.mubr.bf16.gmra.mrb[12].mxu0 %v6870_v47 }
 0x1a2   :  { %5648 = vmatprep.mubr.bf16.mxu1 %v6894_v56  ;;  %2146 = vmatprep.mubr.bf16.mxu0 %v6782_v0 }
 0x1a3   :  { %5709 = vmatpush3.bf16.msra.mxu1 %v6310_v36 }
 0x1a4   :  { %v7222_v49 = vpop.f32.mrb[68].mxu1  ;;  %5710 = vmatprep.subr.bf16.mxu1 %v6311_v31 }
 0x1a5   :  { %8667 = vst [vmem:[#allocation52_spill] sm:$0xff] %v7222_v49  ;;  %v7224_v45 = vpop.f32.mrb[69].mxu1 }
 0x1a6   :  { %8668 = vst [vmem:[#allocation53_spill] sm:$0xff] %v7224_v45  ;;  %v7226_v34 = vpop.f32.mrb[70].mxu1 }
 0x1a7   :  { %8669 = vst [vmem:[#allocation54_spill] sm:$0xff] %v7226_v34  ;;  %v7228_v19 = vpop.f32.mrb[71].mxu1  ;;  %5711 = vmatpush3.bf16.msra.mxu1 %v6311_v31 }
 0x1a8   :  { %8670 = vst [vmem:[#allocation55_spill] sm:$0xff] %v7228_v19 }
 0x1a9   :  { %5649 = vmatmul.mubr.bf16.gmra.mrb[112].mxu1 %v7230_v39  ;;  %2147 = vmatmul.mubr.bf16.gmra.mrb[16].mxu0 %v6878_v51 }
 0x1aa   :  { %5652 = vmatprep.mubr.bf16.mxu1 %v6848_v28  ;;  %2156 = vmatprep.mubr.bf16.mxu0 %v6782_v0 }
 0x1ac   :  { %v7236_v36 = vpop.f32.mrb[72].mxu1 }
 0x1ad   :  { %8671 = vst [vmem:[#allocation56_spill] sm:$0xff] %v7236_v36  ;;  %v7238_v49 = vpop.f32.mrb[73].mxu1 }
 0x1ae   :  { %8672 = vst [vmem:[#allocation57_spill] sm:$0xff] %v7238_v49  ;;  %v7240_v45 = vpop.f32.mrb[74].mxu1 }
 0x1af   :  { %8673 = vst [vmem:[#allocation58_spill] sm:$0xff] %v7240_v45  ;;  %v7242_v34 = vpop.f32.mrb[75].mxu1 }
 0x1b0   :  { %8674 = vst [vmem:[#allocation59_spill] sm:$0xff] %v7242_v34 }
 0x1b1   :  { %5653 = vmatmul.mubr.bf16.gmra.mrb[116].mxu1 %v6856_v35  ;;  %2157 = vmatmul.mubr.bf16.gmra.mrb[20].mxu0 %v6886_v54 }
 0x1b2   :  { %5656 = vmatprep.mubr.bf16.mxu1 %v6864_v43  ;;  %2166 = vmatprep.mubr.bf16.mxu0 %v6782_v0 }
 0x1b4   :  { %v7248_v31 = vpop.f32.mrb[76].mxu1 }
 0x1b5   :  { %8675 = vst [vmem:[#allocation60_spill] sm:$0xff] %v7248_v31  ;;  %v7250_v28 = vpop.f32.mrb[77].mxu1 }
 0x1b6   :  { %8676 = vst [vmem:[#allocation61_spill] sm:$0xff] %v7250_v28  ;;  %v7252_v19 = vpop.f32.mrb[78].mxu1 }
 0x1b7   :  { %8677 = vst [vmem:[#allocation62_spill] sm:$0xff] %v7252_v19  ;;  %v7254_v36 = vpop.f32.mrb[79].mxu1 }
 0x1b8   :  { %8678 = vst [vmem:[#allocation63_spill] sm:$0xff] %v7254_v36 }
 0x1b9   :  { %5657 = vmatmul.mubr.bf16.gmra.mrb[120].mxu1 %v6872_v48  ;;  %2167 = vmatmul.mubr.bf16.gmra.mrb[24].mxu0 %v6894_v56 }
 0x1ba   :  { %5660 = vmatprep.mubr.bf16.mxu1 %v6880_v52  ;;  %2176 = vmatprep.mubr.bf16.mxu0 %v6782_v0 }
 0x1bc   :  { %v7260_v34 = vpop.f32.mrb[80].mxu1 }
 0x1bd   :  { %8679 = vst [vmem:[#allocation64_spill] sm:$0xff] %v7260_v34  ;;  %v7262_v45 = vpop.f32.mrb[81].mxu1 }
 0x1be   :  { %8680 = vst [vmem:[#allocation65_spill] sm:$0xff] %v7262_v45  ;;  %v7264_v49 = vpop.f32.mrb[82].mxu1 }
 0x1bf   :  { %8681 = vst [vmem:[#allocation66_spill] sm:$0xff] %v7264_v49  ;;  %v7266_v31 = vpop.f32.mrb[83].mxu1  ;;  %v6697_v49 = vld [vmem:[#allocation2 + $0x48] sm:$0xff]  }
 0x1c0   :  { %8682 = vst [vmem:[#allocation67_spill] sm:$0xff] %v7266_v31 }
 0x1c1   :  { %5661 = vmatmul.mubr.bf16.gmra.mrb[124].mxu1 %v6888_v55  ;;  %2177 = vmatmul.mubr.bf16.gmra.mrb[28].mxu0 %v7230_v39 }
 0x1c2   :  { %5664 = vmatprep.mubr.bf16.mxu1 %v6782_v0  ;;  %2186 = vmatprep.mubr.bf16.mxu0 %v6782_v0 }
 0x1c4   :  { %v7272_v36 = vpop.f32.mrb[84].mxu1 }
 0x1c5   :  { %8683 = vst [vmem:[#allocation68_spill] sm:$0xff] %v7272_v36  ;;  %v7274_v19 = vpop.f32.mrb[85].mxu1 }
 0x1c6   :  { %v7276_v28 = vpop.f32.mrb[86].mxu1 }
 0x1c7   :  { %8684 = vst [vmem:[#allocation69_spill] sm:$0xff] %v7276_v28  ;;  %v7278_v34 = vpop.f32.mrb[87].mxu1 }
 0x1c8   :  { %8685 = vst [vmem:[#allocation70_spill] sm:$0xff] %v7278_v34 }
 0x1c9   :  { %5665 = vmatmul.mubr.bf16.gmra.mrb[128].mxu1 %v6902_v58  ;;  %2187 = vmatmul.mubr.bf16.gmra.mrb[32].mxu0 %v6697_v49 }
 0x1ca   :  { %5668 = vmatprep.mubr.bf16.mxu1 %v6911_v1  ;;  %2196 = vmatprep.mubr.bf16.mxu0 %v6782_v0 }
 0x1cc   :  { %v7283_v31 = vpop.f32.mrb[88].mxu1 }
 0x1cd   :  { %8686 = vst [vmem:[#allocation71_spill] sm:$0xff] %v7283_v31  ;;  %v7285_v45 = vpop.f32.mrb[89].mxu1 }
 0x1ce   :  { %v7287_v32 = vpop.f32.mrb[90].mxu1 }
 0x1cf   :  { %v7289_v36 = vpop.f32.mrb[91].mxu1 }
 0x1d1   :  { %5669 = vmatmul.mubr.bf16.gmra.mrb[132].mxu1 %v6917_v6  ;;  %2197 = vmatmul.mubr.bf16.gmra.mrb[36].mxu0 %v6856_v35  ;;  %v7325_v35 = vcombine.low %v6782_v0, %v6782_v0 }
 0x1d2   :  { %5672 = vmatprep.mubr.bf16.mxu1 %v6923_v8  ;;  %2206 = vmatprep.mubr.bf16.mxu0 %v6782_v0 }
 0x1d4   :  { %v7295_v58 = vpop.f32.mrb[92].mxu1 }
 0x1d5   :  { %v7297_v34 = vpop.f32.mrb[93].mxu1 }
 0x1d6   :  { %8687 = vst [vmem:[#allocation72_spill] sm:$0xff] %v7297_v34  ;;  %v7299_v28 = vpop.f32.mrb[94].mxu1 }
 0x1d7   :  { %8688 = vst [vmem:[#allocation73_spill] sm:$0xff] %v7299_v28  ;;  %v7301_v31 = vpop.f32.mrb[95].mxu1 }
 0x1d8   :  { %8689 = vst [vmem:[#allocation74_spill] sm:$0xff] %v7301_v31  ;;  %v6699_v31 = vld [vmem:[#allocation2 + $0x10] sm:$0xff]  }
 0x1d9   :  { %5673 = vmatmul.mubr.bf16.gmra.mrb[136].mxu1 %v6929_v9  ;;  %2207 = vmatmul.mubr.bf16.gmra.mrb[40].mxu0 %v6864_v43  ;;  %v6698_v43 = vld [vmem:[#allocation2 + $0x8] sm:$0xff]  }
 0x1da   :  { %5676 = vmatprep.mubr.bf16.mxu1 %v6935_v12  ;;  %2216 = vmatprep.mubr.bf16.mxu0 %v6782_v0 }
 0x1e1   :  { %5677 = vmatmul.mubr.bf16.gmra.mrb[140].mxu1 %v6941_v13  ;;  %2217 = vmatmul.mubr.bf16.gmra.mrb[44].mxu0 %v6872_v48 }
 0x1e2   :  { %5680 = vmatprep.mubr.bf16.mxu1 %v6947_v14  ;;  %2226 = vmatprep.mubr.bf16.mxu0 %v6782_v0 }
 0x1e9   :  { %5681 = vmatmul.mubr.bf16.gmra.mrb[144].mxu1 %v6953_v15  ;;  %2227 = vmatmul.mubr.bf16.gmra.mrb[48].mxu0 %v6880_v52 }
 0x1ea   :  { %5684 = vmatprep.mubr.bf16.mxu1 %v6959_v18  ;;  %2236 = vmatprep.mubr.bf16.mxu0 %v6782_v0 }
 0x1f1   :  { %5685 = vmatmul.mubr.bf16.gmra.mrb[148].mxu1 %v6965_v21  ;;  %2237 = vmatmul.mubr.bf16.gmra.mrb[52].mxu0 %v6888_v55 }
 0x1f2   :  { %5688 = vmatprep.mubr.bf16.mxu1 %v6971_v22  ;;  %2246 = vmatprep.mubr.bf16.mxu0 %v6782_v0 }
 0x1f9   :  { %5689 = vmatmul.mubr.bf16.gmra.mrb[152].mxu1 %v6977_v23  ;;  %2247 = vmatmul.mubr.bf16.gmra.mrb[56].mxu0 %v6896_v57 }
 0x1fa   :  { %5692 = vmatprep.mubr.bf16.mxu1 %v6983_v26  ;;  %2256 = vmatprep.mubr.bf16.mxu0 %v6782_v0 }
 0x201   :  { %5693 = vmatmul.mubr.bf16.gmra.mrb[156].mxu1 %v6989_v29  ;;  %2257 = vmatmul.mubr.bf16.gmra.mrb[60].mxu0 %v7325_v35 }
 0x202   :  { %2266 = vmatprep.mubr.bf16.mxu0 %v6782_v0  ;;  %5712 = vmatprep.mubr.bf16.mxu1 %v6698_v43 }
 0x209   :  { %2267 = vmatmul.mubr.bf16.gmra.mrb[64].mxu0 %v6911_v1  ;;  %5713 = vmatmul.mubr.bf16.vlgmr.msra.gmra.mrb[96].mxu1 %v6699_v31 }
 0x20a   :  { %2276 = vmatprep.mubr.bf16.mxu0 %v6782_v0  ;;  %5716 = vmatprep.mubr.bf16.mxu1 %v6862_v40  ;;  %v6700_v40 = vld [vmem:[#allocation2 + $0x50] sm:$0xff]  }
 0x211   :  { %2277 = vmatmul.mubr.bf16.gmra.mrb[68].mxu0 %v6917_v6  ;;  %5717 = vmatmul.mubr.bf16.gmra.mrb[100].mxu1 %v6870_v47  ;;  %v6701_v47 = vld [vmem:[#allocation2 + $0x58] sm:$0xff]  }
 0x212   :  { %2286 = vmatprep.mubr.bf16.mxu0 %v6782_v0  ;;  %5720 = vmatprep.mubr.bf16.mxu1 %v6878_v51 }
 0x219   :  { %2287 = vmatmul.mubr.bf16.gmra.mrb[72].mxu0 %v6923_v8  ;;  %5721 = vmatmul.mubr.bf16.gmra.mrb[104].mxu1 %v6886_v54 }
 0x21a   :  { %2296 = vmatprep.mubr.bf16.mxu0 %v6782_v0  ;;  %5724 = vmatprep.mubr.bf16.mxu1 %v6894_v56 }
 0x221   :  { %2297 = vmatmul.mubr.bf16.gmra.mrb[76].mxu0 %v6929_v9  ;;  %5725 = vmatmul.mubr.bf16.gmra.mrb[108].mxu1 %v7230_v39 }
 0x222   :  { %2306 = vmatprep.mubr.bf16.mxu0 %v6782_v0  ;;  %5728 = vmatprep.mubr.bf16.mxu1 %v6697_v49 }
 0x229   :  { %2307 = vmatmul.mubr.bf16.gmra.mrb[80].mxu0 %v6935_v12  ;;  %5729 = vmatmul.mubr.bf16.gmra.mrb[112].mxu1 %v6700_v40 }
 0x22a   :  { %2316 = vmatprep.mubr.bf16.mxu0 %v6782_v0  ;;  %5732 = vmatprep.mubr.bf16.mxu1 %v6701_v47 }
 0x231   :  { %2317 = vmatmul.mubr.bf16.gmra.mrb[84].mxu0 %v6941_v13  ;;  %5733 = vmatmul.mubr.bf16.gmra.mrb[116].mxu1 %v6872_v48 }
 0x232   :  { %2326 = vmatprep.mubr.bf16.mxu0 %v6782_v0  ;;  %5736 = vmatprep.mubr.bf16.mxu1 %v6880_v52 }
 0x239   :  { %2327 = vmatmul.mubr.bf16.gmra.mrb[88].mxu0 %v6947_v14  ;;  %5737 = vmatmul.mubr.bf16.gmra.mrb[120].mxu1 %v6888_v55 }
 0x23a   :  { %2336 = vmatprep.mubr.bf16.mxu0 %v6782_v0  ;;  %5740 = vmatprep.mubr.bf16.mxu1 %v6896_v57 }
 0x241   :  { %2337 = vmatmul.mubr.bf16.gmra.mrb[92].mxu0 %v6953_v15  ;;  %5741 = vmatmul.mubr.bf16.gmra.mrb[124].mxu1 %v7325_v35 }
 0x242   :  { %2346 = vmatprep.mubr.bf16.mxu0 %v6782_v0  ;;  %5744 = vmatprep.mubr.bf16.mxu1 %v6911_v1 }
 0x249   :  { %2347 = vmatmul.mubr.bf16.gmra.mrb[96].mxu0 %v6959_v18  ;;  %5745 = vmatmul.mubr.bf16.gmra.mrb[128].mxu1 %v6917_v6 }
 0x24a   :  { %2356 = vmatprep.mubr.bf16.mxu0 %v6782_v0  ;;  %5748 = vmatprep.mubr.bf16.mxu1 %v6923_v8 }
 0x251   :  { %2357 = vmatmul.mubr.bf16.gmra.mrb[100].mxu0 %v6965_v21  ;;  %5749 = vmatmul.mubr.bf16.gmra.mrb[132].mxu1 %v6929_v9 }
 0x252   :  { %2366 = vmatprep.mubr.bf16.mxu0 %v6782_v0  ;;  %5752 = vmatprep.mubr.bf16.mxu1 %v6935_v12 }
 0x259   :  { %2367 = vmatmul.mubr.bf16.gmra.mrb[104].mxu0 %v6971_v22  ;;  %5753 = vmatmul.mubr.bf16.gmra.mrb[136].mxu1 %v6941_v13 }
 0x25a   :  { %2376 = vmatprep.mubr.bf16.mxu0 %v6782_v0  ;;  %5756 = vmatprep.mubr.bf16.mxu1 %v6947_v14 }
 0x25c   :  { %v2108_v48 = vpop.f32.mrb[0].mxu0 }
 0x25d   :  { %v2973_v51 = vrot.slane %v2108_v48, 7  ;;  %v2110_v52 = vpop.f32.mrb[1].mxu0 }
 0x25e   :  { %v2112_v54 = vpop.f32.mrb[2].mxu0 }
 0x25f   :  { %v3133_v55 = vsel %vm2972_vm0, 0.0, %v2973_v51  ;;  %v2974_v56 = vrot.slane %v2112_v54, 7  ;;  %v2114_v57 = vpop.f32.mrb[3].mxu0 }
 0x260   :  { %v7371_v1 = vadd.f32 %v3133_v55, %v2110_v52 }
 0x261   :  { %v2975_v6 = vsel %vm2972_vm0, %v2973_v51, %v2974_v56  ;;  %2377 = vmatmul.mubr.bf16.gmra.mrb[108].mxu0 %v6977_v23  ;;  %5757 = vmatmul.mubr.bf16.gmra.mrb[140].mxu1 %v6953_v15 }
 0x262   :  { %v7376_v8 = vadd.f32 %v2975_v6, %v2114_v57  ;;  %2386 = vmatprep.mubr.bf16.mxu0 %v6782_v0  ;;  %5760 = vmatprep.mubr.bf16.mxu1 %v6959_v18 }
 0x264   :  { %v2118_v9 = vpop.f32.mrb[4].mxu0 }
 0x265   :  { %v2976_v12 = vrot.slane %v2118_v9, 7  ;;  %v2120_v13 = vpop.f32.mrb[5].mxu0 }
 0x266   :  { %v2122_v14 = vpop.f32.mrb[6].mxu0 }
 0x267   :  { %v3134_v49 = vsel %vm2972_vm0, 0.0, %v2976_v12  ;;  %v2977_v39 = vrot.slane %v2122_v14, 7  ;;  %v2124_v31 = vpop.f32.mrb[7].mxu0 }
 0x268   :  { %v7381_v43 = vadd.f32 %v3134_v49, %v2120_v13 }
 0x269   :  { %v2978_v40 = vsel %vm2972_vm0, %v2976_v12, %v2977_v39  ;;  %2387 = vmatmul.mubr.bf16.gmra.mrb[112].mxu0 %v6983_v26  ;;  %5761 = vmatmul.mubr.bf16.gmra.mrb[144].mxu1 %v6965_v21 }
 0x26a   :  { %v7386_v15 = vadd.f32 %v2978_v40, %v2124_v31  ;;  %2396 = vmatprep.mubr.bf16.mxu0 %v6782_v0  ;;  %5764 = vmatprep.mubr.bf16.mxu1 %v6971_v22 }
 0x26c   :  { %v2128_v18 = vpop.f32.mrb[8].mxu0 }
 0x26d   :  { %v2979_v47 = vrot.slane %v2128_v18, 7  ;;  %v2130_v48 = vpop.f32.mrb[9].mxu0 }
 0x26e   :  { %v2132_v51 = vpop.f32.mrb[10].mxu0 }
 0x26f   :  { %v3135_v52 = vsel %vm2972_vm0, 0.0, %v2979_v47  ;;  %v2980_v54 = vrot.slane %v2132_v51, 7  ;;  %v2134_v55 = vpop.f32.mrb[11].mxu0 }
 0x270   :  { %v7391_v56 = vadd.f32 %v3135_v52, %v2130_v48 }
 0x271   :  { %v2981_v57 = vsel %vm2972_vm0, %v2979_v47, %v2980_v54  ;;  %2397 = vmatmul.mubr.bf16.gmra.mrb[116].mxu0 %v6989_v29  ;;  %5765 = vmatmul.mubr.bf16.gmra.mrb[148].mxu1 %v6977_v23 }
 0x272   :  { %v7396_v21 = vadd.f32 %v2981_v57, %v2134_v55  ;;  %2406 = vmatprep.mubr.bf16.mxu0 %v6782_v0  ;;  %5768 = vmatprep.mubr.bf16.mxu1 %v6983_v26 }
 0x274   :  { %v2138_v22 = vpop.f32.mrb[12].mxu0 }
 0x275   :  { %v2982_v6 = vrot.slane %v2138_v22, 7  ;;  %v2140_v9 = vpop.f32.mrb[13].mxu0 }
 0x276   :  { %v2142_v12 = vpop.f32.mrb[14].mxu0 }
 0x277   :  { %v3136_v13 = vsel %vm2972_vm0, 0.0, %v2982_v6  ;;  %v2983_v14 = vrot.slane %v2142_v12, 7  ;;  %v2144_v49 = vpop.f32.mrb[15].mxu0 }
 0x278   :  { %v7401_v39 = vadd.f32 %v3136_v13, %v2140_v9 }
 0x279   :  { %v2984_v31 = vsel %vm2972_vm0, %v2982_v6, %v2983_v14  ;;  %2407 = vmatmul.mubr.bf16.gmra.mrb[120].mxu0 %v6995_v30  ;;  %5769 = vmatmul.mubr.bf16.gmra.mrb[152].mxu1 %v6989_v29 }
 0x27a   :  { %v7406_v23 = vadd.f32 %v2984_v31, %v2144_v49  ;;  %2416 = vmatprep.mubr.bf16.mxu0 %v6782_v0  ;;  %5772 = vmatprep.mubr.bf16.mxu1 %v6995_v30 }
 0x27c   :  { %v2148_v26 = vpop.f32.mrb[16].mxu0 }
 0x27d   :  { %v2985_v40 = vrot.slane %v2148_v26, 7  ;;  %v2150_v18 = vpop.f32.mrb[17].mxu0 }
 0x27e   :  { %v2152_v47 = vpop.f32.mrb[18].mxu0 }
 0x27f   :  { %v3137_v48 = vsel %vm2972_vm0, 0.0, %v2985_v40  ;;  %v2986_v51 = vrot.slane %v2152_v47, 7  ;;  %v2154_v52 = vpop.f32.mrb[19].mxu0 }
 0x280   :  { %v7411_v54 = vadd.f32 %v3137_v48, %v2150_v18 }
 0x281   :  { %v2987_v55 = vsel %vm2972_vm0, %v2985_v40, %v2986_v51  ;;  %2417 = vmatmul.mubr.bf16.gmra.mrb[124].mxu0 %v7325_v35  ;;  %5773 = vmatmul.mubr.bf16.gmra.mrb[156].mxu1 %v7325_v35 }
 0x282   :  { %v7416_v29 = vadd.f32 %v2987_v55, %v2154_v52 }
 0x284   :  { %v2158_v0 = vpop.f32.mrb[20].mxu0 }
 0x285   :  { %v2988_v30 = vrot.slane %v2158_v0, 7  ;;  %v2160_v57 = vpop.f32.mrb[21].mxu0 }
 0x286   :  { %v2162_v22 = vpop.f32.mrb[22].mxu0 }
 0x287   :  { %v3138_v6 = vsel %vm2972_vm0, 0.0, %v2988_v30  ;;  %v2989_v9 = vrot.slane %v2162_v22, 7  ;;  %v2164_v12 = vpop.f32.mrb[23].mxu0 }
 0x288   :  { %v7419_v13 = vadd.f32 %v3138_v6, %v2160_v57 }
 0x289   :  { %v2990_v14 = vsel %vm2972_vm0, %v2988_v30, %v2989_v9 }
 0x28a   :  { %v7422_v49 = vadd.f32 %v2990_v14, %v2164_v12 }
 0x28c   :  { %v2168_v31 = vpop.f32.mrb[24].mxu0 }
 0x28d   :  { %v2991_v26 = vrot.slane %v2168_v31, 7  ;;  %v2170_v40 = vpop.f32.mrb[25].mxu0 }
 0x28e   :  { %v2172_v35 = vpop.f32.mrb[26].mxu0 }
 0x28f   :  { %v3139_v18 = vsel %vm2972_vm0, 0.0, %v2991_v26  ;;  %v2992_v47 = vrot.slane %v2172_v35, 7  ;;  %v2174_v48 = vpop.f32.mrb[27].mxu0 }
 0x290   :  { %v7425_v51 = vadd.f32 %v3139_v18, %v2170_v40 }
 0x291   :  { %v2993_v52 = vsel %vm2972_vm0, %v2991_v26, %v2992_v47 }
 0x292   :  { %v7428_v55 = vadd.f32 %v2993_v52, %v2174_v48 }
 0x294   :  { %v2178_v0 = vpop.f32.mrb[28].mxu0 }
 0x295   :  { %v2994_v57 = vrot.slane %v2178_v0, 7  ;;  %v2180_v22 = vpop.f32.mrb[29].mxu0 }
 0x296   :  { %v2182_v30 = vpop.f32.mrb[30].mxu0 }
 0x297   :  { %v3140_v6 = vsel %vm2972_vm0, 0.0, %v2994_v57  ;;  %v2995_v9 = vrot.slane %v2182_v30, 7  ;;  %v2184_v12 = vpop.f32.mrb[31].mxu0 }
 0x298   :  { %v7431_v14 = vadd.f32 %v3140_v6, %v2180_v22 }
 0x299   :  { %v2996_v31 = vsel %vm2972_vm0, %v2994_v57, %v2995_v9 }
 0x29a   :  { %v7434_v35 = vadd.f32 %v2996_v31, %v2184_v12 }
 0x29c   :  { %v2188_v40 = vpop.f32.mrb[32].mxu0 }
 0x29d   :  { %v5792_v18 = vadd.f32 %v2188_v40, %v7014_v38  ;;  %v2190_v26 = vpop.f32.mrb[33].mxu0 }
 0x29e   :  { %v5793_v47 = vadd.f32 %v2190_v26, %v7016_v41  ;;  %v2192_v48 = vpop.f32.mrb[34].mxu0 }
 0x29f   :  { %v2997_v52 = vrot.slane %v5792_v18, 7  ;;  %v5794_v0 = vadd.f32 %v2192_v48, %v7018_v42  ;;  %v2194_v28 = vpop.f32.mrb[35].mxu0 }
 0x2a0   :  { %v5795_v30 = vadd.f32 %v2194_v28, %v7020_v44 }
 0x2a1   :  { %v3141_v22 = vsel %vm2972_vm0, 0.0, %v2997_v52  ;;  %v2998_v6 = vrot.slane %v5794_v0, 7 }
 0x2a2   :  { %v7441_v34 = vadd.f32 %v5793_v47, %v3141_v22 }
 0x2a3   :  { %v2999_v57 = vsel %vm2972_vm0, %v2997_v52, %v2998_v6 }
 0x2a4   :  { %v7444_v9 = vadd.f32 %v5795_v30, %v2999_v57  ;;  %v2198_v38 = vpop.f32.mrb[36].mxu0 }
 0x2a5   :  { %v5796_v12 = vadd.f32 %v2198_v38, %v7026_v46  ;;  %v2200_v41 = vpop.f32.mrb[37].mxu0 }
 0x2a6   :  { %v5797_v31 = vadd.f32 %v2200_v41, %v7030_v50  ;;  %v2202_v40 = vpop.f32.mrb[38].mxu0 }
 0x2a7   :  { %v3000_v42 = vrot.slane %v5796_v12, 7  ;;  %v5798_v18 = vadd.f32 %v2202_v40, %v7032_v53  ;;  %v2204_v44 = vpop.f32.mrb[39].mxu0 }
 0x2a8   :  { %v5799_v28 = vadd.f32 %v2204_v44, %v7034_v59 }
 0x2a9   :  { %v3142_v26 = vsel %vm2972_vm0, 0.0, %v3000_v42  ;;  %v3001_v47 = vrot.slane %v5798_v18, 7 }
 0x2aa   :  { %v7451_v48 = vadd.f32 %v5797_v31, %v3142_v26 }
 0x2ab   :  { %v3002_v52 = vsel %vm2972_vm0, %v3000_v42, %v3001_v47 }
 0x2ac   :  { %v7454_v0 = vadd.f32 %v5799_v28, %v3002_v52  ;;  %v2208_v46 = vpop.f32.mrb[40].mxu0 }
 0x2ad   :  { %v5800_v30 = vadd.f32 %v2208_v46, %v7041_v20  ;;  %v2210_v50 = vpop.f32.mrb[41].mxu0 }
 0x2ae   :  { %v5801_v22 = vadd.f32 %v2210_v50, %v7043_v60  ;;  %v2212_v6 = vpop.f32.mrb[42].mxu0 }
 0x2af   :  { %v3003_v53 = vrot.slane %v5800_v30, 7  ;;  %v5802_v57 = vadd.f32 %v2212_v6, %v7045_v61  ;;  %v2214_v59 = vpop.f32.mrb[43].mxu0 }
 0x2b0   :  { %v5803_v38 = vadd.f32 %v2214_v59, %v7047_v62 }
 0x2b1   :  { %v3143_v12 = vsel %vm2972_vm0, 0.0, %v3003_v53  ;;  %v3004_v41 = vrot.slane %v5802_v57, 7 }
 0x2b2   :  { %v7461_v31 = vadd.f32 %v5801_v22, %v3143_v12 }
 0x2b3   :  { %v3005_v40 = vsel %vm2972_vm0, %v3003_v53, %v3004_v41 }
 0x2b4   :  { %v7464_v42 = vadd.f32 %v5803_v38, %v3005_v40  ;;  %v2218_v20 = vpop.f32.mrb[44].mxu0 }
 0x2b5   :  { %v5804_v18 = vadd.f32 %v2218_v20, %v7053_v63  ;;  %v2220_v60 = vpop.f32.mrb[45].mxu0 }
 0x2b6   :  { %v5805_v44 = vadd.f32 %v2220_v60, %v7055_v2  ;;  %v2222_v28 = vpop.f32.mrb[46].mxu0 }
 0x2b7   :  { %v3006_v61 = vrot.slane %v5804_v18, 7  ;;  %v5806_v26 = vadd.f32 %v2222_v28, %v7057_v3  ;;  %v2224_v62 = vpop.f32.mrb[47].mxu0 }
 0x2b8   :  { %v5807_v47 = vadd.f32 %v2224_v62, %v7059_v4 }
 0x2b9   :  { %v3144_v52 = vsel %vm2972_vm0, 0.0, %v3006_v61  ;;  %v3007_v46 = vrot.slane %v5806_v26, 7 }
 0x2ba   :  { %v7471_v30 = vadd.f32 %v5805_v44, %v3144_v52 }
 0x2bb   :  { %v3008_v50 = vsel %vm2972_vm0, %v3006_v61, %v3007_v46 }
 0x2bc   :  { %v7474_v22 = vadd.f32 %v5807_v47, %v3008_v50  ;;  %v2228_v63 = vpop.f32.mrb[48].mxu0 }
 0x2bd   :  { %v5808_v6 = vadd.f32 %v2228_v63, %v7065_v5  ;;  %v2230_v2 = vpop.f32.mrb[49].mxu0  ;;  %v8690_v63 = vld [vmem:[#allocation11_spill] sm:$0xff] }
 0x2be   :  { %v5809_v53 = vadd.f32 %v2230_v2, %v7067_v7  ;;  %v2232_v57 = vpop.f32.mrb[50].mxu0  ;;  %v8691_v2 = vld [vmem:[#allocation12_spill] sm:$0xff] }
 0x2bf   :  { %v3009_v3 = vrot.slane %v5808_v6, 7  ;;  %v5810_v59 = vadd.f32 %v2232_v57, %v7069_v10  ;;  %v2234_v4 = vpop.f32.mrb[51].mxu0 }
 0x2c0   :  { %v5811_v38 = vadd.f32 %v2234_v4, %v7071_v11  ;;  %v8693_v4 = vld [vmem:[#allocation14_spill] sm:$0xff] }
 0x2c1   :  { %v3145_v12 = vsel %vm2972_vm0, 0.0, %v3009_v3  ;;  %v3010_v41 = vrot.slane %v5810_v59, 7 }
 0x2c2   :  { %v7481_v40 = vadd.f32 %v5809_v53, %v3145_v12 }
 0x2c3   :  { %v3011_v20 = vsel %vm2972_vm0, %v3009_v3, %v3010_v41  ;;  %v8692_v3 = vld [vmem:[#allocation13_spill] sm:$0xff] }
 0x2c4   :  { %v7484_v18 = vadd.f32 %v5811_v38, %v3011_v20  ;;  %v2238_v5 = vpop.f32.mrb[52].mxu0 }
 0x2c5   :  { %v5812_v60 = vadd.f32 %v2238_v5, %v7077_v16  ;;  %v2240_v7 = vpop.f32.mrb[53].mxu0 }
 0x2c6   :  { %v5813_v44 = vadd.f32 %v2240_v7, %v7079_v17  ;;  %v2242_v28 = vpop.f32.mrb[54].mxu0 }
 0x2c7   :  { %v3012_v10 = vrot.slane %v5812_v60, 7  ;;  %v5814_v61 = vadd.f32 %v2242_v28, %v7081_v24  ;;  %v2244_v11 = vpop.f32.mrb[55].mxu0 }
 0x2c8   :  { %v5815_v26 = vadd.f32 %v2244_v11, %v7083_v25 }
 0x2c9   :  { %v3146_v62 = vsel %vm2972_vm0, 0.0, %v3012_v10  ;;  %v3013_v47 = vrot.slane %v5814_v61, 7  ;;  %v8695_v61 = vld [vmem:[#allocation16_spill] sm:$0xff] }
 0x2ca   :  { %v7491_v52 = vadd.f32 %v5813_v44, %v3146_v62  ;;  %v8694_v44 = vld [vmem:[#allocation15_spill] sm:$0xff] }
 0x2cb   :  { %v3014_v46 = vsel %vm2972_vm0, %v3012_v10, %v3013_v47  ;;  %v8696_v47 = vld [vmem:[#allocation17_spill] sm:$0xff] }
 0x2cc   :  { %v7494_v50 = vadd.f32 %v5815_v26, %v3014_v46  ;;  %v2248_v16 = vpop.f32.mrb[56].mxu0 }
 0x2cd   :  { %v5816_v6 = vadd.f32 %v2248_v16, %v8690_v63  ;;  %v2250_v17 = vpop.f32.mrb[57].mxu0  ;;  %v8697_v63 = vld [vmem:[#allocation18_spill] sm:$0xff] }
 0x2ce   :  { %v5817_v53 = vadd.f32 %v2250_v17, %v8691_v2  ;;  %v2252_v57 = vpop.f32.mrb[58].mxu0 }
 0x2cf   :  { %v3015_v24 = vrot.slane %v5816_v6, 7  ;;  %v5818_v59 = vadd.f32 %v2252_v57, %v8692_v3  ;;  %v2254_v25 = vpop.f32.mrb[59].mxu0 }
 0x2d0   :  { %v5819_v38 = vadd.f32 %v2254_v25, %v8693_v4  ;;  %v8698_v25 = vld [vmem:[#allocation19_spill] sm:$0xff] }
 0x2d1   :  { %v3147_v12 = vsel %vm2972_vm0, 0.0, %v3015_v24  ;;  %v3016_v41 = vrot.slane %v5818_v59, 7 }
 0x2d2   :  { %v7501_v20 = vadd.f32 %v5817_v53, %v3147_v12 }
 0x2d3   :  { %v3017_v5 = vsel %vm2972_vm0, %v3015_v24, %v3016_v41  ;;  %v8699_v41 = vld [vmem:[#allocation20_spill] sm:$0xff] }
 0x2d4   :  { %v7504_v60 = vadd.f32 %v5819_v38, %v3017_v5  ;;  %v2258_v7 = vpop.f32.mrb[60].mxu0 }
 0x2d5   :  { %v5820_v28 = vadd.f32 %v2258_v7, %v8694_v44  ;;  %v2260_v10 = vpop.f32.mrb[61].mxu0 }
 0x2d6   :  { %v5821_v11 = vadd.f32 %v2260_v10, %v8695_v61  ;;  %v2262_v26 = vpop.f32.mrb[62].mxu0  ;;  %v8700_v61 = vld [vmem:[#allocation21_spill] sm:$0xff] }
 0x2d7   :  { %v3018_v62 = vrot.slane %v5820_v28, 7  ;;  %v5822_v46 = vadd.f32 %v2262_v26, %v8696_v47  ;;  %v2264_v16 = vpop.f32.mrb[63].mxu0 }
 0x2d8   :  { %v5823_v6 = vadd.f32 %v2264_v16, %v8697_v63  ;;  %v8701_v16 = vld [vmem:[#allocation22_spill] sm:$0xff] }
 0x2d9   :  { %v3148_v17 = vsel %vm2972_vm0, 0.0, %v3018_v62  ;;  %v3019_v2 = vrot.slane %v5822_v46, 7 }
 0x2da   :  { %v7511_v53 = vadd.f32 %v5821_v11, %v3148_v17 }
 0x2db   :  { %v3020_v57 = vsel %vm2972_vm0, %v3018_v62, %v3019_v2 }
 0x2dc   :  { %v7514_v24 = vadd.f32 %v5823_v6, %v3020_v57  ;;  %v2268_v3 = vpop.f32.mrb[64].mxu0  ;;  %v5714_v59 = vpop.f32.mrb[96].mxu1 }
 0x2dd   :  { %v5824_v4 = vadd.f32 %v2268_v3, %v8698_v25  ;;  %v2270_v38 = vpop.f32.mrb[65].mxu0  ;;  %v2461_v12 = vpop.f32.mrb[97].mxu1  ;;  %v3233_v10 = vrot.slane %v5714_v59, 1  ;;  %v7526_v59 = vld [vmem:[%s8587_s2] ss:$0 sm:$0xff] }
 0x2de   :  { %v5825_v5 = vadd.f32 %v2270_v38, %v8699_v41  ;;  %v2272_v7 = vpop.f32.mrb[66].mxu0  ;;  %v5715_v44 = vpop.f32.mrb[98].mxu1  ;;  %v3230_v46 = vrot.slane %v2461_v12, 1 }
 0x2df   :  { %v3021_v28 = vrot.slane %v5824_v4, 7  ;;  %v5826_v11 = vadd.f32 %v2272_v7, %v8700_v61  ;;  %v3234_v26 = vrot.slane %v5715_v44, 1  ;;  %v2274_v47 = vpop.f32.mrb[67].mxu0  ;;  %v2464_v62 = vpop.f32.mrb[99].mxu1 }
 0x2e0   :  { %v5827_v63 = vadd.f32 %v2274_v47, %v8701_v16  ;;  %v3231_v6 = vrot.slane %v2464_v62, 1  ;;  %v8702_v47 = vld [vmem:[#allocation23_spill] sm:$0xff] }
 0x2e1   :  { %v3149_v17 = vsel %vm2972_vm0, 0.0, %v3021_v28  ;;  %v3022_v2 = vrot.slane %v5826_v11, 7  ;;  %v3391_v57 = vsel %vm3229_vm1, %v3234_v26, 0.0  ;;  %v3235_v3 = vsel %vm3229_vm1, %v3233_v10, %v3234_v26 }
 0x2e2   :  { %v7528_v25 = vadd.f32 %v5825_v5, %v3149_v17  ;;  %v3489_v4 = vadd.f32 %v7386_v15, %v3391_v57  ;;  %v3390_v38 = vsel %vm3229_vm1, %v3231_v6, 0.0  ;;  %v3488_v12 = vadd.f32 %v7381_v43, %v3235_v3 }
 0x2e3   :  { %v3023_v41 = vsel %vm2972_vm0, %v3021_v28, %v3022_v2  ;;  %v3487_v7 = vadd.f32 %v7376_v8, %v3390_v38  ;;  %v3232_v44 = vsel %vm3229_vm1, %v3230_v46, %v3231_v6  ;;  %v8703_v8 = vld [vmem:[#allocation24_spill] sm:$0xff] }
 0x2e4   :  { %v7536_v10 = vadd.f32 %v5827_v63, %v3023_v41  ;;  %v2278_v61 = vpop.f32.mrb[68].mxu0  ;;  %v5718_v11 = vpop.f32.mrb[100].mxu1  ;;  %v7539_v26 = vadd.f32 %v7526_v59, %v3488_v12  ;;  %v3486_v5 = vadd.f32 %v7371_v1, %v3232_v44  ;;  %v7543_v15 = vadd.f32 %v7526_v59, %v3489_v4  ;;  %v8705_v4 = vld [vmem:[#allocation25_spill] sm:$0xff] }
 0x2e5   :  { %v5828_v43 = vadd.f32 %v2278_v61, %v8702_v47  ;;  %v3239_v62 = vrot.slane %v5718_v11, 1  ;;  %v2280_v28 = vpop.f32.mrb[69].mxu0  ;;  %v2477_v16 = vpop.f32.mrb[101].mxu1  ;;  %v7553_v1 = vadd.f32 %v7526_v59, %v3487_v7  ;;  %v8706_v61 = vld [vmem:[#allocation26_spill] sm:$0xff] }
 0x2e6   :  { %v5829_v17 = vadd.f32 %v2280_v28, %v8703_v8  ;;  %v2282_v46 = vpop.f32.mrb[70].mxu0  ;;  %v5719_v63 = vpop.f32.mrb[102].mxu1  ;;  %v3623_v6 = vmul.f32 %v7539_v26, %v7539_v26  ;;  %v7550_v2 = vadd.f32 %v7526_v59, %v3486_v5  ;;  %v3236_v3 = vrot.slane %v2477_v16, 1 }
 0x2e7   :  { %8704 = vst [vmem:[#allocation11_spill] sm:$0xff] %v7553_v1  ;;  %v3024_v57 = vrot.slane %v5828_v43, 7  ;;  %v5830_v38 = vadd.f32 %v2282_v46, %v8705_v4  ;;  %v3240_v12 = vrot.slane %v5719_v63, 1  ;;  %v2284_v41 = vpop.f32.mrb[71].mxu0  ;;  %v2480_v44 = vpop.f32.mrb[103].mxu1  ;;  %v3624_v5 = vmul.f32 %v7543_v15, %v7543_v15 }
 0x2e8   :  { %v5831_v11 = vadd.f32 %v2284_v41, %v8706_v61  ;;  %v3237_v47 = vrot.slane %v2480_v44, 1  ;;  %3689 = vadd.xlane.f32.xlu1 %v3623_v6  ;;  %v3621_v28 = vmul.f32 %v7550_v2, %v7550_v2 }
 0x2e9   :  { %v3150_v7 = vsel %vm2972_vm0, 0.0, %v3024_v57  ;;  %v3025_v8 = vrot.slane %v5830_v38, 7  ;;  %v3241_v43 = vsel %vm3229_vm1, %v3239_v62, %v3240_v12  ;;  %v3393_v16 = vsel %vm3229_vm1, %v3240_v12, 0.0 }
 0x2ea   :  { %v7564_v46 = vadd.f32 %v5829_v17, %v3150_v7  ;;  %v3493_v63 = vadd.f32 %v7406_v23, %v3393_v16  ;;  %v3238_v4 = vsel %vm3229_vm1, %v3236_v3, %v3237_v47  ;;  %v3392_v6 = vsel %vm3229_vm1, %v3237_v47, 0.0  ;;  %3685 = vadd.xlane.f32.xlu0 %v3621_v28  ;;  %v8707_v47 = vld [vmem:[#allocation27_spill] sm:$0xff] }
 0x2eb   :  { %v3026_v41 = vsel %vm2972_vm0, %v3024_v57, %v3025_v8  ;;  %v3491_v44 = vadd.f32 %v7396_v21, %v3392_v6  ;;  %v3492_v61 = vadd.f32 %v7401_v39, %v3241_v43  ;;  %v3490_v38 = vadd.f32 %v7391_v56, %v3238_v4  ;;  %v8710_v6 = vld [vmem:[#allocation29_spill] sm:$0xff] }
 0x2ec   :  { %v7573_v62 = vadd.f32 %v5831_v11, %v3026_v41  ;;  %v5722_v12 = vpop.f32.mrb[104].mxu1  ;;  %3691 = vadd.xlane.f32.xlu1 %v3624_v5  ;;  %v2288_v17 = vpop.f32.mrb[72].mxu0  ;;  %v3622_v23 = vmul.f32 %v7553_v1, %v7553_v1  ;;  %v7578_v3 = vadd.f32 %v7526_v59, %v3493_v63  ;;  %v8709_v5 = vld [vmem:[#allocation28_spill] sm:$0xff]  ;;  %v8711_v1 = vld [vmem:[#allocation30_spill] sm:$0xff] }
 0x2ed   :  { %v5832_v28 = vadd.f32 %v2288_v17, %v8707_v47  ;;  %v2493_v57 = vpop.f32.mrb[105].mxu1  ;;  %v2290_v7 = vpop.f32.mrb[73].mxu0  ;;  %v7582_v21 = vadd.f32 %v7526_v59, %v3492_v61  ;;  %v7585_v56 = vadd.f32 %v7526_v59, %v3491_v44  ;;  %v3245_v39 = vrot.slane %v5722_v12, 1 }
 0x2ee   :  { %v3242_v11 = vrot.slane %v2493_v57, 1  ;;  %3687 = vadd.xlane.f32.xlu0 %v3622_v23  ;;  %v5833_v8 = vadd.f32 %v2290_v7, %v8709_v5  ;;  %v2292_v43 = vpop.f32.mrb[74].mxu0  ;;  %v5723_v16 = vpop.f32.mrb[106].mxu1  ;;  %v3628_v63 = vmul.f32 %v7578_v3, %v7578_v3  ;;  %v7597_v7 = vadd.f32 %v7526_v59, %v3490_v38 }
 0x2ef   :  { %8708 = vst [vmem:[#allocation12_spill] sm:$0xff] %v7582_v21  ;;  %v3027_v4 = vrot.slane %v5832_v28, 7  ;;  %v5834_v41 = vadd.f32 %v2292_v43, %v8710_v6  ;;  %v3246_v17 = vrot.slane %v5723_v16, 1  ;;  %v2294_v47 = vpop.f32.mrb[75].mxu0  ;;  %v2496_v61 = vpop.f32.mrb[107].mxu1  ;;  %v3627_v44 = vmul.f32 %v7582_v21, %v7582_v21 }
 0x2f0   :  { %v5835_v12 = vadd.f32 %v2294_v47, %v8711_v1  ;;  %v3243_v57 = vrot.slane %v2496_v61, 1  ;;  %3699 = vadd.xlane.f32.xlu1 %v3628_v63  ;;  %v3626_v23 = vmul.f32 %v7585_v56, %v7585_v56  ;;  %8712 = vst [vmem:[#allocation13_spill] sm:$0xff] %v7597_v7 }
 0x2f1   :  { %v3151_v28 = vsel %vm2972_vm0, 0.0, %v3027_v4  ;;  %v3028_v5 = vrot.slane %v5834_v41, 7  ;;  %v3247_v43 = vsel %vm3229_vm1, %v3245_v39, %v3246_v17  ;;  %v3395_v16 = vsel %vm3229_vm1, %v3246_v17, 0.0 }
 0x2f2   :  { %v7602_v6 = vadd.f32 %v5833_v8, %v3151_v28  ;;  %v3497_v21 = vadd.f32 %v7422_v49, %v3395_v16  ;;  %v3244_v1 = vsel %vm3229_vm1, %v3242_v11, %v3243_v57  ;;  %v3394_v63 = vsel %vm3229_vm1, %v3243_v57, 0.0  ;;  %3697 = vadd.xlane.f32.xlu0 %v3627_v44  ;;  %v8713_v44 = vld [vmem:[#allocation31_spill] sm:$0xff] }
 0x2f3   :  { %v3029_v47 = vsel %vm2972_vm0, %v3027_v4, %v3028_v5  ;;  %v3495_v38 = vadd.f32 %v7416_v29, %v3394_v63  ;;  %v3496_v61 = vadd.f32 %v7419_v13, %v3247_v43  ;;  %v3494_v41 = vadd.f32 %v7411_v54, %v3244_v1  ;;  %v8716_v63 = vld [vmem:[#allocation33_spill] sm:$0xff] }
 0x2f4   :  { %v7611_v39 = vadd.f32 %v5835_v12, %v3029_v47  ;;  %v5726_v17 = vpop.f32.mrb[108].mxu1  ;;  %3695 = vadd.xlane.f32.xlu1 %v3626_v23  ;;  %v2298_v8 = vpop.f32.mrb[76].mxu0  ;;  %v3625_v49 = vmul.f32 %v7597_v7, %v7597_v7  ;;  %v7616_v11 = vadd.f32 %v7526_v59, %v3497_v21  ;;  %v8715_v23 = vld [vmem:[#allocation32_spill] sm:$0xff]  ;;  %v8717_v7 = vld [vmem:[#allocation34_spill] sm:$0xff] }
 0x2f5   :  { %v5836_v57 = vadd.f32 %v2298_v8, %v8713_v44  ;;  %v2509_v4 = vpop.f32.mrb[109].mxu1  ;;  %v2300_v28 = vpop.f32.mrb[77].mxu0  ;;  %v7620_v29 = vadd.f32 %v7526_v59, %v3496_v61  ;;  %v7623_v54 = vadd.f32 %v7526_v59, %v3495_v38  ;;  %v3251_v13 = vrot.slane %v5726_v17, 1 }
 0x2f6   :  { %v3248_v12 = vrot.slane %v2509_v4, 1  ;;  %3693 = vadd.xlane.f32.xlu0 %v3625_v49  ;;  %v5837_v5 = vadd.f32 %v2300_v28, %v8715_v23  ;;  %v2302_v43 = vpop.f32.mrb[78].mxu0  ;;  %v5727_v16 = vpop.f32.mrb[110].mxu1  ;;  %v3632_v21 = vmul.f32 %v7616_v11, %v7616_v11  ;;  %v7635_v28 = vadd.f32 %v7526_v59, %v3494_v41 }
 0x2f7   :  { %8714 = vst [vmem:[#allocation14_spill] sm:$0xff] %v7620_v29  ;;  %v3030_v1 = vrot.slane %v5836_v57, 7  ;;  %v5838_v47 = vadd.f32 %v2302_v43, %v8716_v63  ;;  %v3252_v8 = vrot.slane %v5727_v16, 1  ;;  %v2304_v44 = vpop.f32.mrb[79].mxu0  ;;  %v2512_v61 = vpop.f32.mrb[111].mxu1  ;;  %v3631_v38 = vmul.f32 %v7620_v29, %v7620_v29 }
 0x2f8   :  { %v5839_v17 = vadd.f32 %v2304_v44, %v8717_v7  ;;  %v3249_v4 = vrot.slane %v2512_v61, 1  ;;  %3707 = vadd.xlane.f32.xlu1 %v3632_v21  ;;  %v3630_v49 = vmul.f32 %v7623_v54, %v7623_v54 }
 0x2f9   :  { %v3152_v57 = vsel %vm2972_vm0, 0.0, %v3030_v1  ;;  %v3031_v23 = vrot.slane %v5838_v47, 7  ;;  %v3253_v43 = vsel %vm3229_vm1, %v3251_v13, %v3252_v8  ;;  %v3397_v16 = vsel %vm3229_vm1, %v3252_v8, 0.0 }
 0x2fa   :  { %v7640_v63 = vadd.f32 %v5837_v5, %v3152_v57  ;;  %v3501_v29 = vadd.f32 %v7434_v35, %v3397_v16  ;;  %v3250_v7 = vsel %vm3229_vm1, %v3248_v12, %v3249_v4  ;;  %v3396_v21 = vsel %vm3229_vm1, %v3249_v4, 0.0  ;;  %3705 = vadd.xlane.f32.xlu0 %v3631_v38  ;;  %v8718_v38 = vld [vmem:[#allocation35_spill] sm:$0xff] }
 0x2fb   :  { %v3032_v44 = vsel %vm2972_vm0, %v3030_v1, %v3031_v23  ;;  %v3499_v41 = vadd.f32 %v7428_v55, %v3396_v21  ;;  %v3500_v61 = vadd.f32 %v7431_v14, %v3253_v43  ;;  %v3498_v47 = vadd.f32 %v7425_v51, %v3250_v7 }
 0x2fc   :  { %v7649_v13 = vadd.f32 %v5839_v17, %v3032_v44  ;;  %v5730_v8 = vpop.f32.mrb[112].mxu1  ;;  %3703 = vadd.xlane.f32.xlu1 %v3630_v49  ;;  %v2308_v5 = vpop.f32.mrb[80].mxu0  ;;  %v3629_v35 = vmul.f32 %v7635_v28, %v7635_v28  ;;  %v7654_v12 = vadd.f32 %v7526_v59, %v3501_v29  ;;  %v8720_v49 = vld [vmem:[#allocation36_spill] sm:$0xff] }
 0x2fd   :  { %v5840_v4 = vadd.f32 %v2308_v5, %v8718_v38  ;;  %v2525_v1 = vpop.f32.mrb[113].mxu1  ;;  %v2310_v57 = vpop.f32.mrb[81].mxu0  ;;  %v7658_v55 = vadd.f32 %v7526_v59, %v3500_v61  ;;  %v7661_v51 = vadd.f32 %v7526_v59, %v3499_v41  ;;  %v3257_v14 = vrot.slane %v5730_v8, 1  ;;  %v8721_v38 = vld [vmem:[#allocation37_spill] sm:$0xff] }
 0x2fe   :  { %v3254_v17 = vrot.slane %v2525_v1, 1  ;;  %3701 = vadd.xlane.f32.xlu0 %v3629_v35  ;;  %v5841_v23 = vadd.f32 %v2310_v57, %v8720_v49  ;;  %v2312_v43 = vpop.f32.mrb[82].mxu0  ;;  %v5731_v16 = vpop.f32.mrb[114].mxu1  ;;  %v3636_v29 = vmul.f32 %v7654_v12, %v7654_v12  ;;  %v7673_v57 = vadd.f32 %v7526_v59, %v3498_v47 }
 0x2ff   :  { %8719 = vst [vmem:[#allocation15_spill] sm:$0xff] %v7658_v55  ;;  %v3033_v7 = vrot.slane %v5840_v4, 7  ;;  %v5842_v21 = vadd.f32 %v2312_v43, %v7165_v33  ;;  %v3258_v44 = vrot.slane %v5731_v16, 1  ;;  %v2314_v5 = vpop.f32.mrb[83].mxu0  ;;  %v2528_v61 = vpop.f32.mrb[115].mxu1  ;;  %v3635_v41 = vmul.f32 %v7658_v55, %v7658_v55 }
 0x300   :  { %v5843_v8 = vadd.f32 %v2314_v5, %v8721_v38  ;;  %v3255_v1 = vrot.slane %v2528_v61, 1  ;;  %3715 = vadd.xlane.f32.xlu1 %v3636_v29  ;;  %v3634_v35 = vmul.f32 %v7661_v51, %v7661_v51  ;;  %8722 = vst [vmem:[#allocation16_spill] sm:$0xff] %v7673_v57 }
 0x301   :  { %v3153_v4 = vsel %vm2972_vm0, 0.0, %v3033_v7  ;;  %v3034_v49 = vrot.slane %v5842_v21, 7  ;;  %v3259_v33 = vsel %vm3229_vm1, %v3257_v14, %v3258_v44  ;;  %v3399_v43 = vsel %vm3229_vm1, %v3258_v44, 0.0 }
 0x302   :  { %v7678_v16 = vadd.f32 %v5841_v23, %v3153_v4  ;;  %v3505_v55 = vadd.f32 %v7454_v0, %v3399_v43  ;;  %v3256_v5 = vsel %vm3229_vm1, %v3254_v17, %v3255_v1  ;;  %v3398_v29 = vsel %vm3229_vm1, %v3255_v1, 0.0  ;;  %3713 = vadd.xlane.f32.xlu0 %v3635_v41  ;;  %v8723_v41 = vld [vmem:[#allocation38_spill] sm:$0xff] }
 0x303   :  { %v3035_v61 = vsel %vm2972_vm0, %v3033_v7, %v3034_v49  ;;  %v3503_v47 = vadd.f32 %v7444_v9, %v3398_v29  ;;  %v3504_v38 = vadd.f32 %v7451_v48, %v3259_v33  ;;  %v3502_v21 = vadd.f32 %v7441_v34, %v3256_v5  ;;  %v8726_v29 = vld [vmem:[#allocation40_spill] sm:$0xff] }
 0x304   :  { %v7687_v14 = vadd.f32 %v5843_v8, %v3035_v61  ;;  %v5734_v44 = vpop.f32.mrb[116].mxu1  ;;  %3711 = vadd.xlane.f32.xlu1 %v3634_v35  ;;  %v2318_v23 = vpop.f32.mrb[84].mxu0  ;;  %v3633_v0 = vmul.f32 %v7673_v57, %v7673_v57  ;;  %v7692_v17 = vadd.f32 %v7526_v59, %v3505_v55  ;;  %v8725_v35 = vld [vmem:[#allocation39_spill] sm:$0xff]  ;;  %v8727_v57 = vld [vmem:[#allocation41_spill] sm:$0xff] }
 0x305   :  { %v5844_v1 = vadd.f32 %v2318_v23, %v8723_v41  ;;  %v2541_v7 = vpop.f32.mrb[117].mxu1  ;;  %v2320_v4 = vpop.f32.mrb[85].mxu0  ;;  %v7696_v9 = vadd.f32 %v7526_v59, %v3504_v38  ;;  %v7699_v34 = vadd.f32 %v7526_v59, %v3503_v47  ;;  %v3263_v48 = vrot.slane %v5734_v44, 1 }
 0x306   :  { %v3260_v8 = vrot.slane %v2541_v7, 1  ;;  %3709 = vadd.xlane.f32.xlu0 %v3633_v0  ;;  %v5845_v49 = vadd.f32 %v2320_v4, %v8725_v35  ;;  %v2322_v33 = vpop.f32.mrb[86].mxu0  ;;  %v5735_v43 = vpop.f32.mrb[118].mxu1  ;;  %v3640_v55 = vmul.f32 %v7692_v17, %v7692_v17  ;;  %v7711_v4 = vadd.f32 %v7526_v59, %v3502_v21 }
 0x307   :  { %8724 = vst [vmem:[#allocation17_spill] sm:$0xff] %v7696_v9  ;;  %v3036_v5 = vrot.slane %v5844_v1, 7  ;;  %v5846_v61 = vadd.f32 %v2322_v33, %v8726_v29  ;;  %v3264_v23 = vrot.slane %v5735_v43, 1  ;;  %v2324_v41 = vpop.f32.mrb[87].mxu0  ;;  %v2544_v38 = vpop.f32.mrb[119].mxu1  ;;  %v3639_v47 = vmul.f32 %v7696_v9, %v7696_v9 }
 0x308   :  { %v5847_v44 = vadd.f32 %v2324_v41, %v8727_v57  ;;  %v3261_v7 = vrot.slane %v2544_v38, 1  ;;  %3723 = vadd.xlane.f32.xlu1 %v3640_v55  ;;  %v3638_v0 = vmul.f32 %v7699_v34, %v7699_v34 }
 0x309   :  { %v3154_v1 = vsel %vm2972_vm0, 0.0, %v3036_v5  ;;  %v3037_v35 = vrot.slane %v5846_v61, 7  ;;  %v3265_v33 = vsel %vm3229_vm1, %v3263_v48, %v3264_v23  ;;  %v3401_v43 = vsel %vm3229_vm1, %v3264_v23, 0.0 }
 0x30a   :  { %v7716_v29 = vadd.f32 %v5845_v49, %v3154_v1  ;;  %v3509_v9 = vadd.f32 %v7474_v22, %v3401_v43  ;;  %v3262_v57 = vsel %vm3229_vm1, %v3260_v8, %v3261_v7  ;;  %v3400_v55 = vsel %vm3229_vm1, %v3261_v7, 0.0  ;;  %3721 = vadd.xlane.f32.xlu0 %v3639_v47 }
 0x30b   :  { %v3038_v41 = vsel %vm2972_vm0, %v3036_v5, %v3037_v35  ;;  %v3507_v21 = vadd.f32 %v7464_v42, %v3400_v55  ;;  %v3508_v38 = vadd.f32 %v7471_v30, %v3265_v33  ;;  %v3506_v61 = vadd.f32 %v7461_v31, %v3262_v57 }
 0x30c   :  { %v7725_v48 = vadd.f32 %v5847_v44, %v3038_v41  ;;  %v5738_v23 = vpop.f32.mrb[120].mxu1  ;;  %3719 = vadd.xlane.f32.xlu1 %v3638_v0  ;;  %v2328_v49 = vpop.f32.mrb[88].mxu0  ;;  %v3637_v22 = vmul.f32 %v7711_v4, %v7711_v4  ;;  %v7730_v8 = vadd.f32 %v7526_v59, %v3509_v9  ;;  %v8729_v0 = vld [vmem:[#allocation42_spill] sm:$0xff] }
 0x30d   :  { %v5848_v47 = vadd.f32 %v2328_v49, %v7186_v37  ;;  %v2557_v5 = vpop.f32.mrb[121].mxu1  ;;  %v2330_v7 = vpop.f32.mrb[89].mxu0  ;;  %v7734_v42 = vadd.f32 %v7526_v59, %v3508_v38  ;;  %v7737_v31 = vadd.f32 %v7526_v59, %v3507_v21  ;;  %v3269_v30 = vrot.slane %v5738_v23, 1  ;;  %v8730_v37 = vld [vmem:[#allocation43_spill] sm:$0xff]  ;;  %v8731_v49 = vld [vmem:[#allocation44_spill] sm:$0xff] }
 0x30e   :  { %v3266_v44 = vrot.slane %v2557_v5, 1  ;;  %3717 = vadd.xlane.f32.xlu0 %v3637_v22  ;;  %v5849_v1 = vadd.f32 %v2330_v7, %v8729_v0  ;;  %v2332_v35 = vpop.f32.mrb[90].mxu0  ;;  %v5739_v33 = vpop.f32.mrb[122].mxu1  ;;  %v3644_v9 = vmul.f32 %v7730_v8, %v7730_v8  ;;  %v7749_v7 = vadd.f32 %v7526_v59, %v3506_v61 }
 0x30f   :  { %8728 = vst [vmem:[#allocation18_spill] sm:$0xff] %v7734_v42  ;;  %v3039_v43 = vrot.slane %v5848_v47, 7  ;;  %v5850_v57 = vadd.f32 %v2332_v35, %v8730_v37  ;;  %v3270_v55 = vrot.slane %v5739_v33, 1  ;;  %v2334_v41 = vpop.f32.mrb[91].mxu0  ;;  %v2560_v38 = vpop.f32.mrb[123].mxu1  ;;  %v3643_v21 = vmul.f32 %v7734_v42, %v7734_v42 }
 0x310   :  { %v5851_v23 = vadd.f32 %v2334_v41, %v8731_v49  ;;  %v3267_v5 = vrot.slane %v2560_v38, 1  ;;  %3731 = vadd.xlane.f32.xlu1 %v3644_v9  ;;  %v3642_v22 = vmul.f32 %v7737_v31, %v7737_v31 }
 0x311   :  { %v3155_v47 = vsel %vm2972_vm0, 0.0, %v3039_v43  ;;  %v3040_v0 = vrot.slane %v5850_v57, 7  ;;  %v3271_v35 = vsel %vm3229_vm1, %v3269_v30, %v3270_v55  ;;  %v3403_v33 = vsel %vm3229_vm1, %v3270_v55, 0.0 }
 0x312   :  { %v7754_v37 = vadd.f32 %v5849_v1, %v3155_v47  ;;  %v3513_v42 = vadd.f32 %v7494_v50, %v3403_v33  ;;  %v3268_v41 = vsel %vm3229_vm1, %v3266_v44, %v3267_v5  ;;  %v3402_v9 = vsel %vm3229_vm1, %v3267_v5, 0.0  ;;  %3729 = vadd.xlane.f32.xlu0 %v3643_v21 }
 0x313   :  { %v3041_v38 = vsel %vm2972_vm0, %v3039_v43, %v3040_v0  ;;  %v3511_v61 = vadd.f32 %v7484_v18, %v3402_v9  ;;  %v3512_v49 = vadd.f32 %v7491_v52, %v3271_v35  ;;  %v3510_v57 = vadd.f32 %v7481_v40, %v3268_v41 }
 0x314   :  { %v7763_v30 = vadd.f32 %v5851_v23, %v3041_v38  ;;  %v5742_v55 = vpop.f32.mrb[124].mxu1  ;;  %3727 = vadd.xlane.f32.xlu1 %v3642_v22  ;;  %v2338_v1 = vpop.f32.mrb[92].mxu0  ;;  %v3641_v50 = vmul.f32 %v7749_v7, %v7749_v7  ;;  %v7768_v44 = vadd.f32 %v7526_v59, %v3513_v42  ;;  %v8733_v22 = vld [vmem:[#allocation45_spill] sm:$0xff] }
 0x315   :  { %v5852_v21 = vadd.f32 %v2338_v1, %v7198_v27  ;;  %v2573_v43 = vpop.f32.mrb[125].mxu1  ;;  %v2340_v5 = vpop.f32.mrb[93].mxu0  ;;  %v7772_v18 = vadd.f32 %v7526_v59, %v3512_v49  ;;  %v7775_v40 = vadd.f32 %v7526_v59, %v3511_v61  ;;  %v3275_v52 = vrot.slane %v5742_v55, 1  ;;  %v8734_v27 = vld [vmem:[#allocation46_spill] sm:$0xff]  ;;  %v8735_v1 = vld [vmem:[#allocation47_spill] sm:$0xff] }
 0x316   :  { %v3272_v23 = vrot.slane %v2573_v43, 1  ;;  %3725 = vadd.xlane.f32.xlu0 %v3641_v50  ;;  %v5853_v47 = vadd.f32 %v2340_v5, %v8733_v22  ;;  %v2342_v0 = vpop.f32.mrb[94].mxu0  ;;  %v5743_v35 = vpop.f32.mrb[126].mxu1  ;;  %v3648_v42 = vmul.f32 %v7768_v44, %v7768_v44  ;;  %v7787_v5 = vadd.f32 %v7526_v59, %v3510_v57 }
 0x317   :  { %8732 = vst [vmem:[#allocation19_spill] sm:$0xff] %v7772_v18  ;;  %v3042_v33 = vrot.slane %v5852_v21, 7  ;;  %v5854_v41 = vadd.f32 %v2342_v0, %v8734_v27  ;;  %v3276_v9 = vrot.slane %v5743_v35, 1  ;;  %v2344_v38 = vpop.f32.mrb[95].mxu0  ;;  %v2576_v49 = vpop.f32.mrb[127].mxu1  ;;  %v3647_v61 = vmul.f32 %v7772_v18, %v7772_v18 }
 0x318   :  { %v5855_v55 = vadd.f32 %v2344_v38, %v8735_v1  ;;  %v3273_v43 = vrot.slane %v2576_v49, 1  ;;  %3739 = vadd.xlane.f32.xlu1 %v3648_v42  ;;  %v3646_v50 = vmul.f32 %v7775_v40, %v7775_v40  ;;  %8736 = vst [vmem:[#allocation20_spill] sm:$0xff] %v7787_v5 }
 0x319   :  { %v3156_v21 = vsel %vm2972_vm0, 0.0, %v3042_v33  ;;  %v3043_v22 = vrot.slane %v5854_v41, 7  ;;  %v3277_v0 = vsel %vm3229_vm1, %v3275_v52, %v3276_v9  ;;  %v3405_v35 = vsel %vm3229_vm1, %v3276_v9, 0.0 }
 0x31a   :  { %v7792_v27 = vadd.f32 %v5853_v47, %v3156_v21  ;;  %v3517_v18 = vadd.f32 %v7514_v24, %v3405_v35  ;;  %v3274_v38 = vsel %vm3229_vm1, %v3272_v23, %v3273_v43  ;;  %v3404_v42 = vsel %vm3229_vm1, %v3273_v43, 0.0  ;;  %3737 = vadd.xlane.f32.xlu0 %v3647_v61  ;;  %v8737_v61 = vld [vmem:[#allocation48_spill] sm:$0xff] }
 0x31b   :  { %v3044_v49 = vsel %vm2972_vm0, %v3042_v33, %v3043_v22  ;;  %v3515_v57 = vadd.f32 %v7504_v60, %v3404_v42  ;;  %v3516_v1 = vadd.f32 %v7511_v53, %v3277_v0  ;;  %v3514_v41 = vadd.f32 %v7501_v20, %v3274_v38  ;;  %v8740_v42 = vld [vmem:[#allocation50_spill] sm:$0xff] }
 0x31c   :  { %v7801_v52 = vadd.f32 %v5855_v55, %v3044_v49  ;;  %v5746_v9 = vpop.f32.mrb[128].mxu1  ;;  %3735 = vadd.xlane.f32.xlu1 %v3646_v50  ;;  %v2348_v47 = vpop.f32.mrb[96].mxu0  ;;  %v3645_v24 = vmul.f32 %v7787_v5, %v7787_v5  ;;  %v7806_v23 = vadd.f32 %v7526_v59, %v3517_v18  ;;  %v8739_v50 = vld [vmem:[#allocation49_spill] sm:$0xff]  ;;  %v8741_v5 = vld [vmem:[#allocation51_spill] sm:$0xff] }
 0x31d   :  { %v5856_v43 = vadd.f32 %v2348_v47, %v8737_v61  ;;  %v2589_v33 = vpop.f32.mrb[129].mxu1  ;;  %v2350_v21 = vpop.f32.mrb[97].mxu0  ;;  %v7810_v60 = vadd.f32 %v7526_v59, %v3516_v1  ;;  %v7813_v20 = vadd.f32 %v7526_v59, %v3515_v57  ;;  %v3281_v53 = vrot.slane %v5746_v9, 1 }
 0x31e   :  { %v3278_v55 = vrot.slane %v2589_v33, 1  ;;  %3733 = vadd.xlane.f32.xlu0 %v3645_v24  ;;  %v5857_v22 = vadd.f32 %v2350_v21, %v8739_v50  ;;  %v2352_v0 = vpop.f32.mrb[98].mxu0  ;;  %v5747_v35 = vpop.f32.mrb[130].mxu1  ;;  %v3652_v18 = vmul.f32 %v7806_v23, %v7806_v23  ;;  %v7825_v21 = vadd.f32 %v7526_v59, %v3514_v41 }
 0x31f   :  { %8738 = vst [vmem:[#allocation21_spill] sm:$0xff] %v7810_v60  ;;  %v3045_v38 = vrot.slane %v5856_v43, 7  ;;  %v5858_v49 = vadd.f32 %v2352_v0, %v8740_v42  ;;  %v3282_v47 = vrot.slane %v5747_v35, 1  ;;  %v2354_v61 = vpop.f32.mrb[99].mxu0  ;;  %v2592_v1 = vpop.f32.mrb[131].mxu1  ;;  %v3651_v57 = vmul.f32 %v7810_v60, %v7810_v60 }
 0x320   :  { %v5859_v9 = vadd.f32 %v2354_v61, %v8741_v5  ;;  %v3279_v33 = vrot.slane %v2592_v1, 1  ;;  %3747 = vadd.xlane.f32.xlu1 %v3652_v18  ;;  %v3650_v24 = vmul.f32 %v7813_v20, %v7813_v20  ;;  %8742 = vst [vmem:[#allocation22_spill] sm:$0xff] %v7825_v21 }
 0x321   :  { %v3157_v43 = vsel %vm2972_vm0, 0.0, %v3045_v38  ;;  %v3046_v50 = vrot.slane %v5858_v49, 7  ;;  %v3283_v0 = vsel %vm3229_vm1, %v3281_v53, %v3282_v47  ;;  %v3407_v35 = vsel %vm3229_vm1, %v3282_v47, 0.0 }
 0x322   :  { %v7830_v42 = vadd.f32 %v5857_v22, %v3157_v43  ;;  %v3521_v60 = vadd.f32 %v7573_v62, %v3407_v35  ;;  %v3280_v5 = vsel %vm3229_vm1, %v3278_v55, %v3279_v33  ;;  %v3406_v18 = vsel %vm3229_vm1, %v3279_v33, 0.0  ;;  %3745 = vadd.xlane.f32.xlu0 %v3651_v57  ;;  %v8743_v57 = vld [vmem:[#allocation52_spill] sm:$0xff] }
 0x323   :  { %v3047_v61 = vsel %vm2972_vm0, %v3045_v38, %v3046_v50  ;;  %v3519_v41 = vadd.f32 %v7536_v10, %v3406_v18  ;;  %v3520_v1 = vadd.f32 %v7564_v46, %v3283_v0  ;;  %v3518_v49 = vadd.f32 %v7528_v25, %v3280_v5  ;;  %v8746_v18 = vld [vmem:[#allocation54_spill] sm:$0xff] }
 0x324   :  { %v7839_v53 = vadd.f32 %v5859_v9, %v3047_v61  ;;  %v5750_v47 = vpop.f32.mrb[132].mxu1  ;;  %3743 = vadd.xlane.f32.xlu1 %v3650_v24  ;;  %v2358_v22 = vpop.f32.mrb[100].mxu0  ;;  %v3649_v62 = vmul.f32 %v7825_v21, %v7825_v21  ;;  %v7844_v55 = vadd.f32 %v7526_v59, %v3521_v60  ;;  %v8745_v24 = vld [vmem:[#allocation53_spill] sm:$0xff]  ;;  %v8747_v21 = vld [vmem:[#allocation55_spill] sm:$0xff] }
 0x325   :  { %v5860_v33 = vadd.f32 %v2358_v22, %v8743_v57  ;;  %v2605_v38 = vpop.f32.mrb[133].mxu1  ;;  %v2360_v43 = vpop.f32.mrb[101].mxu0  ;;  %v7848_v10 = vadd.f32 %v7526_v59, %v3520_v1  ;;  %v7851_v25 = vadd.f32 %v7526_v59, %v3519_v41  ;;  %v3287_v46 = vrot.slane %v5750_v47, 1 }
 0x326   :  { %v3284_v9 = vrot.slane %v2605_v38, 1  ;;  %3741 = vadd.xlane.f32.xlu0 %v3649_v62  ;;  %v5861_v50 = vadd.f32 %v2360_v43, %v8745_v24  ;;  %v2362_v0 = vpop.f32.mrb[102].mxu0  ;;  %v5751_v35 = vpop.f32.mrb[134].mxu1  ;;  %v3656_v60 = vmul.f32 %v7844_v55, %v7844_v55  ;;  %v7863_v43 = vadd.f32 %v7526_v59, %v3518_v49 }
 0x327   :  { %8744 = vst [vmem:[#allocation23_spill] sm:$0xff] %v7848_v10  ;;  %v3048_v5 = vrot.slane %v5860_v33, 7  ;;  %v5862_v61 = vadd.f32 %v2362_v0, %v8746_v18  ;;  %v3288_v22 = vrot.slane %v5751_v35, 1  ;;  %v2364_v57 = vpop.f32.mrb[103].mxu0  ;;  %v2608_v1 = vpop.f32.mrb[135].mxu1  ;;  %v3655_v41 = vmul.f32 %v7848_v10, %v7848_v10 }
 0x328   :  { %v5863_v47 = vadd.f32 %v2364_v57, %v8747_v21  ;;  %v3285_v38 = vrot.slane %v2608_v1, 1  ;;  %3755 = vadd.xlane.f32.xlu1 %v3656_v60  ;;  %v3654_v62 = vmul.f32 %v7851_v25, %v7851_v25  ;;  %8748 = vst [vmem:[#allocation24_spill] sm:$0xff] %v7863_v43 }
 0x329   :  { %v3158_v33 = vsel %vm2972_vm0, 0.0, %v3048_v5  ;;  %v3049_v24 = vrot.slane %v5862_v61, 7  ;;  %v3289_v0 = vsel %vm3229_vm1, %v3287_v46, %v3288_v22  ;;  %v3409_v35 = vsel %vm3229_vm1, %v3288_v22, 0.0 }
 0x32a   :  { %v7868_v18 = vadd.f32 %v5861_v50, %v3158_v33  ;;  %v3525_v10 = vadd.f32 %v7649_v13, %v3409_v35  ;;  %v3286_v21 = vsel %vm3229_vm1, %v3284_v9, %v3285_v38  ;;  %v3408_v60 = vsel %vm3229_vm1, %v3285_v38, 0.0  ;;  %3753 = vadd.xlane.f32.xlu0 %v3655_v41  ;;  %v8749_v41 = vld [vmem:[#allocation56_spill] sm:$0xff] }
 0x32b   :  { %v3050_v57 = vsel %vm2972_vm0, %v3048_v5, %v3049_v24  ;;  %v3523_v49 = vadd.f32 %v7611_v39, %v3408_v60  ;;  %v3524_v1 = vadd.f32 %v7640_v63, %v3289_v0  ;;  %v3522_v61 = vadd.f32 %v7602_v6, %v3286_v21  ;;  %v8752_v60 = vld [vmem:[#allocation58_spill] sm:$0xff] }
 0x32c   :  { %v7877_v46 = vadd.f32 %v5863_v47, %v3050_v57  ;;  %v5754_v22 = vpop.f32.mrb[136].mxu1  ;;  %3751 = vadd.xlane.f32.xlu1 %v3654_v62  ;;  %v2368_v50 = vpop.f32.mrb[104].mxu0  ;;  %v3653_v13 = vmul.f32 %v7863_v43, %v7863_v43  ;;  %v7882_v9 = vadd.f32 %v7526_v59, %v3525_v10  ;;  %v8751_v62 = vld [vmem:[#allocation57_spill] sm:$0xff]  ;;  %v8753_v43 = vld [vmem:[#allocation59_spill] sm:$0xff] }
 0x32d   :  { %v5864_v38 = vadd.f32 %v2368_v50, %v8749_v41  ;;  %v2621_v5 = vpop.f32.mrb[137].mxu1  ;;  %v2370_v33 = vpop.f32.mrb[105].mxu0  ;;  %v7886_v39 = vadd.f32 %v7526_v59, %v3524_v1  ;;  %v7889_v6 = vadd.f32 %v7526_v59, %v3523_v49  ;;  %v3293_v63 = vrot.slane %v5754_v22, 1 }
 0x32e   :  { %v3290_v47 = vrot.slane %v2621_v5, 1  ;;  %3749 = vadd.xlane.f32.xlu0 %v3653_v13  ;;  %v5865_v24 = vadd.f32 %v2370_v33, %v8751_v62  ;;  %v2372_v0 = vpop.f32.mrb[106].mxu0  ;;  %v5755_v35 = vpop.f32.mrb[138].mxu1  ;;  %v3660_v10 = vmul.f32 %v7882_v9, %v7882_v9  ;;  %v7901_v33 = vadd.f32 %v7526_v59, %v3522_v61 }
 0x32f   :  { %8750 = vst [vmem:[#allocation25_spill] sm:$0xff] %v7886_v39  ;;  %v3051_v21 = vrot.slane %v5864_v38, 7  ;;  %v5866_v57 = vadd.f32 %v2372_v0, %v8752_v60  ;;  %v3294_v50 = vrot.slane %v5755_v35, 1  ;;  %v2374_v41 = vpop.f32.mrb[107].mxu0  ;;  %v2624_v1 = vpop.f32.mrb[139].mxu1  ;;  %v3659_v49 = vmul.f32 %v7886_v39, %v7886_v39 }
 0x330   :  { %v5867_v22 = vadd.f32 %v2374_v41, %v8753_v43  ;;  %v3291_v5 = vrot.slane %v2624_v1, 1  ;;  %3763 = vadd.xlane.f32.xlu1 %v3660_v10  ;;  %v3658_v13 = vmul.f32 %v7889_v6, %v7889_v6  ;;  %8754 = vst [vmem:[#allocation26_spill] sm:$0xff] %v7901_v33 }
 0x331   :  { %v3159_v38 = vsel %vm2972_vm0, 0.0, %v3051_v21  ;;  %v3052_v62 = vrot.slane %v5866_v57, 7  ;;  %v3295_v0 = vsel %vm3229_vm1, %v3293_v63, %v3294_v50  ;;  %v3411_v35 = vsel %vm3229_vm1, %v3294_v50, 0.0 }
 0x332   :  { %v7906_v60 = vadd.f32 %v5865_v24, %v3159_v38  ;;  %v3529_v39 = vadd.f32 %v7725_v48, %v3411_v35  ;;  %v3292_v43 = vsel %vm3229_vm1, %v3290_v47, %v3291_v5  ;;  %v3410_v10 = vsel %vm3229_vm1, %v3291_v5, 0.0  ;;  %3761 = vadd.xlane.f32.xlu0 %v3659_v49  ;;  %v8755_v49 = vld [vmem:[#allocation60_spill] sm:$0xff] }
 0x333   :  { %v3053_v41 = vsel %vm2972_vm0, %v3051_v21, %v3052_v62  ;;  %v3527_v61 = vadd.f32 %v7687_v14, %v3410_v10  ;;  %v3528_v1 = vadd.f32 %v7716_v29, %v3295_v0  ;;  %v3526_v57 = vadd.f32 %v7678_v16, %v3292_v43  ;;  %v8758_v10 = vld [vmem:[#allocation62_spill] sm:$0xff] }
 0x334   :  { %v7915_v63 = vadd.f32 %v5867_v22, %v3053_v41  ;;  %v5758_v50 = vpop.f32.mrb[140].mxu1  ;;  %3759 = vadd.xlane.f32.xlu1 %v3658_v13  ;;  %v2378_v24 = vpop.f32.mrb[108].mxu0  ;;  %v3657_v48 = vmul.f32 %v7901_v33, %v7901_v33  ;;  %v7920_v47 = vadd.f32 %v7526_v59, %v3529_v39  ;;  %v8757_v13 = vld [vmem:[#allocation61_spill] sm:$0xff]  ;;  %v8759_v33 = vld [vmem:[#allocation63_spill] sm:$0xff] }
 0x335   :  { %v5868_v5 = vadd.f32 %v2378_v24, %v8755_v49  ;;  %v2637_v21 = vpop.f32.mrb[141].mxu1  ;;  %v2380_v38 = vpop.f32.mrb[109].mxu0  ;;  %v7924_v14 = vadd.f32 %v7526_v59, %v3528_v1  ;;  %v7927_v16 = vadd.f32 %v7526_v59, %v3527_v61  ;;  %v3299_v29 = vrot.slane %v5758_v50, 1 }
 0x336   :  { %v3296_v22 = vrot.slane %v2637_v21, 1  ;;  %3757 = vadd.xlane.f32.xlu0 %v3657_v48  ;;  %v5869_v62 = vadd.f32 %v2380_v38, %v8757_v13  ;;  %v2382_v0 = vpop.f32.mrb[110].mxu0  ;;  %v5759_v35 = vpop.f32.mrb[142].mxu1  ;;  %v3664_v39 = vmul.f32 %v7920_v47, %v7920_v47  ;;  %v7939_v38 = vadd.f32 %v7526_v59, %v3526_v57 }
 0x337   :  { %8756 = vst [vmem:[#allocation27_spill] sm:$0xff] %v7924_v14  ;;  %v3054_v43 = vrot.slane %v5868_v5, 7  ;;  %v5870_v41 = vadd.f32 %v2382_v0, %v8758_v10  ;;  %v3300_v24 = vrot.slane %v5759_v35, 1  ;;  %v2384_v49 = vpop.f32.mrb[111].mxu0  ;;  %v2640_v1 = vpop.f32.mrb[143].mxu1  ;;  %v3663_v61 = vmul.f32 %v7924_v14, %v7924_v14 }
 0x338   :  { %v5871_v50 = vadd.f32 %v2384_v49, %v8759_v33  ;;  %v3297_v21 = vrot.slane %v2640_v1, 1  ;;  %3771 = vadd.xlane.f32.xlu1 %v3664_v39  ;;  %v3662_v48 = vmul.f32 %v7927_v16, %v7927_v16  ;;  %8760 = vst [vmem:[#allocation28_spill] sm:$0xff] %v7939_v38 }
 0x339   :  { %v3160_v5 = vsel %vm2972_vm0, 0.0, %v3054_v43  ;;  %v3055_v13 = vrot.slane %v5870_v41, 7  ;;  %v3301_v0 = vsel %vm3229_vm1, %v3299_v29, %v3300_v24  ;;  %v3413_v35 = vsel %vm3229_vm1, %v3300_v24, 0.0 }
 0x33a   :  { %v7944_v10 = vadd.f32 %v5869_v62, %v3160_v5  ;;  %v3533_v14 = vadd.f32 %v7801_v52, %v3413_v35  ;;  %v3298_v33 = vsel %vm3229_vm1, %v3296_v22, %v3297_v21  ;;  %v3412_v39 = vsel %vm3229_vm1, %v3297_v21, 0.0  ;;  %3769 = vadd.xlane.f32.xlu0 %v3663_v61  ;;  %v8761_v61 = vld [vmem:[#allocation64_spill] sm:$0xff] }
 0x33b   :  { %v3056_v49 = vsel %vm2972_vm0, %v3054_v43, %v3055_v13  ;;  %v3531_v57 = vadd.f32 %v7763_v30, %v3412_v39  ;;  %v3532_v1 = vadd.f32 %v7792_v27, %v3301_v0  ;;  %v3530_v41 = vadd.f32 %v7754_v37, %v3298_v33  ;;  %v8764_v39 = vld [vmem:[#allocation66_spill] sm:$0xff] }
 0x33c   :  { %v7953_v29 = vadd.f32 %v5871_v50, %v3056_v49  ;;  %v5762_v24 = vpop.f32.mrb[144].mxu1  ;;  %3767 = vadd.xlane.f32.xlu1 %v3662_v48  ;;  %v2388_v62 = vpop.f32.mrb[112].mxu0  ;;  %v3661_v52 = vmul.f32 %v7939_v38, %v7939_v38  ;;  %v7958_v22 = vadd.f32 %v7526_v59, %v3533_v14  ;;  %v8763_v48 = vld [vmem:[#allocation65_spill] sm:$0xff]  ;;  %v8765_v38 = vld [vmem:[#allocation67_spill] sm:$0xff] }
 0x33d   :  { %v5872_v21 = vadd.f32 %v2388_v62, %v8761_v61  ;;  %v2653_v43 = vpop.f32.mrb[145].mxu1  ;;  %v2390_v5 = vpop.f32.mrb[113].mxu0  ;;  %v7962_v30 = vadd.f32 %v7526_v59, %v3532_v1  ;;  %v7965_v37 = vadd.f32 %v7526_v59, %v3531_v57  ;;  %v3305_v27 = vrot.slane %v5762_v24, 1 }
 0x33e   :  { %v3302_v50 = vrot.slane %v2653_v43, 1  ;;  %3765 = vadd.xlane.f32.xlu0 %v3661_v52  ;;  %v5873_v13 = vadd.f32 %v2390_v5, %v8763_v48  ;;  %v2392_v0 = vpop.f32.mrb[114].mxu0  ;;  %v5763_v35 = vpop.f32.mrb[146].mxu1  ;;  %v3668_v14 = vmul.f32 %v7958_v22, %v7958_v22  ;;  %v7977_v5 = vadd.f32 %v7526_v59, %v3530_v41 }
 0x33f   :  { %8762 = vst [vmem:[#allocation29_spill] sm:$0xff] %v7962_v30  ;;  %v3057_v33 = vrot.slane %v5872_v21, 7  ;;  %v5874_v49 = vadd.f32 %v2392_v0, %v8764_v39  ;;  %v3306_v62 = vrot.slane %v5763_v35, 1  ;;  %v2394_v61 = vpop.f32.mrb[115].mxu0  ;;  %v2656_v1 = vpop.f32.mrb[147].mxu1  ;;  %v3667_v57 = vmul.f32 %v7962_v30, %v7962_v30 }
 0x340   :  { %v5875_v24 = vadd.f32 %v2394_v61, %v8765_v38  ;;  %v3303_v43 = vrot.slane %v2656_v1, 1  ;;  %3779 = vadd.xlane.f32.xlu1 %v3668_v14  ;;  %v3666_v52 = vmul.f32 %v7965_v37, %v7965_v37  ;;  %8766 = vst [vmem:[#allocation30_spill] sm:$0xff] %v7977_v5 }
 0x341   :  { %v3161_v21 = vsel %vm2972_vm0, 0.0, %v3057_v33  ;;  %v3058_v48 = vrot.slane %v5874_v49, 7  ;;  %v3307_v0 = vsel %vm3229_vm1, %v3305_v27, %v3306_v62  ;;  %v3415_v35 = vsel %vm3229_vm1, %v3306_v62, 0.0 }
 0x342   :  { %v7982_v39 = vadd.f32 %v5873_v13, %v3161_v21  ;;  %v3537_v30 = vadd.f32 %v7877_v46, %v3415_v35  ;;  %v3304_v38 = vsel %vm3229_vm1, %v3302_v50, %v3303_v43  ;;  %v3414_v14 = vsel %vm3229_vm1, %v3303_v43, 0.0  ;;  %3777 = vadd.xlane.f32.xlu0 %v3667_v57  ;;  %v7998_v50 = vld [vmem:[%s8587_s2] ss:$0 sm:$0xff] }
 0x343   :  { %v3059_v61 = vsel %vm2972_vm0, %v3057_v33, %v3058_v48  ;;  %v3535_v59 = vadd.f32 %v7839_v53, %v3414_v14  ;;  %v3536_v41 = vadd.f32 %v7868_v18, %v3307_v0  ;;  %v3534_v49 = vadd.f32 %v7830_v42, %v3304_v38  ;;  %v8768_v53 = vld [vmem:[#allocation68_spill] sm:$0xff]  ;;  %v8771_v38 = vld [vmem:[#allocation69_spill] sm:$0xff] }
 0x344   :  { %v7991_v27 = vadd.f32 %v5875_v24, %v3059_v61  ;;  %v5766_v62 = vpop.f32.mrb[148].mxu1  ;;  %3775 = vadd.xlane.f32.xlu1 %v3666_v52  ;;  %v2398_v13 = vpop.f32.mrb[116].mxu0  ;;  %v3665_v46 = vmul.f32 %v7977_v5, %v7977_v5  ;;  %v8001_v33 = vadd.f32 %v7998_v50, %v3537_v30 }
 0x345   :  { %v5876_v18 = vadd.f32 %v2398_v13, %v8768_v53  ;;  %v2669_v1 = vpop.f32.mrb[149].mxu1  ;;  %v2400_v42 = vpop.f32.mrb[117].mxu0  ;;  %v8005_v57 = vadd.f32 %v7998_v50, %v3536_v41  ;;  %v8008_v24 = vadd.f32 %v7998_v50, %v3535_v59  ;;  %v3311_v43 = vrot.slane %v5766_v62, 1  ;;  %v8772_v53 = vld [vmem:[#allocation70_spill] sm:$0xff] }
 0x346   :  { %8767 = vst [vmem:[#allocation31_spill] sm:$0xff] %v8001_v33  ;;  %v3308_v52 = vrot.slane %v2669_v1, 1  ;;  %3773 = vadd.xlane.f32.xlu0 %v3665_v46  ;;  %v5877_v21 = vadd.f32 %v2400_v42, %v7274_v19  ;;  %v2402_v48 = vpop.f32.mrb[118].mxu0  ;;  %v5767_v0 = vpop.f32.mrb[150].mxu1  ;;  %v3672_v30 = vmul.f32 %v8001_v33, %v8001_v33  ;;  %v8020_v46 = vadd.f32 %v7998_v50, %v3534_v49 }
 0x347   :  { %8769 = vst [vmem:[#allocation32_spill] sm:$0xff] %v8005_v57  ;;  %8770 = vst [vmem:[#allocation33_spill] sm:$0xff] %v8008_v24  ;;  %v3060_v35 = vrot.slane %v5876_v18, 7  ;;  %v5878_v14 = vadd.f32 %v2402_v48, %v8771_v38  ;;  %v3312_v61 = vrot.slane %v5767_v0, 1  ;;  %v2404_v13 = vpop.f32.mrb[119].mxu0  ;;  %v2672_v41 = vpop.f32.mrb[151].mxu1  ;;  %v3671_v59 = vmul.f32 %v8005_v57, %v8005_v57 }
 0x348   :  { %v5879_v62 = vadd.f32 %v2404_v13, %v8772_v53  ;;  %v3309_v1 = vrot.slane %v2672_v41, 1  ;;  %3787 = vadd.xlane.f32.xlu1 %v3672_v30  ;;  %v3670_v19 = vmul.f32 %v8008_v24, %v8008_v24  ;;  %8773 = vst [vmem:[#allocation34_spill] sm:$0xff] %v8020_v46 }
 0x349   :  { %v3162_v18 = vsel %vm2972_vm0, 0.0, %v3060_v35  ;;  %v3061_v42 = vrot.slane %v5878_v14, 7  ;;  %v3313_v48 = vsel %vm3229_vm1, %v3311_v43, %v3312_v61  ;;  %v3417_v0 = vsel %vm3229_vm1, %v3312_v61, 0.0 }
 0x34a   :  { %v3480_v38 = vadd.f32 %v5877_v21, %v3162_v18  ;;  %v3541_v57 = vadd.f32 %v7953_v29, %v3417_v0  ;;  %v3310_v13 = vsel %vm3229_vm1, %v3308_v52, %v3309_v1  ;;  %v3416_v30 = vsel %vm3229_vm1, %v3309_v1, 0.0  ;;  %3785 = vadd.xlane.f32.xlu0 %v3671_v59  ;;  %v8775_v21 = vld [vmem:[#allocation71_spill] sm:$0xff] }
 0x34b   :  { %v3062_v41 = vsel %vm2972_vm0, %v3060_v35, %v3061_v42  ;;  %v3539_v49 = vadd.f32 %v7915_v63, %v3416_v30  ;;  %v3540_v53 = vadd.f32 %v7944_v10, %v3313_v48  ;;  %v3538_v14 = vadd.f32 %v7906_v60, %v3310_v13 }
 0x34c   :  { %v3481_v24 = vadd.f32 %v5879_v62, %v3062_v41  ;;  %v5770_v43 = vpop.f32.mrb[152].mxu1  ;;  %3783 = vadd.xlane.f32.xlu1 %v3670_v19  ;;  %v2408_v61 = vpop.f32.mrb[120].mxu0  ;;  %v3669_v29 = vmul.f32 %v8020_v46, %v8020_v46  ;;  %v8035_v52 = vadd.f32 %v7998_v50, %v3541_v57 }
 0x34d   :  { %v5880_v59 = vadd.f32 %v2408_v61, %v8775_v21  ;;  %v2685_v1 = vpop.f32.mrb[153].mxu1  ;;  %v2410_v35 = vpop.f32.mrb[121].mxu0  ;;  %v8039_v63 = vadd.f32 %v7998_v50, %v3540_v53  ;;  %v8042_v10 = vadd.f32 %v7998_v50, %v3539_v49  ;;  %v3317_v60 = vrot.slane %v5770_v43, 1 }
 0x34e   :  { %8774 = vst [vmem:[#allocation35_spill] sm:$0xff] %v8035_v52  ;;  %v3314_v62 = vrot.slane %v2685_v1, 1  ;;  %3781 = vadd.xlane.f32.xlu0 %v3669_v29  ;;  %v5881_v19 = vadd.f32 %v2410_v35, %v7285_v45  ;;  %v2412_v18 = vpop.f32.mrb[122].mxu0  ;;  %v5771_v42 = vpop.f32.mrb[154].mxu1  ;;  %v3676_v57 = vmul.f32 %v8035_v52, %v8035_v52  ;;  %v8054_v61 = vadd.f32 %v7998_v50, %v3538_v14 }
 0x34f   :  { %8776 = vst [vmem:[#allocation36_spill] sm:$0xff] %v8039_v63  ;;  %8777 = vst [vmem:[#allocation37_spill] sm:$0xff] %v8042_v10  ;;  %v3063_v48 = vrot.slane %v5880_v59, 7  ;;  %v5882_v0 = vadd.f32 %v2412_v18, %v7287_v32  ;;  %v3318_v13 = vrot.slane %v5771_v42, 1  ;;  %v2414_v30 = vpop.f32.mrb[123].mxu0  ;;  %v2688_v41 = vpop.f32.mrb[155].mxu1  ;;  %v3675_v49 = vmul.f32 %v8039_v63, %v8039_v63 }
 0x350   :  { %v5883_v53 = vadd.f32 %v2414_v30, %v7289_v36  ;;  %v3315_v43 = vrot.slane %v2688_v41, 1  ;;  %3795 = vadd.xlane.f32.xlu1 %v3676_v57  ;;  %v3674_v45 = vmul.f32 %v8042_v10, %v8042_v10  ;;  %8778 = vst [vmem:[#allocation38_spill] sm:$0xff] %v8054_v61 }
 0x351   :  { %v3163_v29 = vsel %vm2972_vm0, 0.0, %v3063_v48  ;;  %v3064_v21 = vrot.slane %v5882_v0, 7  ;;  %v3319_v32 = vsel %vm3229_vm1, %v3317_v60, %v3318_v13  ;;  %v3419_v59 = vsel %vm3229_vm1, %v3318_v13, 0.0 }
 0x352   :  { %v3482_v1 = vadd.f32 %v5881_v19, %v3163_v29  ;;  %v3545_v35 = vadd.f32 %v3481_v24, %v3419_v59  ;;  %v3316_v18 = vsel %vm3229_vm1, %v3314_v62, %v3315_v43  ;;  %v3418_v36 = vsel %vm3229_vm1, %v3315_v43, 0.0  ;;  %3793 = vadd.xlane.f32.xlu0 %v3675_v49 }
 0x353   :  { %v3065_v42 = vsel %vm2972_vm0, %v3063_v48, %v3064_v21  ;;  %v3543_v57 = vadd.f32 %v7991_v27, %v3418_v36  ;;  %v3544_v14 = vadd.f32 %v3480_v38, %v3319_v32  ;;  %v3542_v30 = vadd.f32 %v7982_v39, %v3316_v18  ;;  %v8781_v39 = vld [vmem:[#allocation72_spill] sm:$0xff]  ;;  %v8783_v32 = vld [vmem:[#allocation73_spill] sm:$0xff] }
 0x354   :  { %v3483_v41 = vadd.f32 %v5883_v53, %v3065_v42  ;;  %v5774_v0 = vpop.f32.mrb[156].mxu1  ;;  %3791 = vadd.xlane.f32.xlu1 %v3674_v45  ;;  %v2418_v60 = vpop.f32.mrb[124].mxu0  ;;  %v3673_v19 = vmul.f32 %v8054_v61, %v8054_v61  ;;  %v8067_v24 = vadd.f32 %v7998_v50, %v3545_v35 }
 0x355   :  { %v5884_v62 = vadd.f32 %v2418_v60, %v7295_v58  ;;  %v2701_v13 = vpop.f32.mrb[157].mxu1  ;;  %v2420_v49 = vpop.f32.mrb[125].mxu0  ;;  %v8071_v48 = vadd.f32 %v7998_v50, %v3544_v14  ;;  %v3323_v27 = vrot.slane %v5774_v0, 1  ;;  %v8077_v29 = vadd.f32 %v7998_v50, %v3543_v57  ;;  %v8784_v14 = vld [vmem:[#allocation74_spill] sm:$0xff] }
 0x356   :  { %8779 = vst [vmem:[#allocation39_spill] sm:$0xff] %v8067_v24  ;;  %3789 = vadd.xlane.f32.xlu0 %v3673_v19  ;;  %v5885_v38 = vadd.f32 %v2420_v49, %v8781_v39  ;;  %v2422_v53 = vpop.f32.mrb[126].mxu0  ;;  %v5775_v43 = vpop.f32.mrb[158].mxu1  ;;  %v3680_v45 = vmul.f32 %v8067_v24, %v8067_v24  ;;  %v3320_v42 = vrot.slane %v2701_v13, 1  ;;  %v8084_v19 = vadd.f32 %v7998_v50, %v3542_v30 }
 0x357   :  { %8780 = vst [vmem:[#allocation40_spill] sm:$0xff] %v8071_v48  ;;  %8782 = vst [vmem:[#allocation41_spill] sm:$0xff] %v8077_v29  ;;  %v3066_v21 = vrot.slane %v5884_v62, 7  ;;  %v5886_v58 = vadd.f32 %v2422_v53, %v8783_v32  ;;  %v3324_v59 = vrot.slane %v5775_v43, 1  ;;  %v2424_v35 = vpop.f32.mrb[127].mxu0  ;;  %v2704_v18 = vpop.f32.mrb[159].mxu1  ;;  %v3679_v36 = vmul.f32 %v8071_v48, %v8071_v48 }
 0x358   :  { %v5887_v0 = vadd.f32 %v2424_v35, %v8784_v14  ;;  %v3321_v60 = vrot.slane %v2704_v18, 1  ;;  %3803 = vadd.xlane.f32.xlu1 %v3680_v45  ;;  %8785 = vst [vmem:[#allocation42_spill] sm:$0xff] %v8084_v19  ;;  %v3678_v13 = vmul.f32 %v8077_v29, %v8077_v29 }
 0x359   :  { %v3164_v57 = vsel %vm2972_vm0, 0.0, %v3066_v21  ;;  %v3067_v49 = vrot.slane %v5886_v58, 7  ;;  %v3325_v62 = vsel %vm3229_vm1, %v3323_v27, %v3324_v59  ;;  %v3677_v58 = vmul.f32 %v8084_v19, %v8084_v19 }
 0x35a   :  { %v3484_v39 = vadd.f32 %v5885_v38, %v3164_v57  ;;  %v3322_v53 = vsel %vm3229_vm1, %v3320_v42, %v3321_v60  ;;  %v3420_v43 = vsel %vm3229_vm1, %v3321_v60, 0.0  ;;  %3801 = vadd.xlane.f32.xlu0 %v3679_v36  ;;  %v3421_v27 = vsel %vm3229_vm1, %v3324_v59, 0.0 }
 0x35b   :  { %v3068_v32 = vsel %vm2972_vm0, %v3066_v21, %v3067_v49  ;;  %v3546_v45 = vadd.f32 %v3482_v1, %v3322_v53  ;;  %v3547_v35 = vadd.f32 %v3483_v41, %v3420_v43 }
 0x35c   :  { %v3485_v30 = vadd.f32 %v5887_v0, %v3068_v32  ;;  %3799 = vadd.xlane.f32.xlu1 %v3678_v13  ;;  %v3548_v18 = vadd.f32 %v3484_v39, %v3325_v62 }
 0x35d   :  { %v8097_v38 = vadd.f32 %v7998_v50, %v3546_v45  ;;  %v8100_v36 = vadd.f32 %v7998_v50, %v3547_v35 }
 0x35e   :  { %v3549_v42 = vadd.f32 %v3485_v30, %v3421_v27  ;;  %3797 = vadd.xlane.f32.xlu0 %v3677_v58  ;;  %v8107_v21 = vadd.f32 %v7998_v50, %v3548_v18 }
 0x35f   :  { %8786 = vst [vmem:[#allocation43_spill] sm:$0xff] %v8097_v38  ;;  %8787 = vst [vmem:[#allocation44_spill] sm:$0xff] %v8100_v36  ;;  %v3681_v1 = vmul.f32 %v8097_v38, %v8097_v38  ;;  %v3682_v41 = vmul.f32 %v8100_v36, %v8100_v36 }
 0x360   :  { %8788 = vst [vmem:[#allocation45_spill] sm:$0xff] %v8107_v21  ;;  %v8110_v14 = vadd.f32 %v7998_v50, %v3549_v42  ;;  %v3683_v0 = vmul.f32 %v8107_v21, %v8107_v21 }
 0x361   :  { %3807 = vadd.xlane.f32.xlu1 %v3682_v41 }
 0x362   :  { %8789 = vst [vmem:[#allocation46_spill] sm:$0xff] %v8110_v14  ;;  %3805 = vadd.xlane.f32.xlu0 %v3681_v1  ;;  %v3684_v59 = vmul.f32 %v8110_v14, %v8110_v14 }
 0x365   :  { %3811 = vadd.xlane.f32.xlu1 %v3684_v59 }
 0x366   :  { %3809 = vadd.xlane.f32.xlu0 %v3683_v0 }
 0x375   :  { %v3690_v60 = vpop.xlane.xlu1 %3689 }
 0x376   :  { %v3816_v57 = vmul.f32 0.0078125, %v3690_v60 }
 0x377   :  { %v3686_v49 = vpop.xlane.xlu0 %3685 }
 0x378   :  { %v3880_v62 = vadd.f32 1e-06, %v3816_v57  ;;  %v3814_v39 = vmul.f32 0.0078125, %v3686_v49  ;;  %v8119_v57 = vld [vmem:[%s8588_s3] ss:$0 sm:$0xff] }
 0x379   :  { %v3692_v53 = vpop.xlane.xlu1 %3691 }
 0x37a   :  { %6312 = vrsqrt.f32 %v3880_v62  ;;  %v3878_v43 = vadd.f32 1e-06, %v3814_v39  ;;  %v3817_v50 = vmul.f32 0.0078125, %v3692_v53 }
 0x37b   :  { %v3688_v13 = vpop.xlane.xlu0 %3687 }
 0x37c   :  { %6314 = vrsqrt.f32 %v3878_v43  ;;  %v3881_v32 = vadd.f32 1e-06, %v3817_v50  ;;  %v3815_v45 = vmul.f32 0.0078125, %v3688_v13 }
 0x37d   :  { %v3700_v35 = vpop.xlane.xlu1 %3699 }
 0x37e   :  { %6316 = vrsqrt.f32 %v3881_v32  ;;  %v3879_v30 = vadd.f32 1e-06, %v3815_v45  ;;  %v3821_v58 = vmul.f32 0.0078125, %v3700_v35 }
 0x37f   :  { %v3698_v18 = vpop.xlane.xlu0 %3697 }
 0x380   :  { %6318 = vrsqrt.f32 %v3879_v30  ;;  %v3885_v27 = vadd.f32 1e-06, %v3821_v58  ;;  %v3820_v42 = vmul.f32 0.0078125, %v3698_v18 }
 0x381   :  { %v3696_v1 = vpop.xlane.xlu1 %3695 }
 0x382   :  { %6320 = vrsqrt.f32 %v3885_v27  ;;  %v3884_v41 = vadd.f32 1e-06, %v3820_v42  ;;  %v3819_v59 = vmul.f32 0.0078125, %v3696_v1 }
 0x383   :  { %v3694_v0 = vpop.xlane.xlu0 %3693 }
 0x384   :  { %v6313_v60 = vpop.eup %6312  ;;  %6322 = vrsqrt.f32 %v3884_v41  ;;  %v3883_v49 = vadd.f32 1e-06, %v3819_v59  ;;  %v3818_v62 = vmul.f32 0.0078125, %v3694_v0 }
 0x385   :  { %v4008_v39 = vmul.f32 %v6313_v60, %v7539_v26  ;;  %v3708_v53 = vpop.xlane.xlu1 %3707 }
 0x386   :  { %v6315_v43 = vpop.eup %6314  ;;  %6324 = vrsqrt.f32 %v3883_v49  ;;  %v3882_v50 = vadd.f32 1e-06, %v3818_v62  ;;  %v3825_v13 = vmul.f32 0.0078125, %v3708_v53  ;;  %v8790_v49 = vld [vmem:[#allocation11_spill] sm:$0xff] }
 0x387   :  { %v8123_v32 = vmul.f32 %v8119_v57, %v4008_v39  ;;  %v4006_v45 = vmul.f32 %v6315_v43, %v7550_v2  ;;  %v3706_v35 = vpop.xlane.xlu0 %3705 }
 0x388   :  { %v6317_v30 = vpop.eup %6316  ;;  %6326 = vrsqrt.f32 %v3882_v50  ;;  %v3889_v58 = vadd.f32 1e-06, %v3825_v13  ;;  %v3824_v18 = vmul.f32 0.0078125, %v3706_v35 }
 0x389   :  { %v5035_v27 = vmul.f32 -1.442695, %v8123_v32  ;;  %v8128_v42 = vmul.f32 %v8119_v57, %v4006_v45  ;;  %v4009_v26 = vmul.f32 %v6317_v30, %v7543_v15  ;;  %v3704_v1 = vpop.xlane.xlu1 %3703 }
 0x38a   :  { %v6319_v41 = vpop.eup %6318  ;;  %6328 = vrsqrt.f32 %v3889_v58  ;;  %v3888_v59 = vadd.f32 1e-06, %v3824_v18  ;;  %v3823_v0 = vmul.f32 0.0078125, %v3704_v1  ;;  %v8791_v1 = vld [vmem:[#allocation12_spill] sm:$0xff] }
 0x38b   :  { %6330 = vpow2.f32 %v5035_v27  ;;  %v5033_v2 = vmul.f32 -1.442695, %v8128_v42  ;;  %v8133_v60 = vmul.f32 %v8119_v57, %v4009_v26  ;;  %v4007_v62 = vmul.f32 %v6319_v41, %v8790_v49  ;;  %v3702_v39 = vpop.xlane.xlu0 %3701 }
 0x38c   :  { %v6321_v53 = vpop.eup %6320  ;;  %6332 = vrsqrt.f32 %v3888_v59  ;;  %v3887_v43 = vadd.f32 1e-06, %v3823_v0  ;;  %v3822_v50 = vmul.f32 0.0078125, %v3702_v39 }
 0x38d   :  { %6334 = vpow2.f32 %v5033_v2  ;;  %v5036_v15 = vmul.f32 -1.442695, %v8133_v60  ;;  %v8138_v13 = vmul.f32 %v8119_v57, %v4007_v62  ;;  %v4013_v45 = vmul.f32 %v6321_v53, %v7578_v3  ;;  %v3716_v35 = vpop.xlane.xlu1 %3715 }
 0x38e   :  { %v6323_v30 = vpop.eup %6322  ;;  %6336 = vrsqrt.f32 %v3887_v43  ;;  %v3886_v58 = vadd.f32 1e-06, %v3822_v50  ;;  %v3829_v18 = vmul.f32 0.0078125, %v3716_v35 }
 0x38f   :  { %6338 = vpow2.f32 %v5036_v15  ;;  %v5034_v27 = vmul.f32 -1.442695, %v8138_v13  ;;  %v8143_v26 = vmul.f32 %v8119_v57, %v4013_v45  ;;  %v4012_v41 = vmul.f32 %v6323_v30, %v8791_v1  ;;  %v3714_v59 = vpop.xlane.xlu0 %3713  ;;  %v8792_v30 = vld [vmem:[#allocation13_spill] sm:$0xff] }
 0x390   :  { %v6325_v0 = vpop.eup %6324  ;;  %6340 = vrsqrt.f32 %v3886_v58  ;;  %v3893_v2 = vadd.f32 1e-06, %v3829_v18  ;;  %v3828_v49 = vmul.f32 0.0078125, %v3714_v59 }
 0x391   :  { %6342 = vpow2.f32 %v5034_v27  ;;  %v5040_v3 = vmul.f32 -1.442695, %v8143_v26  ;;  %v8148_v62 = vmul.f32 %v8119_v57, %v4012_v41  ;;  %v4011_v39 = vmul.f32 %v6325_v0, %v7585_v56  ;;  %v3712_v53 = vpop.xlane.xlu1 %3711 }
 0x392   :  { %v6327_v43 = vpop.eup %6326  ;;  %6344 = vrsqrt.f32 %v3893_v2  ;;  %v3892_v50 = vadd.f32 1e-06, %v3828_v49  ;;  %v3827_v15 = vmul.f32 0.0078125, %v3712_v53 }
 0x393   :  { %6346 = vpow2.f32 %v5040_v3  ;;  %v5039_v45 = vmul.f32 -1.442695, %v8148_v62  ;;  %v8153_v35 = vmul.f32 %v8119_v57, %v4011_v39  ;;  %v4010_v58 = vmul.f32 %v6327_v43, %v8792_v30  ;;  %v3710_v18 = vpop.xlane.xlu0 %3709 }
 0x394   :  { %v6329_v27 = vpop.eup %6328  ;;  %6348 = vrsqrt.f32 %v3892_v50  ;;  %v3891_v1 = vadd.f32 1e-06, %v3827_v15  ;;  %v8793_v50 = vld [vmem:[#allocation14_spill] sm:$0xff]  ;;  %v3826_v29 = vmul.f32 0.0078125, %v3710_v18 }
 0x395   :  { %v6331_v41 = vpop.eup %6330  ;;  %6350 = vpow2.f32 %v5039_v45  ;;  %v5038_v56 = vmul.f32 -1.442695, %v8153_v35  ;;  %v8158_v59 = vmul.f32 %v8119_v57, %v4010_v58  ;;  %v4017_v0 = vmul.f32 %v6329_v27, %v7616_v11  ;;  %v8161_v2 = vpop.xlane.xlu1 %3723 }
 0x396   :  { %v6333_v49 = vpop.eup %6332  ;;  %v4334_v3 = vadd.f32 1.0, %v6331_v41  ;;  %6352 = vrsqrt.f32 %v3891_v1  ;;  %v3833_v18 = vmul.f32 0.0078125, %v8161_v2 }
 0x397   :  { %v6335_v39 = vpop.eup %6334  ;;  %6354 = vpow2.f32 %v5038_v56  ;;  %v5037_v53 = vmul.f32 -1.442695, %v8158_v59  ;;  %v8165_v43 = vmul.f32 %v8119_v57, %v4017_v0  ;;  %v4016_v15 = vmul.f32 %v6333_v49, %v8793_v50  ;;  %v3722_v45 = vpop.xlane.xlu0 %3721 }
 0x398   :  { %v6337_v30 = vpop.eup %6336  ;;  %6356 = vrcp.f32 %v4334_v3  ;;  %v4332_v58 = vadd.f32 1.0, %v6335_v39  ;;  %v3897_v52 = vadd.f32 1e-06, %v3833_v18 }
 0x399   :  { %v6339_v14 = vpop.eup %6338  ;;  %6358 = vpow2.f32 %v5037_v53  ;;  %v5044_v11 = vmul.f32 -1.442695, %v8165_v43  ;;  %v8170_v27 = vmul.f32 %v8119_v57, %v4016_v15  ;;  %v4015_v1 = vmul.f32 %v6337_v30, %v7623_v54  ;;  %v3720_v41 = vpop.xlane.xlu1 %3719 }
 0x39a   :  { %v6341_v56 = vpop.eup %6340  ;;  %6360 = vrcp.f32 %v4332_v58  ;;  %v4335_v0 = vadd.f32 1.0, %v6339_v14  ;;  %v3831_v10 = vmul.f32 0.0078125, %v3720_v41 }
 0x39b   :  { %v6343_v21 = vpop.eup %6342  ;;  %6362 = vpow2.f32 %v5044_v11  ;;  %v5043_v49 = vmul.f32 -1.442695, %v8170_v27  ;;  %v8175_v3 = vmul.f32 %v8119_v57, %v4015_v1  ;;  %v4014_v39 = vmul.f32 %v6341_v56, %v7635_v28  ;;  %v3718_v53 = vpop.xlane.xlu0 %3717  ;;  %v8794_v56 = vld [vmem:[#allocation15_spill] sm:$0xff] }
 0x39c   :  { %v6345_v50 = vpop.eup %6344  ;;  %6364 = vrcp.f32 %v4335_v0  ;;  %v4333_v15 = vadd.f32 1.0, %v6343_v21  ;;  %v3830_v46 = vmul.f32 0.0078125, %v3718_v53 }
 0x39d   :  { %v6347_v36 = vpop.eup %6346  ;;  %6366 = vpow2.f32 %v5043_v49  ;;  %v5042_v54 = vmul.f32 -1.442695, %v8175_v3  ;;  %v8180_v30 = vmul.f32 %v8119_v57, %v4014_v39  ;;  %v4021_v14 = vmul.f32 %v6345_v50, %v7654_v12  ;;  %v8183_v58 = vpop.xlane.xlu1 %3731 }
 0x39e   :  { %v6349_v11 = vpop.eup %6348  ;;  %6368 = vrcp.f32 %v4333_v15  ;;  %v4339_v1 = vadd.f32 1.0, %v6347_v36 }
 0x39f   :  { %v6351_v38 = vpop.eup %6350  ;;  %6370 = vpow2.f32 %v5042_v54  ;;  %v5041_v28 = vmul.f32 -1.442695, %v8180_v30  ;;  %v8187_v21 = vmul.f32 %v8119_v57, %v4021_v14  ;;  %v4020_v0 = vmul.f32 %v6349_v11, %v8794_v56  ;;  %v3730_v49 = vpop.xlane.xlu0 %3729 }
 0x3a0   :  { %v6353_v19 = vpop.eup %6352  ;;  %6372 = vrcp.f32 %v4339_v1  ;;  %v4338_v39 = vadd.f32 1.0, %v6351_v38 }
 0x3a1   :  { %v6355_v12 = vpop.eup %6354  ;;  %6374 = vpow2.f32 %v5041_v28  ;;  %v5048_v50 = vmul.f32 -1.442695, %v8187_v21  ;;  %v8192_v36 = vmul.f32 %v8119_v57, %v4020_v0  ;;  %v4019_v15 = vmul.f32 %v6353_v19, %v7661_v51  ;;  %v3728_v54 = vpop.xlane.xlu1 %3727 }
 0x3a2   :  { %v6357_v48 = vpop.eup %6356  ;;  %6376 = vrcp.f32 %v4338_v39  ;;  %v4337_v14 = vadd.f32 1.0, %v6355_v12  ;;  %v3832_v0 = vmul.f32 0.0078125, %v3722_v45  ;;  %v3890_v19 = vadd.f32 1e-06, %v3826_v29 }
 0x3a3   :  { %v6359_v24 = vpop.eup %6358  ;;  %6378 = vpow2.f32 %v5048_v50  ;;  %v5047_v11 = vmul.f32 -1.442695, %v8192_v36  ;;  %v8197_v38 = vmul.f32 %v8119_v57, %v4019_v15  ;;  %v3726_v1 = vpop.xlane.xlu0 %3725  ;;  %v4526_v15 = vmul.f32 %v6357_v48, %v8123_v32 }
 0x3a4   :  { %v6361_v28 = vpop.eup %6360  ;;  %6380 = vrcp.f32 %v4337_v14  ;;  %v4336_v56 = vadd.f32 1.0, %v6359_v24  ;;  %v3895_v32 = vadd.f32 1e-06, %v3831_v10  ;;  %v3835_v10 = vmul.f32 0.0078125, %v3728_v54 }
 0x3a5   :  { %v6363_v61 = vpop.eup %6362  ;;  %6382 = vpow2.f32 %v5047_v11  ;;  %v5046_v51 = vmul.f32 -1.442695, %v8197_v38  ;;  %v3740_v39 = vpop.xlane.xlu1 %3739  ;;  %v3896_v11 = vadd.f32 1e-06, %v3832_v0  ;;  %v4524_v29 = vmul.f32 %v6361_v28, %v8128_v42 }
 0x3a6   :  { %v6365_v12 = vpop.eup %6364  ;;  %6384 = vrcp.f32 %v4336_v56  ;;  %v4343_v50 = vadd.f32 1.0, %v6363_v61  ;;  %v3836_v28 = vmul.f32 0.0078125, %v3730_v49  ;;  %v3899_v54 = vadd.f32 1e-06, %v3835_v10 }
 0x3a7   :  { %v6367_v63 = vpop.eup %6366  ;;  %v4527_v2 = vmul.f32 %v6365_v12, %v8133_v60  ;;  %6386 = vpow2.f32 %v5046_v51  ;;  %v3738_v14 = vpop.xlane.xlu0 %3737 }
 0x3a8   :  { %v6369_v24 = vpop.eup %6368  ;;  %6388 = vrcp.f32 %v4343_v50  ;;  %v4342_v45 = vadd.f32 1.0, %v6367_v63  ;;  %v3837_v63 = vmul.f32 0.0078125, %v8183_v58 }
 0x3a9   :  { %v6371_v33 = vpop.eup %6370  ;;  %v5233_v5 = vpack.c.bf16 %v4527_v2, %v4526_v15  ;;  %v4525_v61 = vmul.f32 %v6369_v24, %v8138_v13  ;;  %6390 = vrsqrt.f32 %v3890_v19  ;;  %v3736_v53 = vpop.xlane.xlu1 %3735  ;;  %v3900_v24 = vadd.f32 1e-06, %v3836_v28 }
 0x3aa   :  { %v6373_v41 = vpop.eup %6372  ;;  %6392 = vrcp.f32 %v4342_v45  ;;  %v4341_v48 = vadd.f32 1.0, %v6371_v33  ;;  %v3894_v33 = vadd.f32 1e-06, %v3830_v46  ;;  %v3901_v15 = vadd.f32 1e-06, %v3837_v63  ;;  %v8795_v63 = vld [vmem:[#allocation16_spill] sm:$0xff] }
 0x3ab   :  { %v6375_v60 = vpop.eup %6374  ;;  %5385 = vst [vmem:[#allocation7 + $0x8] sm:$0xff] %v5233_v5   ;;  %v5228_v18 = vpack.c.bf16 %v4525_v61, %v4524_v29  ;;  %v4531_v56 = vmul.f32 %v6373_v41, %v8143_v26  ;;  %6394 = vrsqrt.f32 %v3897_v52  ;;  %v3734_v19 = vpop.xlane.xlu0 %3733  ;;  %v3834_v26 = vmul.f32 0.0078125, %v3726_v1 }
 0x3ac   :  { %v6377_v0 = vpop.eup %6376  ;;  %6396 = vrcp.f32 %v4341_v48  ;;  %v4340_v42 = vadd.f32 1.0, %v6375_v60  ;;  %v3841_v45 = vmul.f32 0.0078125, %v3740_v39 }
 0x3ad   :  { %v6379_v51 = vpop.eup %6378  ;;  %5229 = vst [vmem:[#allocation7] sm:$0xff] %v5228_v18   ;;  %v4530_v13 = vmul.f32 %v6377_v0, %v8148_v62  ;;  %6398 = vrsqrt.f32 %v3896_v11  ;;  %v3840_v11 = vmul.f32 0.0078125, %v3738_v14  ;;  %v3748_v29 = vpop.xlane.xlu1 %3747  ;;  %v3898_v41 = vadd.f32 1e-06, %v3834_v26 }
 0x3ae   :  { %v6381_v5 = vpop.eup %6380  ;;  %6400 = vrcp.f32 %v4340_v42  ;;  %v4347_v12 = vadd.f32 1.0, %v6379_v51  ;;  %v3838_v18 = vmul.f32 0.0078125, %v3734_v19  ;;  %v3905_v0 = vadd.f32 1e-06, %v3841_v45 }
 0x3af   :  { %v6383_v52 = vpop.eup %6382  ;;  %v5243_v50 = vpack.c.bf16 %v4531_v56, %v4530_v13  ;;  %v4529_v58 = vmul.f32 %v6381_v5, %v8153_v35  ;;  %6402 = vrsqrt.f32 %v3895_v32  ;;  %v3839_v35 = vmul.f32 0.0078125, %v3736_v53  ;;  %v3746_v39 = vpop.xlane.xlu0 %3745 }
 0x3b0   :  { %v6385_v2 = vpop.eup %6384  ;;  %6404 = vrcp.f32 %v4347_v12  ;;  %v4346_v49 = vadd.f32 1.0, %v6383_v52  ;;  %v3904_v28 = vadd.f32 1e-06, %v3840_v11  ;;  %v3845_v51 = vmul.f32 0.0078125, %v3748_v29 }
 0x3b1   :  { %v6387_v62 = vpop.eup %6386  ;;  %5387 = vst [vmem:[#allocation7 + $0x18] sm:$0xff] %v5243_v50   ;;  %v4528_v46 = vmul.f32 %v6385_v2, %v8158_v59  ;;  %6406 = vrsqrt.f32 %v3894_v33  ;;  %v3903_v33 = vadd.f32 1e-06, %v3839_v35  ;;  %v3902_v12 = vadd.f32 1e-06, %v3838_v18  ;;  %v3744_v26 = vpop.xlane.xlu1 %3743 }
 0x3b2   :  { %v6389_v1 = vpop.eup %6388  ;;  %6408 = vrcp.f32 %v4346_v49  ;;  %v4345_v61 = vadd.f32 1.0, %v6387_v62  ;;  %v3909_v49 = vadd.f32 1e-06, %v3845_v51 }
 0x3b3   :  { %v6391_v48 = vpop.eup %6390  ;;  %v5238_v32 = vpack.c.bf16 %v4529_v58, %v4528_v46  ;;  %v4535_v60 = vmul.f32 %v6389_v1, %v8165_v43  ;;  %6410 = vrsqrt.f32 %v3901_v15  ;;  %v8796_v58 = vld [vmem:[#allocation17_spill] sm:$0xff] }
 0x3b4   :  { %v6393_v56 = vpop.eup %6392  ;;  %6412 = vrcp.f32 %v4345_v61  ;;  %v4018_v59 = vmul.f32 %v6391_v48, %v8795_v63  ;;  %v3843_v61 = vmul.f32 0.0078125, %v3744_v26 }
 0x3b5   :  { %v6395_v42 = vpop.eup %6394  ;;  %5386 = vst [vmem:[#allocation7 + $0x10] sm:$0xff] %v5238_v32   ;;  %v4534_v14 = vmul.f32 %v6393_v56, %v8170_v27  ;;  %6414 = vrsqrt.f32 %v3900_v24  ;;  %v3844_v24 = vmul.f32 0.0078125, %v3746_v39  ;;  %v8236_v39 = vpop.xlane.xlu1 %3755 }
 0x3b6   :  { %v6397_v53 = vpop.eup %6396  ;;  %v8214_v13 = vmul.f32 %v8119_v57, %v4018_v59  ;;  %v4025_v43 = vmul.f32 %v6395_v42, %v7692_v17  ;;  %6416 = vrsqrt.f32 %v3899_v54  ;;  %v3907_v42 = vadd.f32 1e-06, %v3843_v61 }
 0x3b7   :  { %v6399_v10 = vpop.eup %6398  ;;  %v5253_v19 = vpack.c.bf16 %v4535_v60, %v4534_v14  ;;  %v4533_v5 = vmul.f32 %v6397_v53, %v8175_v3  ;;  %6418 = vrsqrt.f32 %v3898_v41  ;;  %v3742_v3 = vpop.xlane.xlu0 %3741  ;;  %v8797_v53 = vld [vmem:[#allocation18_spill] sm:$0xff] }
 0x3b8   :  { %v6401_v52 = vpop.eup %6400  ;;  %v5045_v27 = vmul.f32 -1.442695, %v8214_v13  ;;  %v8220_v50 = vmul.f32 %v8119_v57, %v4025_v43  ;;  %v4024_v15 = vmul.f32 %v6399_v10, %v8796_v58  ;;  %6420 = vrsqrt.f32 %v3905_v0 }
 0x3b9   :  { %v6403_v2 = vpop.eup %6402  ;;  %5389 = vst [vmem:[#allocation7 + $0x28] sm:$0xff] %v5253_v19   ;;  %v4532_v17 = vmul.f32 %v6401_v52, %v8180_v30  ;;  %6422 = vrsqrt.f32 %v3904_v28  ;;  %v3842_v18 = vmul.f32 0.0078125, %v3742_v3 }
 0x3ba   :  { %v6405_v45 = vpop.eup %6404  ;;  %6424 = vpow2.f32 %v5045_v27  ;;  %v5052_v62 = vmul.f32 -1.442695, %v8220_v50  ;;  %v8226_v46 = vmul.f32 %v8119_v57, %v4024_v15  ;;  %v4023_v54 = vmul.f32 %v6403_v2, %v7699_v34  ;;  %v8262_v15 = vpop.xlane.xlu1 %3751 }
 0x3bb   :  { %v6407_v11 = vpop.eup %6406  ;;  %v5248_v29 = vpack.c.bf16 %v4533_v5, %v4532_v17  ;;  %v4539_v1 = vmul.f32 %v6405_v45, %v8187_v21  ;;  %6426 = vrsqrt.f32 %v3903_v33  ;;  %v3908_v34 = vadd.f32 1e-06, %v3844_v24 }
 0x3bc   :  { %v6409_v30 = vpop.eup %6408  ;;  %6428 = vpow2.f32 %v5052_v62  ;;  %v5051_v41 = vmul.f32 -1.442695, %v8226_v46  ;;  %v8232_v35 = vmul.f32 %v8119_v57, %v4023_v54  ;;  %v4022_v48 = vmul.f32 %v6407_v11, %v7711_v4 }
 0x3bd   :  { %v6411_v32 = vpop.eup %6410  ;;  %5388 = vst [vmem:[#allocation7 + $0x20] sm:$0xff] %v5248_v29   ;;  %v4538_v60 = vmul.f32 %v6409_v30, %v8192_v36  ;;  %6430 = vrsqrt.f32 %v3902_v12  ;;  %v8245_v36 = vpop.xlane.xlu0 %3753 }
 0x3be   :  { %v8238_v21 = vpop.eup %6412  ;;  %6432 = vpow2.f32 %v5051_v41  ;;  %v5050_v56 = vmul.f32 -1.442695, %v8232_v35  ;;  %v8242_v63 = vmul.f32 %v8119_v57, %v4022_v48  ;;  %v4029_v59 = vmul.f32 %v6411_v32, %v7730_v8 }
 0x3bf   :  { %v6415_v4 = vpop.eup %6414  ;;  %v5263_v0 = vpack.c.bf16 %v4539_v1, %v4538_v60  ;;  %6434 = vrsqrt.f32 %v3909_v49  ;;  %v3906_v8 = vadd.f32 1e-06, %v3842_v18  ;;  %v8798_v49 = vld [vmem:[#allocation19_spill] sm:$0xff]  ;;  %v8799_v60 = vld [vmem:[#allocation20_spill] sm:$0xff] }
 0x3c0   :  { %v6417_v14 = vpop.eup %6416  ;;  %6436 = vpow2.f32 %v5050_v56  ;;  %v5049_v28 = vmul.f32 -1.442695, %v8242_v63  ;;  %v8249_v51 = vmul.f32 %v8119_v57, %v4029_v59  ;;  %v4028_v43 = vmul.f32 %v6415_v4, %v8797_v53  ;;  %v8285_v59 = vpop.xlane.xlu1 %3763 }
 0x3c1   :  { %v6419_v33 = vpop.eup %6418  ;;  %5391 = vst [vmem:[#allocation7 + $0x38] sm:$0xff] %v5263_v0   ;;  %v4027_v10 = vmul.f32 %v6417_v14, %v7737_v31  ;;  %6438 = vrsqrt.f32 %v3908_v34 }
 0x3c2   :  { %v6421_v19 = vpop.eup %6420  ;;  %6440 = vpow2.f32 %v5049_v28  ;;  %v5056_v5 = vmul.f32 -1.442695, %v8249_v51  ;;  %v8255_v12 = vmul.f32 %v8119_v57, %v4028_v43  ;;  %v4026_v26 = vmul.f32 %v6419_v33, %v7749_v7 }
 0x3c3   :  { %v6423_v52 = vpop.eup %6422  ;;  %v8259_v27 = vmul.f32 %v8119_v57, %v4027_v10  ;;  %v4033_v58 = vmul.f32 %v6421_v19, %v7768_v44  ;;  %6442 = vrsqrt.f32 %v3907_v42  ;;  %v8273_v44 = vpop.xlane.xlu0 %3749 }
 0x3c4   :  { %v6425_v31 = vpop.eup %6424  ;;  %6444 = vpow2.f32 %v5056_v5  ;;  %v5055_v2 = vmul.f32 -1.442695, %v8255_v12  ;;  %v8266_v17 = vmul.f32 %v8119_v57, %v4026_v26  ;;  %v4032_v24 = vmul.f32 %v6423_v52, %v8798_v49 }
 0x3c5   :  { %v6427_v3 = vpop.eup %6426  ;;  %v4344_v7 = vadd.f32 1.0, %v6425_v31  ;;  %v5054_v45 = vmul.f32 -1.442695, %v8259_v27  ;;  %v8271_v62 = vmul.f32 %v8119_v57, %v4033_v58  ;;  %6446 = vrsqrt.f32 %v3906_v8  ;;  %v8800_v8 = vld [vmem:[#allocation21_spill] sm:$0xff] }
 0x3c6   :  { %v6429_v54 = vpop.eup %6428  ;;  %6448 = vpow2.f32 %v5055_v2  ;;  %v5053_v11 = vmul.f32 -1.442695, %v8266_v17  ;;  %v8277_v29 = vmul.f32 %v8119_v57, %v4032_v24  ;;  %v4031_v1 = vmul.f32 %v6427_v3, %v7775_v40  ;;  %v8306_v3 = vpop.xlane.xlu1 %3759 }
 0x3c7   :  { %v6431_v61 = vpop.eup %6430  ;;  %6450 = vrcp.f32 %v4344_v7  ;;  %v4351_v30 = vadd.f32 1.0, %v6429_v54  ;;  %v5060_v48 = vmul.f32 -1.442695, %v8271_v62  ;;  %v8292_v53 = vpop.xlane.xlu0 %3761  ;;  %v4537_v49 = vmul.f32 %v8238_v21, %v8197_v38 }
 0x3c8   :  { %v6433_v41 = vpop.eup %6432  ;;  %6452 = vpow2.f32 %v5054_v45  ;;  %v8282_v32 = vmul.f32 %v8119_v57, %v4031_v1  ;;  %v4030_v34 = vmul.f32 %v6431_v61, %v8799_v60  ;;  %v5059_v40 = vmul.f32 -1.442695, %v8277_v29 }
 0x3c9   :  { %v6435_v18 = vpop.eup %6434  ;;  %6454 = vrcp.f32 %v4351_v30  ;;  %v4350_v56 = vadd.f32 1.0, %v6433_v41 }
 0x3ca   :  { %v6437_v4 = vpop.eup %6436  ;;  %6456 = vpow2.f32 %v5053_v11  ;;  %v8289_v0 = vmul.f32 %v8119_v57, %v4030_v34  ;;  %v4037_v42 = vmul.f32 %v6435_v18, %v7806_v23  ;;  %v5058_v33 = vmul.f32 -1.442695, %v8282_v32  ;;  %v8801_v11 = vld [vmem:[#allocation22_spill] sm:$0xff] }
 0x3cb   :  { %v6439_v14 = vpop.eup %6438  ;;  %6458 = vrcp.f32 %v4350_v56  ;;  %v4349_v28 = vadd.f32 1.0, %v6437_v4  ;;  %v8313_v30 = vpop.xlane.xlu0 %3757  ;;  %v3849_v18 = vmul.f32 0.0078125, %v8236_v39  ;;  %v3848_v39 = vmul.f32 0.0078125, %v8245_v36 }
 0x3cc   :  { %v6441_v43 = vpop.eup %6440  ;;  %6460 = vpow2.f32 %v5060_v48  ;;  %v8296_v10 = vmul.f32 %v8119_v57, %v4037_v42  ;;  %v4036_v19 = vmul.f32 %v6439_v14, %v8800_v8  ;;  %v5057_v23 = vmul.f32 -1.442695, %v8289_v0 }
 0x3cd   :  { %v6443_v5 = vpop.eup %6442  ;;  %6462 = vrcp.f32 %v4349_v28  ;;  %v4348_v26 = vadd.f32 1.0, %v6441_v43  ;;  %v8323_v28 = vpop.xlane.xlu1 %3771  ;;  %v3912_v36 = vadd.f32 1e-06, %v3848_v39 }
 0x3ce   :  { %v6445_v52 = vpop.eup %6444  ;;  %6464 = vpow2.f32 %v5059_v40  ;;  %v8301_v58 = vmul.f32 %v8119_v57, %v4036_v19  ;;  %v4035_v31 = vmul.f32 %v6443_v5, %v7813_v20  ;;  %v5064_v45 = vmul.f32 -1.442695, %v8296_v10 }
 0x3cf   :  { %v6447_v2 = vpop.eup %6446  ;;  %6466 = vrcp.f32 %v4348_v26  ;;  %v4355_v24 = vadd.f32 1.0, %v6445_v52  ;;  %v3847_v5 = vmul.f32 0.0078125, %v8262_v15  ;;  %v3770_v26 = vpop.xlane.xlu0 %3769 }
 0x3d0   :  { %v6449_v7 = vpop.eup %6448  ;;  %6468 = vpow2.f32 %v5058_v33  ;;  %v8310_v54 = vmul.f32 %v8119_v57, %v4035_v31  ;;  %v4034_v1 = vmul.f32 %v6447_v2, %v8801_v11  ;;  %v5063_v21 = vmul.f32 -1.442695, %v8301_v58 }
 0x3d1   :  { %v6451_v61 = vpop.eup %6450  ;;  %6470 = vrcp.f32 %v4355_v24  ;;  %v4354_v20 = vadd.f32 1.0, %v6449_v7  ;;  %v3913_v2 = vadd.f32 1e-06, %v3849_v18 }
 0x3d2   :  { %v6453_v41 = vpop.eup %6452  ;;  %v4536_v38 = vmul.f32 %v6451_v61, %v8214_v13  ;;  %6472 = vpow2.f32 %v5057_v23  ;;  %v8318_v48 = vmul.f32 %v8119_v57, %v4034_v1  ;;  %v5062_v42 = vmul.f32 -1.442695, %v8310_v54  ;;  %v3768_v61 = vpop.xlane.xlu1 %3767 }
 0x3d3   :  { %v6455_v60 = vpop.eup %6454  ;;  %6474 = vrcp.f32 %v4354_v20  ;;  %v4353_v34 = vadd.f32 1.0, %v6453_v41  ;;  %v3911_v1 = vadd.f32 1e-06, %v3847_v5 }
 0x3d4   :  { %v6457_v56 = vpop.eup %6456  ;;  %v5258_v4 = vpack.c.bf16 %v4537_v49, %v4536_v38  ;;  %v4543_v40 = vmul.f32 %v6455_v60, %v8220_v50  ;;  %6476 = vpow2.f32 %v5064_v45  ;;  %v5061_v8 = vmul.f32 -1.442695, %v8318_v48 }
 0x3d5   :  { %v6459_v14 = vpop.eup %6458  ;;  %6478 = vrcp.f32 %v4353_v34  ;;  %v4352_v13 = vadd.f32 1.0, %v6457_v56  ;;  %v3846_v45 = vmul.f32 0.0078125, %v8273_v44  ;;  %v3853_v38 = vmul.f32 0.0078125, %v8285_v59  ;;  %v3766_v34 = vpop.xlane.xlu0 %3765 }
 0x3d6   :  { %v6461_v43 = vpop.eup %6460  ;;  %5390 = vst [vmem:[#allocation7 + $0x30] sm:$0xff] %v5258_v4   ;;  %v4542_v33 = vmul.f32 %v6459_v14, %v8226_v46  ;;  %6480 = vpow2.f32 %v5063_v21  ;;  %v3851_v4 = vmul.f32 0.0078125, %v8306_v3 }
 0x3d7   :  { %v6463_v19 = vpop.eup %6462  ;;  %6482 = vrcp.f32 %v4352_v13  ;;  %v4359_v50 = vadd.f32 1.0, %v6461_v43  ;;  %v3910_v56 = vadd.f32 1e-06, %v3846_v45  ;;  %v3917_v13 = vadd.f32 1e-06, %v3853_v38 }
 0x3d8   :  { %v6465_v52 = vpop.eup %6464  ;;  %v5273_v23 = vpack.c.bf16 %v4543_v40, %v4542_v33  ;;  %v4541_v31 = vmul.f32 %v6463_v19, %v8232_v35  ;;  %6484 = vpow2.f32 %v5062_v42  ;;  %v3915_v19 = vadd.f32 1e-06, %v3851_v4 }
 0x3d9   :  { %v6467_v49 = vpop.eup %6466  ;;  %6486 = vrcp.f32 %v4359_v50  ;;  %v4358_v46 = vadd.f32 1.0, %v6465_v52  ;;  %v3857_v50 = vmul.f32 0.0078125, %v8323_v28  ;;  %v3856_v52 = vmul.f32 0.0078125, %v3770_v26 }
 0x3da   :  { %v6469_v24 = vpop.eup %6468  ;;  %5393 = vst [vmem:[#allocation7 + $0x48] sm:$0xff] %v5273_v23   ;;  %v4540_v7 = vmul.f32 %v6467_v49, %v8242_v63  ;;  %6488 = vpow2.f32 %v5061_v8  ;;  %v3852_v63 = vmul.f32 0.0078125, %v8292_v53  ;;  %v3850_v8 = vmul.f32 0.0078125, %v8313_v30 }
 0x3db   :  { %v6471_v11 = vpop.eup %6470  ;;  %6490 = vrcp.f32 %v4358_v46  ;;  %v4357_v15 = vadd.f32 1.0, %v6469_v24  ;;  %v3855_v23 = vmul.f32 0.0078125, %v3768_v61  ;;  %v3854_v30 = vmul.f32 0.0078125, %v3766_v34 }
 0x3dc   :  { %v6473_v20 = vpop.eup %6472  ;;  %v5268_v35 = vpack.c.bf16 %v4541_v31, %v4540_v7  ;;  %v4547_v41 = vmul.f32 %v6471_v11, %v8249_v51  ;;  %6492 = vrsqrt.f32 %v3913_v2  ;;  %v3916_v33 = vadd.f32 1e-06, %v3852_v63  ;;  %v3778_v31 = vpop.xlane.xlu0 %3777 }
 0x3dd   :  { %v6475_v21 = vpop.eup %6474  ;;  %6494 = vrcp.f32 %v4357_v15  ;;  %v4356_v60 = vadd.f32 1.0, %v6473_v20  ;;  %v3921_v45 = vadd.f32 1e-06, %v3857_v50  ;;  %v3919_v61 = vadd.f32 1e-06, %v3855_v23 }
 0x3de   :  { %v6477_v18 = vpop.eup %6476  ;;  %5392 = vst [vmem:[#allocation7 + $0x40] sm:$0xff] %v5268_v35   ;;  %v4546_v44 = vmul.f32 %v6475_v21, %v8255_v12  ;;  %6496 = vrsqrt.f32 %v3912_v36  ;;  %v3780_v12 = vpop.xlane.xlu1 %3779  ;;  %v3918_v38 = vadd.f32 1e-06, %v3854_v30  ;;  %v3860_v34 = vmul.f32 0.0078125, %v3778_v31 }
 0x3df   :  { %v6479_v40 = vpop.eup %6478  ;;  %6498 = vrcp.f32 %v4356_v60  ;;  %v4363_v51 = vadd.f32 1.0, %v6477_v18  ;;  %v3861_v11 = vmul.f32 0.0078125, %v3780_v12 }
 0x3e0   :  { %v6481_v42 = vpop.eup %6480  ;;  %v5283_v14 = vpack.c.bf16 %v4547_v41, %v4546_v44  ;;  %v4545_v59 = vmul.f32 %v6479_v40, %v8259_v27  ;;  %6500 = vrsqrt.f32 %v3911_v1  ;;  %v3920_v1 = vadd.f32 1e-06, %v3856_v52  ;;  %v3774_v18 = vpop.xlane.xlu0 %3773 }
 0x3e1   :  { %v6483_v43 = vpop.eup %6482  ;;  %6502 = vrcp.f32 %v4363_v51  ;;  %v4362_v53 = vadd.f32 1.0, %v6481_v42 }
 0x3e2   :  { %v6485_v39 = vpop.eup %6484  ;;  %5395 = vst [vmem:[#allocation7 + $0x58] sm:$0xff] %v5283_v14   ;;  %v4544_v3 = vmul.f32 %v6483_v43, %v8266_v17  ;;  %6504 = vrsqrt.f32 %v3910_v56  ;;  %v3914_v17 = vadd.f32 1e-06, %v3850_v8  ;;  %v3925_v56 = vadd.f32 1e-06, %v3861_v11 }
 0x3e3   :  { %v6487_v5 = vpop.eup %6486  ;;  %6506 = vrcp.f32 %v4362_v53  ;;  %v4361_v27 = vadd.f32 1.0, %v6485_v39  ;;  %v3858_v43 = vmul.f32 0.0078125, %v3774_v18 }
 0x3e4   :  { %v6489_v2 = vpop.eup %6488  ;;  %v5278_v49 = vpack.c.bf16 %v4545_v59, %v4544_v3  ;;  %v4551_v46 = vmul.f32 %v6487_v5, %v8271_v62  ;;  %6508 = vrsqrt.f32 %v3917_v13  ;;  %v3776_v62 = vpop.xlane.xlu1 %3775  ;;  %v3924_v3 = vadd.f32 1e-06, %v3860_v34 }
 0x3e5   :  { %v6491_v24 = vpop.eup %6490  ;;  %6510 = vrcp.f32 %v4361_v27  ;;  %v4360_v7 = vadd.f32 1.0, %v6489_v2  ;;  %v3859_v4 = vmul.f32 0.0078125, %v3776_v62 }
 0x3e6   :  { %v6493_v36 = vpop.eup %6492  ;;  %5394 = vst [vmem:[#allocation7 + $0x50] sm:$0xff] %v5278_v49   ;;  %v4550_v28 = vmul.f32 %v6491_v24, %v8277_v29  ;;  %6512 = vrsqrt.f32 %v3916_v33  ;;  %v8802_v29 = vld [vmem:[#allocation23_spill] sm:$0xff] }
 0x3e7   :  { %v6495_v26 = vpop.eup %6494  ;;  %6514 = vrcp.f32 %v4360_v7  ;;  %v4041_v15 = vmul.f32 %v6493_v36, %v7844_v55  ;;  %v8360_v33 = vld [vmem:[%s8588_s3] ss:$0 sm:$0xff]  ;;  %v8804_v7 = vld [vmem:[#allocation25_spill] sm:$0xff]  ;;  %s6783_s3 = smov [#allocation7]  }
 0x3e8   :  { %v6497_v20 = vpop.eup %6496  ;;  %v5293_v35 = vpack.c.bf16 %v4551_v46, %v4550_v28  ;;  %v4549_v41 = vmul.f32 %v6495_v26, %v8282_v32  ;;  %6516 = vrsqrt.f32 %v3915_v19  ;;  %v3788_v12 = vpop.xlane.xlu1 %3787  ;;  %v3923_v19 = vadd.f32 1e-06, %v3859_v4  ;;  %s4913_s22 = sshll.u32 %s6783_s3, 4  ;;  %s4914_s22 = int_to_ptr.vmem [resolvable:$true] %s4913_s22 }
 0x3e9   :  { %v6499_v21 = vpop.eup %6498  ;;  %v8346_v60 = vmul.f32 %v8119_v57, %v4041_v15  ;;  %v4040_v63 = vmul.f32 %v6497_v20, %v8802_v29  ;;  %6518 = vrsqrt.f32 %v3914_v17  ;;  %v3865_v49 = vmul.f32 0.0078125, %v3788_v12  ;;  %v8373_v46 = vpop.xlane.xlu0 %3785  ;;  %s6748_s23 = scalar_lea.vmem %s4914_s22, 4096  ;;  %p6753_p3 = scmp.lt.s32.totalorder %s4914_s22, %s4914_s22 }
 0x3ea   :  { %v6501_v44 = vpop.eup %6500  ;;  %5397 = vst [vmem:[#allocation7 + $0x68] sm:$0xff] %v5293_v35   ;;  %v4548_v55 = vmul.f32 %v6499_v21, %v8289_v0  ;;  %6520 = vrsqrt.f32 %v3921_v45  ;;  %v3922_v28 = vadd.f32 1e-06, %v3858_v43  ;;  %v8807_v43 = vld [vmem:[#allocation28_spill] sm:$0xff]  ;;  %p6749_p2 = scmp.ne.s32.totalorder %s4914_s22, %s6748_s23  ;;  %p6754_p4 = scmp.lt.s32.totalorder %s6748_s23, %s6748_s23 }
 0x3eb   :  { %v6503_v40 = vpop.eup %6502  ;;  %v5068_v32 = vmul.f32 -1.442695, %v8346_v60  ;;  %v8352_v51 = vmul.f32 %v8119_v57, %v4040_v63  ;;  %v4039_v42 = vmul.f32 %v6501_v44, %v7851_v25  ;;  %6522 = vrsqrt.f32 %v3920_v1  ;;  %v8803_v25 = vld [vmem:[#allocation24_spill] sm:$0xff] }
 0x3ec   :  { %v6505_v14 = vpop.eup %6504  ;;  %v5288_v59 = vpack.c.bf16 %v4549_v41, %v4548_v55  ;;  %v4555_v13 = vmul.f32 %v6503_v40, %v8296_v10  ;;  %6524 = vrsqrt.f32 %v3919_v61  ;;  %v8805_v61 = vld [vmem:[#allocation26_spill] sm:$0xff]  ;;  %v3929_v20 = vadd.f32 1e-06, %v3865_v49  ;;  %p6755_p5 = por %p6754_p4, %p6753_p3 }
 0x3ed   :  { %v6507_v53 = vpop.eup %6506  ;;  %6526 = vpow2.f32 %v5068_v32  ;;  %v5067_v0 = vmul.f32 -1.442695, %v8352_v51  ;;  %v8363_v57 = vmul.f32 %v8360_v33, %v4039_v42  ;;  %v4038_v8 = vmul.f32 %v6505_v14, %v8803_v25  ;;  %v8396_v34 = vpop.xlane.xlu0 %3781 }
 0x3ee   :  { %v6509_v39 = vpop.eup %6508  ;;  %5396 = vst [vmem:[#allocation7 + $0x60] sm:$0xff] %v5288_v59   ;;  %v4554_v10 = vmul.f32 %v6507_v53, %v8301_v58  ;;  %6528 = vrsqrt.f32 %v3918_v38  ;;  %v8407_v42 = vpop.xlane.xlu1 %3783  ;;  %p6756_p6 = pnand %p6755_p5, %p6749_p2 }
 0x3ef   :  { %v6511_v50 = vpop.eup %6510  ;;  %6530 = vpow2.f32 %v5067_v0  ;;  %v5066_v5 = vmul.f32 -1.442695, %v8363_v57  ;;  %v8369_v27 = vmul.f32 %v8360_v33, %v4038_v8  ;;  %v4045_v52 = vmul.f32 %v6509_v39, %v7882_v9 }
 0x3f0   :  { %v6513_v23 = vpop.eup %6512  ;;  %v5303_v31 = vpack.c.bf16 %v4555_v13, %v4554_v10  ;;  %v4553_v2 = vmul.f32 %v6511_v50, %v8310_v54  ;;  %6532 = vrsqrt.f32 %v3925_v56 }
 0x3f1   :  { %v6515_v58 = vpop.eup %6514  ;;  %6534 = vpow2.f32 %v5066_v5  ;;  %v5065_v30 = vmul.f32 -1.442695, %v8369_v27  ;;  %v8377_v24 = vmul.f32 %v8360_v33, %v4045_v52  ;;  %v4044_v17 = vmul.f32 %v6513_v23, %v8804_v7  ;;  %v8808_v23 = vld [vmem:[#allocation29_spill] sm:$0xff] }
 0x3f2   :  { %v6517_v36 = vpop.eup %6516  ;;  %5399 = vst [vmem:[#allocation7 + $0x78] sm:$0xff] %v5303_v31   ;;  %v4552_v9 = vmul.f32 %v6515_v58, %v8318_v48  ;;  %6536 = vrsqrt.f32 %v3924_v3  ;;  %v8426_v58 = vpop.xlane.xlu1 %3795 }
 0x3f3   :  { %v6519_v54 = vpop.eup %6518  ;;  %6538 = vpow2.f32 %v5065_v30  ;;  %v5072_v45 = vmul.f32 -1.442695, %v8377_v24  ;;  %v8383_v11 = vmul.f32 %v8360_v33, %v4044_v17  ;;  %v4043_v26 = vmul.f32 %v6517_v36, %v7889_v6  ;;  %v8806_v6 = vld [vmem:[#allocation27_spill] sm:$0xff] }
 0x3f4   :  { %v6521_v15 = vpop.eup %6520  ;;  %v5298_v1 = vpack.c.bf16 %v4553_v2, %v4552_v9  ;;  %v4042_v62 = vmul.f32 %v6519_v54, %v8805_v61  ;;  %6540 = vrsqrt.f32 %v3923_v19  ;;  %v8419_v19 = vpop.xlane.xlu0 %3793 }
 0x3f5   :  { %v6523_v35 = vpop.eup %6522  ;;  %6542 = vpow2.f32 %v5072_v45  ;;  %v5071_v48 = vmul.f32 -1.442695, %v8383_v11  ;;  %v8389_v41 = vmul.f32 %v8360_v33, %v4043_v26  ;;  %v4049_v38 = vmul.f32 %v6521_v15, %v7920_v47  ;;  %v8809_v26 = vld [vmem:[#allocation30_spill] sm:$0xff] }
 0x3f6   :  { %v6525_v21 = vpop.eup %6524  ;;  %5398 = vst [vmem:[#allocation7 + $0x70] sm:$0xff] %v5298_v1   ;;  %v8393_v29 = vmul.f32 %v8360_v33, %v4042_v62  ;;  %v4048_v63 = vmul.f32 %v6523_v35, %v8806_v6  ;;  %6544 = vrsqrt.f32 %v3922_v28 }
 0x3f7   :  { %v6527_v18 = vpop.eup %6526  ;;  %6546 = vpow2.f32 %v5071_v48  ;;  %v5070_v44 = vmul.f32 -1.442695, %v8389_v41  ;;  %v8400_v55 = vmul.f32 %v8360_v33, %v4049_v38  ;;  %v4047_v56 = vmul.f32 %v6525_v21, %v7927_v16  ;;  %v8810_v48 = vld [vmem:[#allocation31_spill] sm:$0xff] }
 0x3f8   :  { %v6529_v47 = vpop.eup %6528  ;;  %v4367_v4 = vadd.f32 1.0, %v6527_v18  ;;  %v5069_v40 = vmul.f32 -1.442695, %v8393_v29  ;;  %v8405_v32 = vmul.f32 %v8360_v33, %v4048_v63  ;;  %6548 = vrsqrt.f32 %v3929_v20  ;;  %v8438_v62 = vpop.xlane.xlu0 %3789 }
 0x3f9   :  { %v6531_v14 = vpop.eup %6530  ;;  %6550 = vpow2.f32 %v5070_v44  ;;  %v5076_v59 = vmul.f32 -1.442695, %v8400_v55  ;;  %v8411_v13 = vmul.f32 %v8360_v33, %v4047_v56  ;;  %v4046_v53 = vmul.f32 %v6529_v47, %v8807_v43  ;;  %v3792_v63 = vpop.xlane.xlu1 %3791 }
 0x3fa   :  { %v6533_v16 = vpop.eup %6532  ;;  %6552 = vrcp.f32 %v4367_v4  ;;  %v4366_v0 = vadd.f32 1.0, %v6531_v14  ;;  %v5075_v8 = vmul.f32 -1.442695, %v8405_v32 }
 0x3fb   :  { %v6535_v25 = vpop.eup %6534  ;;  %6554 = vpow2.f32 %v5069_v40  ;;  %v8416_v12 = vmul.f32 %v8360_v33, %v4046_v53  ;;  %v4053_v39 = vmul.f32 %v6533_v16, %v7958_v22  ;;  %v5074_v5 = vmul.f32 -1.442695, %v8411_v13 }
 0x3fc   :  { %v6537_v10 = vpop.eup %6536  ;;  %6556 = vrcp.f32 %v4366_v0  ;;  %v4365_v3 = vadd.f32 1.0, %v6535_v25  ;;  %v3864_v53 = vmul.f32 0.0078125, %v8373_v46  ;;  %v3863_v0 = vmul.f32 0.0078125, %v8407_v42  ;;  %v8454_v25 = vpop.xlane.xlu0 %3801 }
 0x3fd   :  { %v6539_v50 = vpop.eup %6538  ;;  %6558 = vpow2.f32 %v5076_v59  ;;  %v8423_v52 = vmul.f32 %v8360_v33, %v4053_v39  ;;  %v4052_v31 = vmul.f32 %v6537_v10, %v8808_v23  ;;  %v5073_v30 = vmul.f32 -1.442695, %v8416_v12 }
 0x3fe   :  { %v6541_v2 = vpop.eup %6540  ;;  %6560 = vrcp.f32 %v4365_v3  ;;  %v4364_v49 = vadd.f32 1.0, %v6539_v50  ;;  %v3862_v42 = vmul.f32 0.0078125, %v8396_v34 }
 0x3ff   :  { %v6543_v22 = vpop.eup %6542  ;;  %6562 = vpow2.f32 %v5075_v8  ;;  %v8430_v7 = vmul.f32 %v8360_v33, %v4052_v31  ;;  %v4051_v17 = vmul.f32 %v6541_v2, %v7965_v37  ;;  %v5080_v54 = vmul.f32 -1.442695, %v8423_v52 }
 0x400   :  { %v6545_v36 = vpop.eup %6544  ;;  %6564 = vrcp.f32 %v4364_v49  ;;  %v4371_v9 = vadd.f32 1.0, %v6543_v22  ;;  %v3928_v31 = vadd.f32 1e-06, %v3864_v53  ;;  %v3927_v22 = vadd.f32 1e-06, %v3863_v0 }
 0x401   :  { %v6547_v28 = vpop.eup %6546  ;;  %6566 = vpow2.f32 %v5074_v5  ;;  %v8435_v45 = vmul.f32 %v8360_v33, %v4051_v17  ;;  %v4050_v15 = vmul.f32 %v6545_v36, %v8809_v26  ;;  %v5079_v37 = vmul.f32 -1.442695, %v8430_v7  ;;  %v3804_v5 = vpop.xlane.xlu1 %3803 }
 0x402   :  { %v6549_v1 = vpop.eup %6548  ;;  %6568 = vrcp.f32 %v4371_v9  ;;  %v4370_v61 = vadd.f32 1.0, %v6547_v28  ;;  %v3869_v36 = vmul.f32 0.0078125, %v8426_v58  ;;  %v3926_v34 = vadd.f32 1e-06, %v3862_v42 }
 0x403   :  { %v6551_v20 = vpop.eup %6550  ;;  %6570 = vpow2.f32 %v5073_v30  ;;  %v8442_v35 = vmul.f32 %v8360_v33, %v4050_v15  ;;  %v4057_v38 = vmul.f32 %v6549_v1, %v8810_v48  ;;  %v5078_v56 = vmul.f32 -1.442695, %v8435_v45 }
 0x404   :  { %v6553_v21 = vpop.eup %6552  ;;  %6572 = vrcp.f32 %v4370_v61  ;;  %v4369_v6 = vadd.f32 1.0, %v6551_v20  ;;  %v3868_v15 = vmul.f32 0.0078125, %v8419_v19  ;;  %v3867_v20 = vmul.f32 0.0078125, %v3792_v63 }
 0x405   :  { %v6555_v18 = vpop.eup %6554  ;;  %v4559_v44 = vmul.f32 %v6553_v21, %v8346_v60  ;;  %6574 = vpow2.f32 %v5080_v54  ;;  %v8448_v47 = vmul.f32 %v8360_v33, %v4057_v38  ;;  %v5077_v43 = vmul.f32 -1.442695, %v8442_v35  ;;  %v3798_v54 = vpop.xlane.xlu0 %3797 }
 0x406   :  { %v6557_v4 = vpop.eup %6556  ;;  %6576 = vrcp.f32 %v4369_v6  ;;  %v4368_v40 = vadd.f32 1.0, %v6555_v18  ;;  %v3933_v38 = vadd.f32 1e-06, %v3869_v36  ;;  %v3932_v19 = vadd.f32 1e-06, %v3868_v15 }
 0x407   :  { %v6559_v14 = vpop.eup %6558  ;;  %v4558_v59 = vmul.f32 %v6557_v4, %v8352_v51  ;;  %6578 = vpow2.f32 %v5079_v37  ;;  %v5084_v3 = vmul.f32 -1.442695, %v8448_v47  ;;  %v3931_v4 = vadd.f32 1e-06, %v3867_v20  ;;  %v8813_v20 = vld [vmem:[#allocation34_spill] sm:$0xff] }
 0x408   :  { %v6561_v16 = vpop.eup %6560  ;;  %6580 = vrcp.f32 %v4368_v40  ;;  %v4375_v60 = vadd.f32 1.0, %v6559_v14  ;;  %v3873_v40 = vmul.f32 0.0078125, %v3804_v5  ;;  %v3872_v53 = vmul.f32 0.0078125, %v8454_v25 }
 0x409   :  { %v6563_v8 = vpop.eup %6562  ;;  %v5313_v39 = vpack.c.bf16 %v4559_v44, %v4558_v59  ;;  %v4557_v10 = vmul.f32 %v6561_v16, %v8363_v57  ;;  %6582 = vpow2.f32 %v5078_v56  ;;  %v3866_v44 = vmul.f32 0.0078125, %v8438_v62  ;;  %v3806_v14 = vpop.xlane.xlu0 %3805 }
 0x40a   :  { %v6565_v51 = vpop.eup %6564  ;;  %6584 = vrcp.f32 %v4375_v60  ;;  %v4374_v50 = vadd.f32 1.0, %v6563_v8 }
 0x40b   :  { %v6567_v23 = vpop.eup %6566  ;;  %5401 = vst [vmem:[#allocation7 + $0x88] sm:$0xff] %v5313_v39   ;;  %v4556_v46 = vmul.f32 %v6565_v51, %v8369_v27  ;;  %6586 = vpow2.f32 %v5077_v43  ;;  %v3930_v39 = vadd.f32 1e-06, %v3866_v44  ;;  %v3937_v51 = vadd.f32 1e-06, %v3873_v40 }
 0x40c   :  { %v6569_v2 = vpop.eup %6568  ;;  %6588 = vrcp.f32 %v4374_v50  ;;  %v4373_v49 = vadd.f32 1.0, %v6567_v23  ;;  %v3936_v23 = vadd.f32 1e-06, %v3872_v53 }
 0x40d   :  { %v6571_v57 = vpop.eup %6570  ;;  %v5308_v30 = vpack.c.bf16 %v4557_v10, %v4556_v46  ;;  %v4563_v17 = vmul.f32 %v6569_v2, %v8377_v24  ;;  %6590 = vpow2.f32 %v5084_v3  ;;  %v3800_v24 = vpop.xlane.xlu1 %3799  ;;  %v3870_v10 = vmul.f32 0.0078125, %v3798_v54 }
 0x40e   :  { %v6573_v9 = vpop.eup %6572  ;;  %6592 = vrcp.f32 %v4373_v49  ;;  %v4372_v28 = vadd.f32 1.0, %v6571_v57  ;;  %v3871_v60 = vmul.f32 0.0078125, %v3800_v24  ;;  %v3810_v49 = vpop.xlane.xlu0 %3809 }
 0x40f   :  { %v6575_v27 = vpop.eup %6574  ;;  %5400 = vst [vmem:[#allocation7 + $0x80] sm:$0xff] %v5308_v30   ;;  %v4562_v26 = vmul.f32 %v6573_v9, %v8383_v11  ;;  %6594 = vrsqrt.f32 %v3928_v31  ;;  %v8811_v31 = vld [vmem:[#allocation32_spill] sm:$0xff]  ;;  %v3934_v57 = vadd.f32 1e-06, %v3870_v10  ;;  %v8812_v9 = vld [vmem:[#allocation33_spill] sm:$0xff]  ;;  %v3876_v15 = vmul.f32 0.0078125, %v3810_v49 }
 0x410   :  { %v6577_v1 = vpop.eup %6576  ;;  %6596 = vrcp.f32 %v4372_v28  ;;  %v4379_v61 = vadd.f32 1.0, %v6575_v27  ;;  %v3935_v2 = vadd.f32 1e-06, %v3871_v60 }
 0x411   :  { %v6579_v37 = vpop.eup %6578  ;;  %v5323_v48 = vpack.c.bf16 %v4563_v17, %v4562_v26  ;;  %v4561_v58 = vmul.f32 %v6577_v1, %v8389_v41  ;;  %6598 = vrsqrt.f32 %v3927_v22  ;;  %v3808_v0 = vpop.xlane.xlu1 %3807 }
 0x412   :  { %v6581_v21 = vpop.eup %6580  ;;  %6600 = vrcp.f32 %v4379_v61  ;;  %v4378_v6 = vadd.f32 1.0, %v6579_v37  ;;  %v3875_v30 = vmul.f32 0.0078125, %v3808_v0 }
 0x413   :  { %v6583_v18 = vpop.eup %6582  ;;  %5403 = vst [vmem:[#allocation7 + $0x98] sm:$0xff] %v5323_v48   ;;  %v4560_v11 = vmul.f32 %v6581_v21, %v8393_v29  ;;  %6602 = vrsqrt.f32 %v3926_v34 }
 0x414   :  { %v6585_v56 = vpop.eup %6584  ;;  %6604 = vrcp.f32 %v4378_v6  ;;  %v4377_v63 = vadd.f32 1.0, %v6583_v18  ;;  %v8814_v18 = vld [vmem:[#allocation35_spill] sm:$0xff] }
 0x415   :  { %v6587_v41 = vpop.eup %6586  ;;  %v5318_v59 = vpack.c.bf16 %v4561_v58, %v4560_v11  ;;  %v4567_v43 = vmul.f32 %v6585_v56, %v8400_v55  ;;  %6606 = vrsqrt.f32 %v3933_v38  ;;  %v3874_v55 = vmul.f32 0.0078125, %v3806_v14  ;;  %v3812_v54 = vpop.xlane.xlu1 %3811  ;;  %v8815_v14 = vld [vmem:[#allocation36_spill] sm:$0xff] }
 0x416   :  { %v6589_v16 = vpop.eup %6588  ;;  %6608 = vrcp.f32 %v4377_v63  ;;  %v4376_v29 = vadd.f32 1.0, %v6587_v41  ;;  %v3939_v58 = vadd.f32 1e-06, %v3875_v30  ;;  %v3877_v38 = vmul.f32 0.0078125, %v3812_v54 }
 0x417   :  { %v8469_v8 = vpop.eup %6590  ;;  %5402 = vst [vmem:[#allocation7 + $0x90] sm:$0xff] %v5318_v59   ;;  %v4566_v62 = vmul.f32 %v6589_v16, %v8405_v32  ;;  %6610 = vrsqrt.f32 %v3932_v19  ;;  %v3938_v28 = vadd.f32 1e-06, %v3874_v55  ;;  %v3940_v63 = vadd.f32 1e-06, %v3876_v15 }
 0x418   :  { %v6593_v3 = vpop.eup %6592  ;;  %6612 = vrcp.f32 %v4376_v29  ;;  %v3941_v53 = vadd.f32 1e-06, %v3877_v38  ;;  %v8816_v29 = vld [vmem:[#allocation37_spill] sm:$0xff] }
 0x419   :  { %v6595_v50 = vpop.eup %6594  ;;  %v5333_v5 = vpack.c.bf16 %v4567_v43, %v4566_v62  ;;  %v4565_v25 = vmul.f32 %v6593_v3, %v8411_v13  ;;  %6614 = vrsqrt.f32 %v3931_v4 }
 0x41a   :  { %v6597_v46 = vpop.eup %6596  ;;  %v4056_v42 = vmul.f32 %v6595_v50, %v8811_v31  ;;  %6616 = vrsqrt.f32 %v3930_v39  ;;  %v4383_v39 = vadd.f32 1.0, %v8469_v8  ;;  %v8819_v31 = vld [vmem:[#allocation40_spill] sm:$0xff] }
 0x41b   :  { %v6599_v22 = vpop.eup %6598  ;;  %5405 = vst [vmem:[#allocation7 + $0xa8] sm:$0xff] %v5333_v5   ;;  %v4564_v32 = vmul.f32 %v6597_v46, %v8416_v12  ;;  %6618 = vrsqrt.f32 %v3937_v51  ;;  %v8817_v51 = vld [vmem:[#allocation38_spill] sm:$0xff]  ;;  %v8818_v5 = vld [vmem:[#allocation39_spill] sm:$0xff] }
 0x41c   :  { %v6601_v17 = vpop.eup %6600  ;;  %v8476_v36 = vmul.f32 %v8360_v33, %v4056_v42  ;;  %v4055_v13 = vmul.f32 %v6599_v22, %v8812_v9  ;;  %6620 = vrsqrt.f32 %v3936_v23  ;;  %v8820_v22 = vld [vmem:[#allocation41_spill] sm:$0xff]  ;;  %v8821_v9 = vld [vmem:[#allocation42_spill] sm:$0xff] }
 0x41d   :  { %v6603_v27 = vpop.eup %6602  ;;  %v5328_v26 = vpack.c.bf16 %v4565_v25, %v4564_v32  ;;  %v4571_v34 = vmul.f32 %v6601_v17, %v8423_v52  ;;  %6622 = vrsqrt.f32 %v3935_v2 }
 0x41e   :  { %v6605_v1 = vpop.eup %6604  ;;  %v5083_v12 = vmul.f32 -1.442695, %v8476_v36  ;;  %v8482_v61 = vmul.f32 %v8360_v33, %v4055_v13  ;;  %v4054_v24 = vmul.f32 %v6603_v27, %v8813_v20  ;;  %6624 = vrsqrt.f32 %v3934_v57 }
 0x41f   :  { %v6607_v37 = vpop.eup %6606  ;;  %5404 = vst [vmem:[#allocation7 + $0xa0] sm:$0xff] %v5328_v26   ;;  %v4570_v48 = vmul.f32 %v6605_v1, %v8430_v7 }
 0x420   :  { %v6609_v21 = vpop.eup %6608  ;;  %6626 = vpow2.f32 %v5083_v12  ;;  %v5082_v52 = vmul.f32 -1.442695, %v8482_v61  ;;  %v8488_v6 = vmul.f32 %v8360_v33, %v4054_v24  ;;  %v4061_v11 = vmul.f32 %v6607_v37, %v8814_v18  ;;  %v8822_v12 = vld [vmem:[#allocation43_spill] sm:$0xff] }
 0x421   :  { %v6611_v19 = vpop.eup %6610  ;;  %v5343_v44 = vpack.c.bf16 %v4571_v34, %v4570_v48  ;;  %v4569_v56 = vmul.f32 %v6609_v21, %v8435_v45  ;;  %6628 = vrsqrt.f32 %v3938_v28  ;;  %v8823_v21 = vld [vmem:[#allocation44_spill] sm:$0xff] }
 0x422   :  { %v6613_v4 = vpop.eup %6612  ;;  %6630 = vpow2.f32 %v5082_v52  ;;  %v5081_v7 = vmul.f32 -1.442695, %v8488_v6  ;;  %v8494_v40 = vmul.f32 %v8360_v33, %v4061_v11  ;;  %v4060_v41 = vmul.f32 %v6611_v19, %v8815_v14 }
 0x423   :  { %v6615_v59 = vpop.eup %6614  ;;  %5407 = vst [vmem:[#allocation7 + $0xb8] sm:$0xff] %v5343_v44   ;;  %v4568_v43 = vmul.f32 %v6613_v4, %v8442_v35  ;;  %6632 = vrsqrt.f32 %v3939_v58 }
 0x424   :  { %6634 = vpow2.f32 %v5081_v7  ;;  %v5088_v45 = vmul.f32 -1.442695, %v8494_v40  ;;  %v8500_v16 = vmul.f32 %v8360_v33, %v4060_v41  ;;  %v4059_v60 = vmul.f32 %v6615_v59, %v8816_v29  ;;  %v6617_v0 = vpop.eup %6616 }
 0x425   :  { %v5338_v62 = vpack.c.bf16 %v4569_v56, %v4568_v43  ;;  %6636 = vrsqrt.f32 %v3940_v63  ;;  %v6619_v10 = vpop.eup %6618  ;;  %v4058_v55 = vmul.f32 %v6617_v0, %v8817_v51  ;;  %v8824_v63 = vld [vmem:[#allocation45_spill] sm:$0xff] }
 0x426   :  { %6638 = vpow2.f32 %v5088_v45  ;;  %v5087_v3 = vmul.f32 -1.442695, %v8500_v16  ;;  %v8506_v35 = vmul.f32 %v8360_v33, %v4059_v60  ;;  %v6621_v50 = vpop.eup %6620  ;;  %v4065_v25 = vmul.f32 %v6619_v10, %v8818_v5 }
 0x427   :  { %5406 = vst [vmem:[#allocation7 + $0xb0] sm:$0xff] %v5338_v62   ;;  %6640 = vrsqrt.f32 %v3941_v53  ;;  %v6623_v23 = vpop.eup %6622  ;;  %v8512_v8 = vmul.f32 %v8360_v33, %v4058_v55  ;;  %v4064_v42 = vmul.f32 %v6621_v50, %v8819_v31  ;;  %v8825_v53 = vld [vmem:[#allocation46_spill] sm:$0xff] }
 0x428   :  { %6642 = vpow2.f32 %v5087_v3  ;;  %v5086_v46 = vmul.f32 -1.442695, %v8506_v35  ;;  %v6625_v2 = vpop.eup %6624  ;;  %v8516_v49 = vmul.f32 %v8360_v33, %v4065_v25  ;;  %v4063_v32 = vmul.f32 %v6623_v23, %v8820_v22 }
 0x429   :  { %6644 = vrcp.f32 %v4383_v39  ;;  %v5085_v30 = vmul.f32 -1.442695, %v8512_v8  ;;  %v8521_v17 = vmul.f32 %v8360_v33, %v4064_v42  ;;  %v4062_v13 = vmul.f32 %v6625_v2, %v8821_v9 }
 0x42a   :  { %v6627_v57 = vpop.eup %6626  ;;  %6646 = vpow2.f32 %v5086_v46  ;;  %v5092_v27 = vmul.f32 -1.442695, %v8516_v49  ;;  %v8526_v26 = vmul.f32 %v8360_v33, %v4063_v32 }
 0x42b   :  { %v6629_v28 = vpop.eup %6628  ;;  %v4382_v54 = vadd.f32 1.0, %v6627_v57  ;;  %6648 = vpow2.f32 %v5085_v30  ;;  %v5091_v15 = vmul.f32 -1.442695, %v8521_v17  ;;  %v8530_v1 = vmul.f32 %v8360_v33, %v4062_v13 }
 0x42c   :  { %v6631_v34 = vpop.eup %6630  ;;  %v4066_v20 = vmul.f32 %v6629_v28, %v8822_v12  ;;  %v5090_v58 = vmul.f32 -1.442695, %v8526_v26 }
 0x42d   :  { %v6633_v24 = vpop.eup %6632  ;;  %6650 = vrcp.f32 %v4382_v54  ;;  %v4381_v37 = vadd.f32 1.0, %v6631_v34  ;;  %v5089_v44 = vmul.f32 -1.442695, %v8530_v1 }
 0x42e   :  { %v6635_v48 = vpop.eup %6634  ;;  %6652 = vpow2.f32 %v5092_v27  ;;  %v8535_v38 = vmul.f32 %v8360_v33, %v4066_v20  ;;  %v4067_v52 = vmul.f32 %v6633_v24, %v8823_v21 }
 0x42f   :  { %v6637_v18 = vpop.eup %6636  ;;  %6654 = vrcp.f32 %v4381_v37  ;;  %v4380_v11 = vadd.f32 1.0, %v6635_v48 }
 0x430   :  { %v6639_v19 = vpop.eup %6638  ;;  %6656 = vpow2.f32 %v5091_v15  ;;  %v8540_v56 = vmul.f32 %v8360_v33, %v4067_v52  ;;  %v4068_v4 = vmul.f32 %v6637_v18, %v8824_v63  ;;  %v5093_v59 = vmul.f32 -1.442695, %v8535_v38 }
 0x431   :  { %v6641_v7 = vpop.eup %6640  ;;  %6658 = vrcp.f32 %v4380_v11  ;;  %v4387_v14 = vadd.f32 1.0, %v6639_v19 }
 0x432   :  { %v6643_v41 = vpop.eup %6642  ;;  %6660 = vpow2.f32 %v5090_v58  ;;  %v8545_v43 = vmul.f32 %v8360_v33, %v4068_v4  ;;  %v4069_v45 = vmul.f32 %v6641_v7, %v8825_v53  ;;  %v5094_v62 = vmul.f32 -1.442695, %v8540_v56 }
 0x433   :  { %v6645_v29 = vpop.eup %6644  ;;  %6662 = vrcp.f32 %v4387_v14  ;;  %v4386_v60 = vadd.f32 1.0, %v6643_v41 }
 0x434   :  { %v6647_v0 = vpop.eup %6646  ;;  %6664 = vpow2.f32 %v5089_v44  ;;  %v8550_v39 = vmul.f32 %v8360_v33, %v4069_v45  ;;  %v4575_v51 = vmul.f32 %v6645_v29, %v8448_v47  ;;  %v5095_v55 = vmul.f32 -1.442695, %v8545_v43 }
 0x435   :  { %6666 = vrcp.f32 %v4386_v60  ;;  %v4385_v10 = vadd.f32 1.0, %v6647_v0  ;;  %v6649_v3 = vpop.eup %6648 }
 0x436   :  { %6668 = vpow2.f32 %v5093_v59  ;;  %v4384_v5 = vadd.f32 1.0, %v6649_v3  ;;  %v5096_v46 = vmul.f32 -1.442695, %v8550_v39 }
 0x437   :  { %v6651_v50 = vpop.eup %6650  ;;  %6670 = vrcp.f32 %v4385_v10 }
 0x438   :  { %v6653_v25 = vpop.eup %6652  ;;  %v4574_v23 = vmul.f32 %v6651_v50, %v8476_v36  ;;  %6672 = vpow2.f32 %v5094_v62 }
 0x439   :  { %v6655_v31 = vpop.eup %6654  ;;  %6674 = vrcp.f32 %v4384_v5  ;;  %v4391_v33 = vadd.f32 1.0, %v6653_v25 }
 0x43a   :  { %v6657_v42 = vpop.eup %6656  ;;  %v5353_v2 = vpack.c.bf16 %v4575_v51, %v4574_v23  ;;  %v4573_v22 = vmul.f32 %v6655_v31, %v8482_v61  ;;  %6676 = vpow2.f32 %v5095_v55 }
 0x43b   :  { %v6659_v47 = vpop.eup %6658  ;;  %6678 = vrcp.f32 %v4391_v33  ;;  %v4390_v32 = vadd.f32 1.0, %v6657_v42 }
 0x43c   :  { %v6661_v57 = vpop.eup %6660  ;;  %5409 = vst [vmem:[#allocation7 + $0xc8] sm:$0xff] %v5353_v2   ;;  %v4572_v30 = vmul.f32 %v6659_v47, %v8488_v6  ;;  %6680 = vpow2.f32 %v5096_v46 }
 0x43d   :  { %v6663_v36 = vpop.eup %6662  ;;  %6682 = vrcp.f32 %v4390_v32  ;;  %v4389_v9 = vadd.f32 1.0, %v6661_v57 }
 0x43e   :  { %v6665_v13 = vpop.eup %6664  ;;  %v5348_v28 = vpack.c.bf16 %v4573_v22, %v4572_v30  ;;  %v4579_v54 = vmul.f32 %v6663_v36, %v8494_v40 }
 0x43f   :  { %v6667_v27 = vpop.eup %6666  ;;  %6684 = vrcp.f32 %v4389_v9  ;;  %v4388_v34 = vadd.f32 1.0, %v6665_v13 }
 0x440   :  { %v6669_v61 = vpop.eup %6668  ;;  %5408 = vst [vmem:[#allocation7 + $0xc0] sm:$0xff] %v5348_v28   ;;  %v4578_v15 = vmul.f32 %v6667_v27, %v8500_v16 }
 0x441   :  { %v6671_v12 = vpop.eup %6670  ;;  %6686 = vrcp.f32 %v4388_v34  ;;  %v4392_v20 = vadd.f32 1.0, %v6669_v61 }
 0x442   :  { %v6673_v24 = vpop.eup %6672  ;;  %v5363_v6 = vpack.c.bf16 %v4579_v54, %v4578_v15  ;;  %v4577_v37 = vmul.f32 %v6671_v12, %v8506_v35 }
 0x443   :  { %v6675_v48 = vpop.eup %6674  ;;  %6688 = vrcp.f32 %v4392_v20  ;;  %v4393_v58 = vadd.f32 1.0, %v6673_v24 }
 0x444   :  { %v6677_v21 = vpop.eup %6676  ;;  %5411 = vst [vmem:[#allocation7 + $0xd8] sm:$0xff] %v5363_v6   ;;  %v4576_v40 = vmul.f32 %v6675_v48, %v8512_v8 }
 0x445   :  { %v6679_v52 = vpop.eup %6678  ;;  %6690 = vrcp.f32 %v4393_v58  ;;  %v4394_v18 = vadd.f32 1.0, %v6677_v21 }
 0x446   :  { %v6681_v11 = vpop.eup %6680  ;;  %v5358_v19 = vpack.c.bf16 %v4577_v37, %v4576_v40  ;;  %v4583_v16 = vmul.f32 %v6679_v52, %v8516_v49 }
 0x447   :  { %v6683_v44 = vpop.eup %6682  ;;  %6692 = vrcp.f32 %v4394_v18  ;;  %v4395_v63 = vadd.f32 1.0, %v6681_v11 }
 0x448   :  { %5410 = vst [vmem:[#allocation7 + $0xd0] sm:$0xff] %v5358_v19   ;;  %v4582_v35 = vmul.f32 %v6683_v44, %v8521_v17 }
 0x449   :  { %v6685_v4 = vpop.eup %6684  ;;  %6694 = vrcp.f32 %v4395_v63 }
 0x44a   :  { %v5373_v7 = vpack.c.bf16 %v4583_v16, %v4582_v35  ;;  %v4581_v14 = vmul.f32 %v6685_v4, %v8526_v26 }
 0x44b   :  { %v6687_v41 = vpop.eup %6686 }
 0x44c   :  { %5413 = vst [vmem:[#allocation7 + $0xe8] sm:$0xff] %v5373_v7   ;;  %v4580_v8 = vmul.f32 %v6687_v41, %v8530_v1 }
 0x44d   :  { %v6689_v59 = vpop.eup %6688 }
 0x44e   :  { %v5368_v53 = vpack.c.bf16 %v4581_v14, %v4580_v8  ;;  %v4584_v45 = vmul.f32 %v6689_v59, %v8535_v38 }
 0x44f   :  { %v6691_v49 = vpop.eup %6690 }
 0x450   :  { %5412 = vst [vmem:[#allocation7 + $0xe0] sm:$0xff] %v5368_v53   ;;  %v4585_v29 = vmul.f32 %v6691_v49, %v8540_v56 }
 0x451   :  { %v6693_v60 = vpop.eup %6692 }
 0x452   :  { %v5378_v0 = vpack.c.bf16 %v4585_v29, %v4584_v45  ;;  %v4586_v17 = vmul.f32 %v6693_v60, %v8545_v43 }
 0x453   :  { %v6695_v62 = vpop.eup %6694 }
 0x454   :  { %5414 = vst [vmem:[#allocation7 + $0xf0] sm:$0xff] %v5378_v0   ;;  %v4587_v26 = vmul.f32 %v6695_v62, %v8550_v39 }
 0x456   :  { %v5383_v10 = vpack.c.bf16 %v4587_v26, %v4586_v17 }
 0x458   :  { %5415 = vst [vmem:[#allocation7 + $0xf8] sm:$0xff] %v5383_v10  }
 0x459   :  { %6759 = shalt.err (!%p6756_p6)
}
 0x45a   :  { %s6760_s28 = scalar_lea.hbm %s8589_s4, 4096 }
 0x45b   :  { %p6761_p7 = scmp.ne.s32.totalorder %s8589_s4, %s6760_s28  ;;  %p6764_p8 = scmp.lt.u32.totalorder %s6760_s28, %s8589_s4 }
 0x45d   :  { %p6766_p9 = pnand %p6764_p8, %p6761_p7 }
 0x45f   :  { %6769 = shalt.err (!%p6766_p9)
}
 0x460   :  { %4919 = dma.vmem_to_hbm [thread:$0]  %s4914_s22, 4096, %s8589_s4, [#allocation4], %s6777_s25, %s6777_s25, %s6778_s26  }
 0x461   :  { %6774 = dma.done.wait [#allocation4], 4096  }
 0x462   :  { %6775 = vsyncadd [#allocation4], 4294963200 }
 0x463   :  { %4923 = vsyncpa [#allocation3], 1 }
 0x464   :  { %4924 = vsyncpa [#allocation6], 1 }
 0x465   :  { %4925 = vsyncpa [#allocation4], 1 }

</bundles_post_ra>
